<compile_context>
chip_gen: v5e
topology: v5e:2x2
jax: 0.10.0
libtpu: 0.0.40
codegen_flags: <defaults>
</compile_context>

<pallas_src>
import math
import functools

import jax
import jax.numpy as jnp
from jax.experimental import pallas as pl
from jax.experimental.pallas import tpu as pltpu


MASK_VALUE = -1e30  # additive mask for cross-window score positions; exp() underflows to 0


# ----------------------------------------------------------------------------
# Pallas kernel: one grid step = P packed windows (M = P*N rows).
# ----------------------------------------------------------------------------
def window_attn_kernel(x_ref, wqkv_ref, bqkv_ref, biasmask_ref, wproj_ref, bproj_ref,
                       o_ref, *, num_heads, exact_divide):
    """Refs:
      x_ref:        (M, C)        activations (input dtype; bf16 ok)
      wqkv_ref:     (3, H, C, hd) head-split qkv weights (q block pre-scaled by 1/sqrt(hd))
      bqkv_ref:     (3, H, 1, hd) head-split qkv biases, f32 (q block pre-scaled)
      biasmask_ref: (H, M, M)     rel-pos bias on diagonal window blocks, MASK_VALUE elsewhere
      wproj_ref:    (H, hd, C)    output projection, split along head input blocks
      bproj_ref:    (1, C)        output projection bias, f32
      o_ref:        (M, C)
    """
    M, C = x_ref.shape
    H = num_heads

    x = x_ref[...]                       # (M, C)
    in_dtype = x.dtype

    acc = jnp.zeros((M, C), jnp.float32)
    for h in range(H):                   # H is small & static: a few MXU calls per head
        # Per-head projections straight from head-split weights (no lane slicing of activations).
        q = jnp.dot(x, wqkv_ref[0, h], preferred_element_type=jnp.float32) + bqkv_ref[0, h]
        k = jnp.dot(x, wqkv_ref[1, h], preferred_element_type=jnp.float32) + bqkv_ref[1, h]
        v = jnp.dot(x, wqkv_ref[2, h], preferred_element_type=jnp.float32) + bqkv_ref[2, h]

        # Lane-dense (M, M) scores over the packed windows; a single add applies the
        # relative-position bias and the block-diagonal cross-window mask.
        s = jax.lax.dot_general(q.astype(in_dtype), k.astype(in_dtype),
                                (((1,), (1,)), ((), ())),
                                preferred_element_type=jnp.float32)        # (M, M) f32
        s = s + biasmask_ref[h]

        # Numerically stable softmax in f32 over 128-lane-dense rows.
        m = jnp.max(s, axis=-1, keepdims=True)
        e = jnp.exp(s - m)
        denom = jnp.sum(e, axis=-1, keepdims=True)
        if exact_divide:
            p = e / denom
        else:
            p = e * pl.reciprocal(denom, approx=True)                      # EUP slot, ~free

        # attn_drop is a no-op (p = 0.0 / eval).  K = M contraction (128 -> MXU-native).
        ctx = jnp.dot(p.astype(in_dtype), v.astype(in_dtype),
                      preferred_element_type=jnp.float32)                  # (M, hd)

        # Head merge folded into the output projection: H accumulating matmuls.
        acc = acc + jnp.dot(ctx.astype(in_dtype), wproj_ref[h],
                            preferred_element_type=jnp.float32)

    # proj_drop is a no-op.
    o_ref[...] = (acc + bproj_ref[...]).astype(o_ref.dtype)


# ----------------------------------------------------------------------------
# Wrapper helpers
# ----------------------------------------------------------------------------
def _choose_pack(B_, N, lane_target=128, min_grid=4):
    """Windows packed per grid step: largest divisor of B_ with P*N <= ~128 (one lane tile of
    scores), P*N sublane-aligned, and >= min_grid grid steps (pipelining / both v7x TCs)."""
    cands = [p for p in range(1, B_ + 1)
             if B_ % p == 0 and p * N <= max(N, lane_target) and (p * N) % 8 == 0]
    if not cands:
        return 1
    good = [p for p in cands if B_ // p >= min_grid]
    return max(good) if good else max(cands)


def _prep_params(wqkv, bqkv, wproj, bproj, C, H, compute_dtype):
    """Head-split the projection weights and fold the 1/sqrt(hd) scale into q."""
    hd = C // H
    scale = float(hd) ** -0.5
    w3 = jnp.transpose(wqkv.reshape(C, 3, H, hd), (1, 2, 0, 3))            # (3, H, C, hd)
    w3 = w3.at[0].multiply(scale)
    b3 = bqkv.reshape(3, H, 1, hd).astype(jnp.float32)                     # (3, H, 1, hd)
    b3 = b3.at[0].multiply(scale)
    wph = wproj.reshape(H, hd, C)                                          # (H, hd, C)
    return (w3.astype(compute_dtype), b3, wph.astype(compute_dtype),
            bproj.reshape(1, C).astype(jnp.float32))


def _build_packed_bias(rel_bias, P):
    """(H, N, N) -> (H, P*N, P*N): bias on diagonal window blocks, MASK_VALUE off-diagonal."""
    H, N, _ = rel_bias.shape
    diag = jnp.eye(P, dtype=bool)[None, :, None, :, None]                  # (1,P,1,P,1)
    full = jnp.broadcast_to(rel_bias.astype(jnp.float32)[:, None, :, None, :], (H, P, N, P, N))
    return jnp.where(diag, full, MASK_VALUE).reshape(H, P * N, P * N)


# ----------------------------------------------------------------------------
# Wrapper: packing, BlockSpecs, cost / VMEM estimates
# ----------------------------------------------------------------------------
@functools.partial(jax.jit, static_argnames=("pack", "exact_divide"))
def window_attention(x, wqkv, bqkv, rel_bias, wproj, bproj, *, pack=None, exact_divide=False):
    B_, N, C = x.shape
    H = rel_bias.shape[0]
    assert C % H == 0, "dim must be divisible by num_heads"
    hd = C // H
    P = _choose_pack(B_, N) if pack is None else pack
    assert B_ % P == 0, f"B_={B_} must be divisible by pack={P}"
    G = B_ // P
    M = P * N

    w3, b3, wph, bp = _prep_params(wqkv, bqkv, wproj, bproj, C, H, x.dtype)
    biasmask = _build_packed_bias(rel_bias, P)
    x2 = x.reshape(B_ * N, C)                  # free; blocks cover (M, C) row slabs

    isz = jnp.dtype(x.dtype).itemsize
    flops = G * H * (3 * 2 * M * C * hd        # per-head qkv projections
                     + 2 * M * M * hd          # q @ k^T   (packed, incl. masked positions)
                     + 2 * M * M * hd          # probs @ v (K = M contraction)
                     + 2 * M * hd * C)         # per-head output projection
    transcendentals = G * H * M * M
    bytes_accessed = (2 * B_ * N * C * isz
                      + (w3.size + wph.size) * isz
                      + (b3.size + bp.size + biasmask.size) * 4)

    # VMEM budget: double-buffered x/out blocks + resident params/bias + f32 intermediates.
    resident = 2 * (2 * M * C * isz + (w3.size + wph.size) * isz
                    + (b3.size + bp.size + biasmask.size) * 4)
    interm = 4 * M * M * 4 + 8 * M * 128 * 4
    vmem_limit = int(min(64 << 20, max(32 << 20, 2 * (resident + interm))))

    kernel = functools.partial(window_attn_kernel, num_heads=H, exact_divide=exact_divide)

    out2 = pl.pallas_call(
        kernel,
        out_shape=jax.ShapeDtypeStruct((B_ * N, C), x.dtype),
        grid=(G,),
        in_specs=[
            pl.BlockSpec((M, C), lambda g: (g, 0)),                 # x: P windows per step
            pl.BlockSpec((3, H, C, hd), lambda g: (0, 0, 0, 0)),    # head-split qkv weights
            pl.BlockSpec((3, H, 1, hd), lambda g: (0, 0, 0, 0)),    # head-split qkv biases
            pl.BlockSpec((H, M, M), lambda g: (0, 0, 0)),           # packed bias + mask
            pl.BlockSpec((H, hd, C), lambda g: (0, 0, 0)),          # head-split proj weights
            pl.BlockSpec((1, C), lambda g: (0, 0)),                 # proj bias
        ],
        out_specs=pl.BlockSpec((M, C), lambda g: (g, 0)),
        compiler_params=pltpu.CompilerParams(
            dimension_semantics=("parallel",),
            vmem_limit_bytes=vmem_limit),
        cost_estimate=pl.CostEstimate(flops=int(flops),
                                      transcendentals=int(transcendentals),
                                      bytes_accessed=int(bytes_accessed)),
    )(x2, w3, b3, biasmask, wph, bp)

    return out2.reshape(B_, N, C)


# ----------------------------------------------------------------------------
# Parameter setup + relative position index/bias (plain-JAX glue)
# ----------------------------------------------------------------------------
def make_relative_position_index(window_size):
    Wh, Ww = window_size
    coords = jnp.stack(jnp.meshgrid(jnp.arange(Wh), jnp.arange(Ww), indexing="ij"))
    coords_flatten = coords.reshape(2, -1)
    rel = coords_flatten[:, :, None] - coords_flatten[:, None, :]
    rel = rel.transpose(1, 2, 0)
    rel = rel.at[:, :, 0].add(Wh - 1)
    rel = rel.at[:, :, 1].add(Ww - 1)
    rel = rel.at[:, :, 0].multiply(2 * Ww - 1)
    return rel.sum(-1)                                                     # (N, N) int32


def init_params(key, dim, window_size, num_heads):
    Wh, Ww = window_size
    k1, k2, k3, k4, k5 = jax.random.split(key, 5)
    table_len = (2 * Wh - 1) * (2 * Ww - 1)
    rpb_table = 0.02 * jax.random.truncated_normal(
        k1, -2.0, 2.0, (table_len, num_heads), jnp.float32)                # ~trunc_normal_
    bnd = 1.0 / math.sqrt(dim)
    wqkv = jax.random.uniform(k2, (dim, 3 * dim), jnp.float32, -bnd, bnd)  # (in, out)
    bqkv = jax.random.uniform(k3, (1, 3 * dim), jnp.float32, -bnd, bnd)
    wproj = jax.random.uniform(k4, (dim, dim), jnp.float32, -bnd, bnd)
    bproj = jax.random.uniform(k5, (1, dim), jnp.float32, -bnd, bnd)
    return rpb_table, wqkv, bqkv, wproj, bproj


def gather_relative_bias(rpb_table, rel_index, window_size, num_heads):
    N = window_size[0] * window_size[1]
    bias = rpb_table[rel_index.reshape(-1)].reshape(N, N, num_heads)
    return jnp.transpose(bias, (2, 0, 1)).astype(jnp.float32)              # (H, N, N)


# ----------------------------------------------------------------------------
# Pure-JAX reference (mirrors the PyTorch forward, mask=None, dropout=0)
# ----------------------------------------------------------------------------
def reference_forward(x, wqkv, bqkv, rel_bias, wproj, bproj, num_heads):
    B_, N, C = x.shape
    hd = C // num_heads
    scale = hd ** -0.5
    qkv = x @ wqkv + bqkv
    qkv = qkv.reshape(B_, N, 3, num_heads, hd).transpose(2, 0, 3, 1, 4)
    q, k, v = qkv[0] * scale, qkv[1], qkv[2]
    attn = q @ jnp.swapaxes(k, -2, -1) + rel_bias[None]
    attn = jax.nn.softmax(attn, axis=-1)
    out = (attn @ v).transpose(0, 2, 1, 3).reshape(B_, N, C)
    return out @ wproj + bproj


if __name__ == "__main__":
    dim = 32
    window_size = (4, 4)          # N = 16 tokens per window
    num_heads = 4
    B_ = 64                       # num_windows * batch -> pack P=8 windows/step, grid G=8
    N = window_size[0] * window_size[1]

    key = jax.random.PRNGKey(0)
    kx, kp = jax.random.split(key)
    x = jax.random.normal(kx, (B_, N, dim), jnp.float32)   # pass bf16 here on v6e/v7x for 2x MXU

    rpb_table, wqkv, bqkv, wproj, bproj = init_params(kp, dim, window_size, num_heads)
    rel_index = make_relative_position_index(window_size)
    rel_bias = gather_relative_bias(rpb_table, rel_index, window_size, num_heads)

    # TODO(synk): shifted-window attention `mask` path (per-window additive mask) not
    # implemented; this kernel covers the mask=None branch only.
    out = window_attention(x, wqkv, bqkv, rel_bias, wproj, bproj)
    out = jax.block_until_ready(out)

    ref = reference_forward(x, wqkv, bqkv, rel_bias, wproj, bproj, num_heads)
    assert out.shape == (B_, N, dim)
    # tolerance accounts for the EUP approximate reciprocal in the softmax denominator
    max_err = float(jnp.max(jnp.abs(out - ref)))
    assert jnp.allclose(out, ref, atol=2e-3, rtol=2e-3), f"mismatch vs reference (max err {max_err})"
    print("KERNEL_OK")
</pallas_src>

<mosaic_0001>
module attributes {stable_mosaic.version = 11 : i64} {
  func.func @window_attn_kernel(%arg0: i32, %arg1: memref<128x32xf32, #tpu.memory_space<vmem>>, %arg2: memref<3x4x32x8xf32, #tpu.memory_space<vmem>>, %arg3: memref<3x4x1x8xf32, #tpu.memory_space<vmem>>, %arg4: memref<4x128x128xf32, #tpu.memory_space<vmem>>, %arg5: memref<4x8x32xf32, #tpu.memory_space<vmem>>, %arg6: memref<1x32xf32, #tpu.memory_space<vmem>>, %arg7: memref<128x32xf32, #tpu.memory_space<vmem>>) attributes {dimension_semantics = [#tpu.dimension_semantics<parallel>], iteration_bounds = array<i64: 8>, scalar_prefetch = 0 : i64, scratch_operands = 0 : i64, tpu.core_type = #tpu.core_type<tc>, window_params = [{transform_indices = @transform_0, window_bounds = array<i64: 128, 32>}, {pipeline_mode = #tpu.pipeline_mode<synchronous>, transform_indices = @transform_1, window_bounds = array<i64: 3, 4, 32, 8>}, {pipeline_mode = #tpu.pipeline_mode<synchronous>, transform_indices = @transform_2, window_bounds = array<i64: 3, 4, 1, 8>}, {pipeline_mode = #tpu.pipeline_mode<synchronous>, transform_indices = @transform_3, window_bounds = array<i64: 4, 128, 128>}, {pipeline_mode = #tpu.pipeline_mode<synchronous>, transform_indices = @transform_4, window_bounds = array<i64: 4, 8, 32>}, {pipeline_mode = #tpu.pipeline_mode<synchronous>, transform_indices = @transform_5, window_bounds = array<i64: 1, 32>}, {transform_indices = @transform_6, window_bounds = array<i64: 128, 32>}]} {
    %c0 = arith.constant 0 : index
    %c0_0 = arith.constant 0 : index
    %0 = vector.load %arg1[%c0, %c0_0] : memref<128x32xf32, #tpu.memory_space<vmem>>, vector<128x32xf32>
    %cst = arith.constant 0.000000e+00 : f32
    %1 = vector.broadcast %cst : f32 to vector<128x32xf32>
    %c0_1 = arith.constant 0 : index
    %c0_2 = arith.constant 0 : index
    %c0_3 = arith.constant 0 : index
    %c0_4 = arith.constant 0 : index
    %2 = vector.load %arg2[%c0_1, %c0_2, %c0_3, %c0_4] : memref<3x4x32x8xf32, #tpu.memory_space<vmem>>, vector<1x1x32x8xf32>
    %3 = vector.shape_cast %2 : vector<1x1x32x8xf32> to vector<32x8xf32>
    %cst_5 = arith.constant dense<0.000000e+00> : vector<128x8xf32>
    %4 = tpu.matmul %0, %3, %cst_5 {dimension_numbers = #tpu.dot_dimension_numbers<[1], [0], [0], [1], [0, 0, 1, 1], [], []>} : vector<128x32xf32>, vector<32x8xf32>, vector<128x8xf32> -> vector<128x8xf32>
    %c0_6 = arith.constant 0 : index
    %c0_7 = arith.constant 0 : index
    %c0_8 = arith.constant 0 : index
    %c0_9 = arith.constant 0 : index
    %5 = vector.load %arg3[%c0_6, %c0_7, %c0_8, %c0_9] : memref<3x4x1x8xf32, #tpu.memory_space<vmem>>, vector<1x1x1x8xf32>
    %6 = vector.shape_cast %5 : vector<1x1x1x8xf32> to vector<1x8xf32>
    %7 = vector.broadcast %6 : vector<1x8xf32> to vector<128x8xf32>
    %8 = arith.addf %4, %7 : vector<128x8xf32>
    %c1 = arith.constant 1 : index
    %c0_10 = arith.constant 0 : index
    %c0_11 = arith.constant 0 : index
    %c0_12 = arith.constant 0 : index
    %9 = vector.load %arg2[%c1, %c0_10, %c0_11, %c0_12] : memref<3x4x32x8xf32, #tpu.memory_space<vmem>>, vector<1x1x32x8xf32>
    %10 = vector.shape_cast %9 : vector<1x1x32x8xf32> to vector<32x8xf32>
    %cst_13 = arith.constant dense<0.000000e+00> : vector<128x8xf32>
    %11 = tpu.matmul %0, %10, %cst_13 {dimension_numbers = #tpu.dot_dimension_numbers<[1], [0], [0], [1], [0, 0, 1, 1], [], []>} : vector<128x32xf32>, vector<32x8xf32>, vector<128x8xf32> -> vector<128x8xf32>
    %c1_14 = arith.constant 1 : index
    %c0_15 = arith.constant 0 : index
    %c0_16 = arith.constant 0 : index
    %c0_17 = arith.constant 0 : index
    %12 = vector.load %arg3[%c1_14, %c0_15, %c0_16, %c0_17] : memref<3x4x1x8xf32, #tpu.memory_space<vmem>>, vector<1x1x1x8xf32>
    %13 = vector.shape_cast %12 : vector<1x1x1x8xf32> to vector<1x8xf32>
    %14 = vector.broadcast %13 : vector<1x8xf32> to vector<128x8xf32>
    %15 = arith.addf %11, %14 : vector<128x8xf32>
    %c2 = arith.constant 2 : index
    %c0_18 = arith.constant 0 : index
    %c0_19 = arith.constant 0 : index
    %c0_20 = arith.constant 0 : index
    %16 = vector.load %arg2[%c2, %c0_18, %c0_19, %c0_20] : memref<3x4x32x8xf32, #tpu.memory_space<vmem>>, vector<1x1x32x8xf32>
    %17 = vector.shape_cast %16 : vector<1x1x32x8xf32> to vector<32x8xf32>
    %cst_21 = arith.constant dense<0.000000e+00> : vector<128x8xf32>
    %18 = tpu.matmul %0, %17, %cst_21 {dimension_numbers = #tpu.dot_dimension_numbers<[1], [0], [0], [1], [0, 0, 1, 1], [], []>} : vector<128x32xf32>, vector<32x8xf32>, vector<128x8xf32> -> vector<128x8xf32>
    %c2_22 = arith.constant 2 : index
    %c0_23 = arith.constant 0 : index
    %c0_24 = arith.constant 0 : index
    %c0_25 = arith.constant 0 : index
    %19 = vector.load %arg3[%c2_22, %c0_23, %c0_24, %c0_25] : memref<3x4x1x8xf32, #tpu.memory_space<vmem>>, vector<1x1x1x8xf32>
    %20 = vector.shape_cast %19 : vector<1x1x1x8xf32> to vector<1x8xf32>
    %21 = vector.broadcast %20 : vector<1x8xf32> to vector<128x8xf32>
    %22 = arith.addf %18, %21 : vector<128x8xf32>
    %cst_26 = arith.constant dense<0.000000e+00> : vector<128x128xf32>
    %23 = tpu.matmul %8, %15, %cst_26 {dimension_numbers = #tpu.dot_dimension_numbers<[1], [1], [0], [0], [0, 0, 1, 0], [], []>} : vector<128x8xf32>, vector<128x8xf32>, vector<128x128xf32> -> vector<128x128xf32>
    %c0_27 = arith.constant 0 : index
    %c0_28 = arith.constant 0 : index
    %c0_29 = arith.constant 0 : index
    %24 = vector.load %arg4[%c0_27, %c0_28, %c0_29] : memref<4x128x128xf32, #tpu.memory_space<vmem>>, vector<1x128x128xf32>
    %25 = vector.shape_cast %24 : vector<1x128x128xf32> to vector<128x128xf32>
    %26 = arith.addf %23, %25 : vector<128x128xf32>
    %cst_30 = arith.constant dense<0xFF800000> : vector<128xf32>
    %27 = vector.multi_reduction <maximumf>, %26, %cst_30 [1] : vector<128x128xf32> to vector<128xf32>
    %28 = vector.shape_cast %27 : vector<128xf32> to vector<128x1xf32>
    %29 = vector.broadcast %28 : vector<128x1xf32> to vector<128x128xf32>
    %30 = arith.subf %26, %29 : vector<128x128xf32>
    %31 = math.exp %30 : vector<128x128xf32>
    %cst_31 = arith.constant dense<0.000000e+00> : vector<128xf32>
    %32 = vector.multi_reduction <add>, %31, %cst_31 [1] : vector<128x128xf32> to vector<128xf32>
    %33 = vector.shape_cast %32 : vector<128xf32> to vector<128x1xf32>
    %34 = tpu.reciprocal %33 {approx = true} : vector<128x1xf32> -> vector<128x1xf32>
    %35 = vector.broadcast %34 : vector<128x1xf32> to vector<128x128xf32>
    %36 = arith.mulf %31, %35 : vector<128x128xf32>
    %cst_32 = arith.constant dense<0.000000e+00> : vector<128x8xf32>
    %37 = tpu.matmul %36, %22, %cst_32 {dimension_numbers = #tpu.dot_dimension_numbers<[1], [0], [0], [1], [0, 0, 1, 1], [], []>} : vector<128x128xf32>, vector<128x8xf32>, vector<128x8xf32> -> vector<128x8xf32>
    %c0_33 = arith.constant 0 : index
    %c0_34 = arith.constant 0 : index
    %c0_35 = arith.constant 0 : index
    %38 = vector.load %arg5[%c0_33, %c0_34, %c0_35] : memref<4x8x32xf32, #tpu.memory_space<vmem>>, vector<1x8x32xf32>
    %39 = vector.shape_cast %38 : vector<1x8x32xf32> to vector<8x32xf32>
    %cst_36 = arith.constant dense<0.000000e+00> : vector<128x32xf32>
    %40 = tpu.matmul %37, %39, %cst_36 {dimension_numbers = #tpu.dot_dimension_numbers<[1], [0], [0], [1], [0, 0, 1, 1], [], []>} : vector<128x8xf32>, vector<8x32xf32>, vector<128x32xf32> -> vector<128x32xf32>
    %41 = arith.addf %1, %40 : vector<128x32xf32>
    %c0_37 = arith.constant 0 : index
    %c1_38 = arith.constant 1 : index
    %c0_39 = arith.constant 0 : index
    %c0_40 = arith.constant 0 : index
    %42 = vector.load %arg2[%c0_37, %c1_38, %c0_39, %c0_40] : memref<3x4x32x8xf32, #tpu.memory_space<vmem>>, vector<1x1x32x8xf32>
    %43 = vector.shape_cast %42 : vector<1x1x32x8xf32> to vector<32x8xf32>
    %cst_41 = arith.constant dense<0.000000e+00> : vector<128x8xf32>
    %44 = tpu.matmul %0, %43, %cst_41 {dimension_numbers = #tpu.dot_dimension_numbers<[1], [0], [0], [1], [0, 0, 1, 1], [], []>} : vector<128x32xf32>, vector<32x8xf32>, vector<128x8xf32> -> vector<128x8xf32>
    %c0_42 = arith.constant 0 : index
    %c1_43 = arith.constant 1 : index
    %c0_44 = arith.constant 0 : index
    %c0_45 = arith.constant 0 : index
    %45 = vector.load %arg3[%c0_42, %c1_43, %c0_44, %c0_45] : memref<3x4x1x8xf32, #tpu.memory_space<vmem>>, vector<1x1x1x8xf32>
    %46 = vector.shape_cast %45 : vector<1x1x1x8xf32> to vector<1x8xf32>
    %47 = vector.broadcast %46 : vector<1x8xf32> to vector<128x8xf32>
    %48 = arith.addf %44, %47 : vector<128x8xf32>
    %c1_46 = arith.constant 1 : index
    %c1_47 = arith.constant 1 : index
    %c0_48 = arith.constant 0 : index
    %c0_49 = arith.constant 0 : index
    %49 = vector.load %arg2[%c1_46, %c1_47, %c0_48, %c0_49] : memref<3x4x32x8xf32, #tpu.memory_space<vmem>>, vector<1x1x32x8xf32>
    %50 = vector.shape_cast %49 : vector<1x1x32x8xf32> to vector<32x8xf32>
    %cst_50 = arith.constant dense<0.000000e+00> : vector<128x8xf32>
    %51 = tpu.matmul %0, %50, %cst_50 {dimension_numbers = #tpu.dot_dimension_numbers<[1], [0], [0], [1], [0, 0, 1, 1], [], []>} : vector<128x32xf32>, vector<32x8xf32>, vector<128x8xf32> -> vector<128x8xf32>
    %c1_51 = arith.constant 1 : index
    %c1_52 = arith.constant 1 : index
    %c0_53 = arith.constant 0 : index
    %c0_54 = arith.constant 0 : index
    %52 = vector.load %arg3[%c1_51, %c1_52, %c0_53, %c0_54] : memref<3x4x1x8xf32, #tpu.memory_space<vmem>>, vector<1x1x1x8xf32>
    %53 = vector.shape_cast %52 : vector<1x1x1x8xf32> to vector<1x8xf32>
    %54 = vector.broadcast %53 : vector<1x8xf32> to vector<128x8xf32>
    %55 = arith.addf %51, %54 : vector<128x8xf32>
    %c2_55 = arith.constant 2 : index
    %c1_56 = arith.constant 1 : index
    %c0_57 = arith.constant 0 : index
    %c0_58 = arith.constant 0 : index
    %56 = vector.load %arg2[%c2_55, %c1_56, %c0_57, %c0_58] : memref<3x4x32x8xf32, #tpu.memory_space<vmem>>, vector<1x1x32x8xf32>
    %57 = vector.shape_cast %56 : vector<1x1x32x8xf32> to vector<32x8xf32>
    %cst_59 = arith.constant dense<0.000000e+00> : vector<128x8xf32>
    %58 = tpu.matmul %0, %57, %cst_59 {dimension_numbers = #tpu.dot_dimension_numbers<[1], [0], [0], [1], [0, 0, 1, 1], [], []>} : vector<128x32xf32>, vector<32x8xf32>, vector<128x8xf32> -> vector<128x8xf32>
    %c2_60 = arith.constant 2 : index
    %c1_61 = arith.constant 1 : index
    %c0_62 = arith.constant 0 : index
    %c0_63 = arith.constant 0 : index
    %59 = vector.load %arg3[%c2_60, %c1_61, %c0_62, %c0_63] : memref<3x4x1x8xf32, #tpu.memory_space<vmem>>, vector<1x1x1x8xf32>
    %60 = vector.shape_cast %59 : vector<1x1x1x8xf32> to vector<1x8xf32>
    %61 = vector.broadcast %60 : vector<1x8xf32> to vector<128x8xf32>
    %62 = arith.addf %58, %61 : vector<128x8xf32>
    %cst_64 = arith.constant dense<0.000000e+00> : vector<128x128xf32>
    %63 = tpu.matmul %48, %55, %cst_64 {dimension_numbers = #tpu.dot_dimension_numbers<[1], [1], [0], [0], [0, 0, 1, 0], [], []>} : vector<128x8xf32>, vector<128x8xf32>, vector<128x128xf32> -> vector<128x128xf32>
    %c1_65 = arith.constant 1 : index
    %c0_66 = arith.constant 0 : index
    %c0_67 = arith.constant 0 : index
    %64 = vector.load %arg4[%c1_65, %c0_66, %c0_67] : memref<4x128x128xf32, #tpu.memory_space<vmem>>, vector<1x128x128xf32>
    %65 = vector.shape_cast %64 : vector<1x128x128xf32> to vector<128x128xf32>
    %66 = arith.addf %63, %65 : vector<128x128xf32>
    %cst_68 = arith.constant dense<0xFF800000> : vector<128xf32>
    %67 = vector.multi_reduction <maximumf>, %66, %cst_68 [1] : vector<128x128xf32> to vector<128xf32>
    %68 = vector.shape_cast %67 : vector<128xf32> to vector<128x1xf32>
    %69 = vector.broadcast %68 : vector<128x1xf32> to vector<128x128xf32>
    %70 = arith.subf %66, %69 : vector<128x128xf32>
    %71 = math.exp %70 : vector<128x128xf32>
    %cst_69 = arith.constant dense<0.000000e+00> : vector<128xf32>
    %72 = vector.multi_reduction <add>, %71, %cst_69 [1] : vector<128x128xf32> to vector<128xf32>
    %73 = vector.shape_cast %72 : vector<128xf32> to vector<128x1xf32>
    %74 = tpu.reciprocal %73 {approx = true} : vector<128x1xf32> -> vector<128x1xf32>
    %75 = vector.broadcast %74 : vector<128x1xf32> to vector<128x128xf32>
    %76 = arith.mulf %71, %75 : vector<128x128xf32>
    %cst_70 = arith.constant dense<0.000000e+00> : vector<128x8xf32>
    %77 = tpu.matmul %76, %62, %cst_70 {dimension_numbers = #tpu.dot_dimension_numbers<[1], [0], [0], [1], [0, 0, 1, 1], [], []>} : vector<128x128xf32>, vector<128x8xf32>, vector<128x8xf32> -> vector<128x8xf32>
    %c1_71 = arith.constant 1 : index
    %c0_72 = arith.constant 0 : index
    %c0_73 = arith.constant 0 : index
    %78 = vector.load %arg5[%c1_71, %c0_72, %c0_73] : memref<4x8x32xf32, #tpu.memory_space<vmem>>, vector<1x8x32xf32>
    %79 = vector.shape_cast %78 : vector<1x8x32xf32> to vector<8x32xf32>
    %cst_74 = arith.constant dense<0.000000e+00> : vector<128x32xf32>
    %80 = tpu.matmul %77, %79, %cst_74 {dimension_numbers = #tpu.dot_dimension_numbers<[1], [0], [0], [1], [0, 0, 1, 1], [], []>} : vector<128x8xf32>, vector<8x32xf32>, vector<128x32xf32> -> vector<128x32xf32>
    %81 = arith.addf %41, %80 : vector<128x32xf32>
    %c0_75 = arith.constant 0 : index
    %c2_76 = arith.constant 2 : index
    %c0_77 = arith.constant 0 : index
    %c0_78 = arith.constant 0 : index
    %82 = vector.load %arg2[%c0_75, %c2_76, %c0_77, %c0_78] : memref<3x4x32x8xf32, #tpu.memory_space<vmem>>, vector<1x1x32x8xf32>
    %83 = vector.shape_cast %82 : vector<1x1x32x8xf32> to vector<32x8xf32>
    %cst_79 = arith.constant dense<0.000000e+00> : vector<128x8xf32>
    %84 = tpu.matmul %0, %83, %cst_79 {dimension_numbers = #tpu.dot_dimension_numbers<[1], [0], [0], [1], [0, 0, 1, 1], [], []>} : vector<128x32xf32>, vector<32x8xf32>, vector<128x8xf32> -> vector<128x8xf32>
    %c0_80 = arith.constant 0 : index
    %c2_81 = arith.constant 2 : index
    %c0_82 = arith.constant 0 : index
    %c0_83 = arith.constant 0 : index
    %85 = vector.load %arg3[%c0_80, %c2_81, %c0_82, %c0_83] : memref<3x4x1x8xf32, #tpu.memory_space<vmem>>, vector<1x1x1x8xf32>
    %86 = vector.shape_cast %85 : vector<1x1x1x8xf32> to vector<1x8xf32>
    %87 = vector.broadcast %86 : vector<1x8xf32> to vector<128x8xf32>
    %88 = arith.addf %84, %87 : vector<128x8xf32>
    %c1_84 = arith.constant 1 : index
    %c2_85 = arith.constant 2 : index
    %c0_86 = arith.constant 0 : index
    %c0_87 = arith.constant 0 : index
    %89 = vector.load %arg2[%c1_84, %c2_85, %c0_86, %c0_87] : memref<3x4x32x8xf32, #tpu.memory_space<vmem>>, vector<1x1x32x8xf32>
    %90 = vector.shape_cast %89 : vector<1x1x32x8xf32> to vector<32x8xf32>
    %cst_88 = arith.constant dense<0.000000e+00> : vector<128x8xf32>
    %91 = tpu.matmul %0, %90, %cst_88 {dimension_numbers = #tpu.dot_dimension_numbers<[1], [0], [0], [1], [0, 0, 1, 1], [], []>} : vector<128x32xf32>, vector<32x8xf32>, vector<128x8xf32> -> vector<128x8xf32>
    %c1_89 = arith.constant 1 : index
    %c2_90 = arith.constant 2 : index
    %c0_91 = arith.constant 0 : index
    %c0_92 = arith.constant 0 : index
    %92 = vector.load %arg3[%c1_89, %c2_90, %c0_91, %c0_92] : memref<3x4x1x8xf32, #tpu.memory_space<vmem>>, vector<1x1x1x8xf32>
    %93 = vector.shape_cast %92 : vector<1x1x1x8xf32> to vector<1x8xf32>
    %94 = vector.broadcast %93 : vector<1x8xf32> to vector<128x8xf32>
    %95 = arith.addf %91, %94 : vector<128x8xf32>
    %c2_93 = arith.constant 2 : index
    %c2_94 = arith.constant 2 : index
    %c0_95 = arith.constant 0 : index
    %c0_96 = arith.constant 0 : index
    %96 = vector.load %arg2[%c2_93, %c2_94, %c0_95, %c0_96] : memref<3x4x32x8xf32, #tpu.memory_space<vmem>>, vector<1x1x32x8xf32>
    %97 = vector.shape_cast %96 : vector<1x1x32x8xf32> to vector<32x8xf32>
    %cst_97 = arith.constant dense<0.000000e+00> : vector<128x8xf32>
    %98 = tpu.matmul %0, %97, %cst_97 {dimension_numbers = #tpu.dot_dimension_numbers<[1], [0], [0], [1], [0, 0, 1, 1], [], []>} : vector<128x32xf32>, vector<32x8xf32>, vector<128x8xf32> -> vector<128x8xf32>
    %c2_98 = arith.constant 2 : index
    %c2_99 = arith.constant 2 : index
    %c0_100 = arith.constant 0 : index
    %c0_101 = arith.constant 0 : index
    %99 = vector.load %arg3[%c2_98, %c2_99, %c0_100, %c0_101] : memref<3x4x1x8xf32, #tpu.memory_space<vmem>>, vector<1x1x1x8xf32>
    %100 = vector.shape_cast %99 : vector<1x1x1x8xf32> to vector<1x8xf32>
    %101 = vector.broadcast %100 : vector<1x8xf32> to vector<128x8xf32>
    %102 = arith.addf %98, %101 : vector<128x8xf32>
    %cst_102 = arith.constant dense<0.000000e+00> : vector<128x128xf32>
    %103 = tpu.matmul %88, %95, %cst_102 {dimension_numbers = #tpu.dot_dimension_numbers<[1], [1], [0], [0], [0, 0, 1, 0], [], []>} : vector<128x8xf32>, vector<128x8xf32>, vector<128x128xf32> -> vector<128x128xf32>
    %c2_103 = arith.constant 2 : index
    %c0_104 = arith.constant 0 : index
    %c0_105 = arith.constant 0 : index
    %104 = vector.load %arg4[%c2_103, %c0_104, %c0_105] : memref<4x128x128xf32, #tpu.memory_space<vmem>>, vector<1x128x128xf32>
    %105 = vector.shape_cast %104 : vector<1x128x128xf32> to vector<128x128xf32>
    %106 = arith.addf %103, %105 : vector<128x128xf32>
    %cst_106 = arith.constant dense<0xFF800000> : vector<128xf32>
    %107 = vector.multi_reduction <maximumf>, %106, %cst_106 [1] : vector<128x128xf32> to vector<128xf32>
    %108 = vector.shape_cast %107 : vector<128xf32> to vector<128x1xf32>
    %109 = vector.broadcast %108 : vector<128x1xf32> to vector<128x128xf32>
    %110 = arith.subf %106, %109 : vector<128x128xf32>
    %111 = math.exp %110 : vector<128x128xf32>
    %cst_107 = arith.constant dense<0.000000e+00> : vector<128xf32>
    %112 = vector.multi_reduction <add>, %111, %cst_107 [1] : vector<128x128xf32> to vector<128xf32>
    %113 = vector.shape_cast %112 : vector<128xf32> to vector<128x1xf32>
    %114 = tpu.reciprocal %113 {approx = true} : vector<128x1xf32> -> vector<128x1xf32>
    %115 = vector.broadcast %114 : vector<128x1xf32> to vector<128x128xf32>
    %116 = arith.mulf %111, %115 : vector<128x128xf32>
    %cst_108 = arith.constant dense<0.000000e+00> : vector<128x8xf32>
    %117 = tpu.matmul %116, %102, %cst_108 {dimension_numbers = #tpu.dot_dimension_numbers<[1], [0], [0], [1], [0, 0, 1, 1], [], []>} : vector<128x128xf32>, vector<128x8xf32>, vector<128x8xf32> -> vector<128x8xf32>
    %c2_109 = arith.constant 2 : index
    %c0_110 = arith.constant 0 : index
    %c0_111 = arith.constant 0 : index
    %118 = vector.load %arg5[%c2_109, %c0_110, %c0_111] : memref<4x8x32xf32, #tpu.memory_space<vmem>>, vector<1x8x32xf32>
    %119 = vector.shape_cast %118 : vector<1x8x32xf32> to vector<8x32xf32>
    %cst_112 = arith.constant dense<0.000000e+00> : vector<128x32xf32>
    %120 = tpu.matmul %117, %119, %cst_112 {dimension_numbers = #tpu.dot_dimension_numbers<[1], [0], [0], [1], [0, 0, 1, 1], [], []>} : vector<128x8xf32>, vector<8x32xf32>, vector<128x32xf32> -> vector<128x32xf32>
    %121 = arith.addf %81, %120 : vector<128x32xf32>
    %c0_113 = arith.constant 0 : index
    %c3 = arith.constant 3 : index
    %c0_114 = arith.constant 0 : index
    %c0_115 = arith.constant 0 : index
    %122 = vector.load %arg2[%c0_113, %c3, %c0_114, %c0_115] : memref<3x4x32x8xf32, #tpu.memory_space<vmem>>, vector<1x1x32x8xf32>
    %123 = vector.shape_cast %122 : vector<1x1x32x8xf32> to vector<32x8xf32>
    %cst_116 = arith.constant dense<0.000000e+00> : vector<128x8xf32>
    %124 = tpu.matmul %0, %123, %cst_116 {dimension_numbers = #tpu.dot_dimension_numbers<[1], [0], [0], [1], [0, 0, 1, 1], [], []>} : vector<128x32xf32>, vector<32x8xf32>, vector<128x8xf32> -> vector<128x8xf32>
    %c0_117 = arith.constant 0 : index
    %c3_118 = arith.constant 3 : index
    %c0_119 = arith.constant 0 : index
    %c0_120 = arith.constant 0 : index
    %125 = vector.load %arg3[%c0_117, %c3_118, %c0_119, %c0_120] : memref<3x4x1x8xf32, #tpu.memory_space<vmem>>, vector<1x1x1x8xf32>
    %126 = vector.shape_cast %125 : vector<1x1x1x8xf32> to vector<1x8xf32>
    %127 = vector.broadcast %126 : vector<1x8xf32> to vector<128x8xf32>
    %128 = arith.addf %124, %127 : vector<128x8xf32>
    %c1_121 = arith.constant 1 : index
    %c3_122 = arith.constant 3 : index
    %c0_123 = arith.constant 0 : index
    %c0_124 = arith.constant 0 : index
    %129 = vector.load %arg2[%c1_121, %c3_122, %c0_123, %c0_124] : memref<3x4x32x8xf32, #tpu.memory_space<vmem>>, vector<1x1x32x8xf32>
    %130 = vector.shape_cast %129 : vector<1x1x32x8xf32> to vector<32x8xf32>
    %cst_125 = arith.constant dense<0.000000e+00> : vector<128x8xf32>
    %131 = tpu.matmul %0, %130, %cst_125 {dimension_numbers = #tpu.dot_dimension_numbers<[1], [0], [0], [1], [0, 0, 1, 1], [], []>} : vector<128x32xf32>, vector<32x8xf32>, vector<128x8xf32> -> vector<128x8xf32>
    %c1_126 = arith.constant 1 : index
    %c3_127 = arith.constant 3 : index
    %c0_128 = arith.constant 0 : index
    %c0_129 = arith.constant 0 : index
    %132 = vector.load %arg3[%c1_126, %c3_127, %c0_128, %c0_129] : memref<3x4x1x8xf32, #tpu.memory_space<vmem>>, vector<1x1x1x8xf32>
    %133 = vector.shape_cast %132 : vector<1x1x1x8xf32> to vector<1x8xf32>
    %134 = vector.broadcast %133 : vector<1x8xf32> to vector<128x8xf32>
    %135 = arith.addf %131, %134 : vector<128x8xf32>
    %c2_130 = arith.constant 2 : index
    %c3_131 = arith.constant 3 : index
    %c0_132 = arith.constant 0 : index
    %c0_133 = arith.constant 0 : index
    %136 = vector.load %arg2[%c2_130, %c3_131, %c0_132, %c0_133] : memref<3x4x32x8xf32, #tpu.memory_space<vmem>>, vector<1x1x32x8xf32>
    %137 = vector.shape_cast %136 : vector<1x1x32x8xf32> to vector<32x8xf32>
    %cst_134 = arith.constant dense<0.000000e+00> : vector<128x8xf32>
    %138 = tpu.matmul %0, %137, %cst_134 {dimension_numbers = #tpu.dot_dimension_numbers<[1], [0], [0], [1], [0, 0, 1, 1], [], []>} : vector<128x32xf32>, vector<32x8xf32>, vector<128x8xf32> -> vector<128x8xf32>
    %c2_135 = arith.constant 2 : index
    %c3_136 = arith.constant 3 : index
    %c0_137 = arith.constant 0 : index
    %c0_138 = arith.constant 0 : index
    %139 = vector.load %arg3[%c2_135, %c3_136, %c0_137, %c0_138] : memref<3x4x1x8xf32, #tpu.memory_space<vmem>>, vector<1x1x1x8xf32>
    %140 = vector.shape_cast %139 : vector<1x1x1x8xf32> to vector<1x8xf32>
    %141 = vector.broadcast %140 : vector<1x8xf32> to vector<128x8xf32>
    %142 = arith.addf %138, %141 : vector<128x8xf32>
    %cst_139 = arith.constant dense<0.000000e+00> : vector<128x128xf32>
    %143 = tpu.matmul %128, %135, %cst_139 {dimension_numbers = #tpu.dot_dimension_numbers<[1], [1], [0], [0], [0, 0, 1, 0], [], []>} : vector<128x8xf32>, vector<128x8xf32>, vector<128x128xf32> -> vector<128x128xf32>
    %c3_140 = arith.constant 3 : index
    %c0_141 = arith.constant 0 : index
    %c0_142 = arith.constant 0 : index
    %144 = vector.load %arg4[%c3_140, %c0_141, %c0_142] : memref<4x128x128xf32, #tpu.memory_space<vmem>>, vector<1x128x128xf32>
    %145 = vector.shape_cast %144 : vector<1x128x128xf32> to vector<128x128xf32>
    %146 = arith.addf %143, %145 : vector<128x128xf32>
    %cst_143 = arith.constant dense<0xFF800000> : vector<128xf32>
    %147 = vector.multi_reduction <maximumf>, %146, %cst_143 [1] : vector<128x128xf32> to vector<128xf32>
    %148 = vector.shape_cast %147 : vector<128xf32> to vector<128x1xf32>
    %149 = vector.broadcast %148 : vector<128x1xf32> to vector<128x128xf32>
    %150 = arith.subf %146, %149 : vector<128x128xf32>
    %151 = math.exp %150 : vector<128x128xf32>
    %cst_144 = arith.constant dense<0.000000e+00> : vector<128xf32>
    %152 = vector.multi_reduction <add>, %151, %cst_144 [1] : vector<128x128xf32> to vector<128xf32>
    %153 = vector.shape_cast %152 : vector<128xf32> to vector<128x1xf32>
    %154 = tpu.reciprocal %153 {approx = true} : vector<128x1xf32> -> vector<128x1xf32>
    %155 = vector.broadcast %154 : vector<128x1xf32> to vector<128x128xf32>
    %156 = arith.mulf %151, %155 : vector<128x128xf32>
    %cst_145 = arith.constant dense<0.000000e+00> : vector<128x8xf32>
    %157 = tpu.matmul %156, %142, %cst_145 {dimension_numbers = #tpu.dot_dimension_numbers<[1], [0], [0], [1], [0, 0, 1, 1], [], []>} : vector<128x128xf32>, vector<128x8xf32>, vector<128x8xf32> -> vector<128x8xf32>
    %c3_146 = arith.constant 3 : index
    %c0_147 = arith.constant 0 : index
    %c0_148 = arith.constant 0 : index
    %158 = vector.load %arg5[%c3_146, %c0_147, %c0_148] : memref<4x8x32xf32, #tpu.memory_space<vmem>>, vector<1x8x32xf32>
    %159 = vector.shape_cast %158 : vector<1x8x32xf32> to vector<8x32xf32>
    %cst_149 = arith.constant dense<0.000000e+00> : vector<128x32xf32>
    %160 = tpu.matmul %157, %159, %cst_149 {dimension_numbers = #tpu.dot_dimension_numbers<[1], [0], [0], [1], [0, 0, 1, 1], [], []>} : vector<128x8xf32>, vector<8x32xf32>, vector<128x32xf32> -> vector<128x32xf32>
    %161 = arith.addf %121, %160 : vector<128x32xf32>
    %c0_150 = arith.constant 0 : index
    %c0_151 = arith.constant 0 : index
    %162 = vector.load %arg6[%c0_150, %c0_151] : memref<1x32xf32, #tpu.memory_space<vmem>>, vector<1x32xf32>
    %163 = vector.broadcast %162 : vector<1x32xf32> to vector<128x32xf32>
    %164 = arith.addf %161, %163 : vector<128x32xf32>
    %c0_152 = arith.constant 0 : index
    %c0_153 = arith.constant 0 : index
    %165 = vector.load %arg7[%c0_152, %c0_153] : memref<128x32xf32, #tpu.memory_space<vmem>>, vector<128x32xf32>
    tpu.vector_store %arg7[%c0_152, %c0_153], %164 {strides = array<i32>} : memref<128x32xf32, #tpu.memory_space<vmem>>, vector<128x32xf32>,
    return
  }
  func.func @transform_0(%arg0: i32) -> (i32, i32) {
    %c0_i32 = arith.constant 0 : i32
    %c0_i32_0 = arith.constant 0 : i32
    return %arg0, %c0_i32 : i32, i32
  }
  func.func @transform_1(%arg0: i32) -> (i32, i32, i32, i32) {
    %c0_i32 = arith.constant 0 : i32
    %c0_i32_0 = arith.constant 0 : i32
    %c0_i32_1 = arith.constant 0 : i32
    %c0_i32_2 = arith.constant 0 : i32
    %c0_i32_3 = arith.constant 0 : i32
    return %c0_i32, %c0_i32_0, %c0_i32_1, %c0_i32_2 : i32, i32, i32, i32
  }
  func.func @transform_2(%arg0: i32) -> (i32, i32, i32, i32) {
    %c0_i32 = arith.constant 0 : i32
    %c0_i32_0 = arith.constant 0 : i32
    %c0_i32_1 = arith.constant 0 : i32
    %c0_i32_2 = arith.constant 0 : i32
    %c0_i32_3 = arith.constant 0 : i32
    return %c0_i32, %c0_i32_0, %c0_i32_1, %c0_i32_2 : i32, i32, i32, i32
  }
  func.func @transform_3(%arg0: i32) -> (i32, i32, i32) {
    %c0_i32 = arith.constant 0 : i32
    %c0_i32_0 = arith.constant 0 : i32
    %c0_i32_1 = arith.constant 0 : i32
    %c0_i32_2 = arith.constant 0 : i32
    return %c0_i32, %c0_i32_0, %c0_i32_1 : i32, i32, i32
  }
  func.func @transform_4(%arg0: i32) -> (i32, i32, i32) {
    %c0_i32 = arith.constant 0 : i32
    %c0_i32_0 = arith.constant 0 : i32
    %c0_i32_1 = arith.constant 0 : i32
    %c0_i32_2 = arith.constant 0 : i32
    return %c0_i32, %c0_i32_0, %c0_i32_1 : i32, i32, i32
  }
  func.func @transform_5(%arg0: i32) -> (i32, i32) {
    %c0_i32 = arith.constant 0 : i32
    %c0_i32_0 = arith.constant 0 : i32
    %c0_i32_1 = arith.constant 0 : i32
    return %c0_i32, %c0_i32_0 : i32, i32
  }
  func.func @transform_6(%arg0: i32) -> (i32, i32) {
    %c0_i32 = arith.constant 0 : i32
    %c0_i32_0 = arith.constant 0 : i32
    return %arg0, %c0_i32 : i32, i32
  }
}

</mosaic_0001>

<bundles_post_ra>
// kernel: window_attention.1
= control target key start
LH: loop header
LB: loop body
LE: loop exit
PB: predicated region body
PF: predicated region fallthrough
CT: control target
= control target key end

     0   :  { %s4238_s21 = smov 0   ;;  %s6374_s0 = inlined_call_operand.vmem [shape: f32[1024,32], index: 0, kind: input, shape index: {}]   ;;  %s6375_s1 = inlined_call_operand.vmem [shape: f32[3,4,32,8], index: 1, kind: input, shape index: {}]   ;;  %s6376_s2 = inlined_call_operand.vmem [shape: f32[3,4,1,8], index: 2, kind: input, shape index: {}]   ;;  %s6377_s3 = inlined_call_operand.vmem [shape: f32[4,128,128], index: 3, kind: input, shape index: {}]   ;;  %s6378_s4 = inlined_call_operand.vmem [shape: f32[4,8,32], index: 4, kind: input, shape index: {}]   ;;  %s6379_s5 = inlined_call_operand.vmem [shape: f32[1,32], index: 5, kind: input, shape index: {}]   ;;  %s6380_s6 = inlined_call_operand.vmem [shape: f32[1024,32], index: 6, kind: output, shape index: {}]  }
   0x1 LB: > { %s3349_s22 = sadd.s32 4294967295, %s4201_s21   ;;  %p3353_p0 = scmp.ge.s32.totalorder %s4201_s21, 1  ;;  %s4201_s21 = sphi %s4238_s21, %s16_s21  }
   0x2   : > { %p213_p1 = scmp.lt.s32.totalorder %s4201_s21, 9 }
   0x4   : > { %p214_p2 = pnand %p3353_p0, %p213_p1 }
   0x6   : > { %217 = sbr.rel (%p214_p2) target bundleno = 3358 (0xd1e), region = 44 }
   0xb   : > { %v274_v0 = vld [vmem:[%s6375_s1 + $0x18] sm:$0xff]  ;;  %v273_v1 = vld [vmem:[%s6375_s1 + $0x10] sm:$0xff]  ;;  %s3354_s27 = sshll.u32 %s3349_s22, 4  ;;  %v272_v2 = vld [vmem:[%s6375_s1 + $0x8] sm:$0xff]  ;;  %vm279_vm0 = vcmask 261120   ;;  %vm559_vm1 = vcmask 64512  }
   0xc   : > { %3850 = vmatpush.msra.mxu1 %v274_v0  ;;  %p244_p3 = scmp.lt.s32.totalorder %s3354_s27, 127  ;;  %340 = vmatpush.msra.mxu0 %v274_v0  ;;  %v271_v3 = vld [vmem:[%s6375_s1] sm:$0xff]  ;;  %v3377_v4 = vld [vmem:[%s6375_s1 + $0x98] sm:$0xff]  ;;  %v3376_v7 = vld [vmem:[%s6375_s1 + $0x90] sm:$0xff] }
   0xd   : > { %3851 = vmatpush.msra.mxu2 %v274_v0  ;;  %v3375_v8 = vld [vmem:[%s6375_s1 + $0x88] sm:$0xff]  ;;  %v3374_v9 = vld [vmem:[%s6375_s1 + $0x80] sm:$0xff]  ;;  %v3398_v38 = vld [vmem:[%s6375_s1 + $0x118] sm:$0xff] }
   0xe   : > { %3852 = vmatpush.msra.mxu1 %v273_v1  ;;  %s6420_s27 = smov (!%p244_p3, %s3354_s27), 127  ;;  %341 = vmatpush.msra.mxu0 %v273_v1  ;;  %v3397_v39 = vld [vmem:[%s6375_s1 + $0x110] sm:$0xff]  ;;  %v3396_v40 = vld [vmem:[%s6375_s1 + $0x108] sm:$0xff]  ;;  %v3395_v41 = vld [vmem:[%s6375_s1 + $0x100] sm:$0xff] }
   0xf   : > { %3853 = vmatpush.msra.mxu2 %v273_v1  ;;  %s3355_s8 = sshll.u32 %s6420_s27, 3  ;;  %v4427_v45 = vld [vmem:[%s6376_s2 + $0x4] ss:$0 sm:$0xff] }
  0x10   : > { %3854 = vmatpush.msra.mxu1 %v272_v2  ;;  %342 = vmatpush.msra.mxu0 %v272_v2  ;;  %s4269_s13 = scalar_lea.vmem %s6374_s0, %s3355_s8  ;;  %s6268_s23 = scalar_lea.vmem %s6380_s6, %s3355_s8 }
  0x11   : > { %3855 = vmatpush.msra.mxu2 %v272_v2  ;;  %v4272_v5 = vld [vmem:[%s4269_s13 + $0x68] sm:$0xff]  ;;  %v4275_v6 = vld [vmem:[%s4269_s13] sm:$0xff]  ;;  %v4298_v11 = vld [vmem:[%s4269_s13 + $0x10] sm:$0xff] }
  0x12   : > { %3856 = vmatpush.msra.mxu1 %v271_v3  ;;  %343 = vmatpush.msra.mxu0 %v271_v3  ;;  %v4291_v10 = vld [vmem:[%s4269_s13 + $0x8] sm:$0xff]  ;;  %v4305_v12 = vld [vmem:[%s4269_s13 + $0x18] sm:$0xff]  ;;  %v4312_v13 = vld [vmem:[%s4269_s13 + $0x20] sm:$0xff] }
  0x13   : > { %3371 = vmatmul.msk.f32.vlgmr.msra.gmra.mxu1 %vm279_vm0, %v4272_v5  ;;  %3358 = vmatmul.msk.f32.vlgmr.msra.gmra.mxu0 %vm279_vm0, %v4275_v6  ;;  %v4319_v14 = vld [vmem:[%s4269_s13 + $0x28] sm:$0xff]  ;;  %v4326_v15 = vld [vmem:[%s4269_s13 + $0x30] sm:$0xff]  ;;  %v4333_v16 = vld [vmem:[%s4269_s13 + $0x38] sm:$0xff] }
  0x14   : > { %415 = vmatpush.msrb.mxu1 %v3377_v4  ;;  %3857 = vmatpush.msra.mxu2 %v271_v3  ;;  %v4340_v17 = vld [vmem:[%s4269_s13 + $0x40] sm:$0xff]  ;;  %v4347_v18 = vld [vmem:[%s4269_s13 + $0x48] sm:$0xff]  ;;  %v4354_v19 = vld [vmem:[%s4269_s13 + $0x50] sm:$0xff] }
  0x15   : > { %v4359_v20 = vld [vmem:[%s4269_s13 + $0x70] sm:$0xff]  ;;  %v4366_v21 = vld [vmem:[%s4269_s13 + $0x58] sm:$0xff]  ;;  %v4376_v23 = vld [vmem:[%s4269_s13 + $0x60] sm:$0xff] }
  0x16   : > { %416 = vmatpush.msrb.mxu1 %v3376_v7  ;;  %3372 = vmatmul.msk.f32.vlgmr.msra.gmra.mxu2 %vm279_vm0, %v4359_v20  ;;  %v4373_v22 = vld [vmem:[%s4269_s13 + $0x78] sm:$0xff]  ;;  %v4498_v4 = vld [vmem:[%s6376_s2] ss:$0 sm:$0xff] }
  0x17   : > { %490 = vmatpush.msrb.mxu2 %v3398_v38  ;;  %v3472_v38 = vld [vmem:[%s6375_s1 + $0xb8] sm:$0xff] }
  0x18   : > { %417 = vmatpush.msrb.mxu1 %v3375_v8 }
  0x19   : > { %491 = vmatpush.msrb.mxu2 %v3397_v39  ;;  %v3471_v39 = vld [vmem:[%s6375_s1 + $0xb0] sm:$0xff] }
  0x1a   : > { %418 = vmatpush.msrb.mxu1 %v3374_v9 }
  0x1b   : > { %3379 = vmatmul.msk.f32.vlgmr.msrb.gmra.mxu1 %vm279_vm0, %v4275_v6  ;;  %3359 = vmatmul.msk.f32.gmra.mxu0 %vm279_vm0, %v4291_v10 }
  0x1c   : > { %492 = vmatpush.msrb.mxu2 %v3396_v40  ;;  %v3470_v40 = vld [vmem:[%s6375_s1 + $0xa8] sm:$0xff] }
  0x1e   : > { %3373 = vmatmul.msk.f32.gmra.mxu2 %vm279_vm0, %v4373_v22 }
  0x1f   : > { %493 = vmatpush.msrb.mxu2 %v3395_v41 }
  0x21   : > { %1028 = vmatpush.msra.mxu2 %v3472_v38  ;;  %v550_v38 = vld [vmem:[%s6377_s3 + $0x38] sm:$0xff] }
  0x23   : > { %3380 = vmatmul.msk.f32.gmra.mxu1 %vm279_vm0, %v4291_v10  ;;  %3360 = vmatmul.msk.f32.gmra.mxu0 %vm279_vm0, %v4298_v11 }
  0x24   : > { %1029 = vmatpush.msra.mxu2 %v3471_v39  ;;  %v3884_v39 = vld [vmem:[%s6376_s2 + $0x8] ss:$0 sm:$0xff] }
  0x26   : > { %3400 = vmatmul.msk.f32.vlgmr.msrb.gmra.mxu2 %vm279_vm0, %v4275_v6 }
  0x27   : > { %1030 = vmatpush.msra.mxu2 %v3470_v40 }
  0x2b   : > { %3381 = vmatmul.msk.f32.gmra.mxu1 %vm279_vm0, %v4298_v11  ;;  %3361 = vmatmul.msk.f32.gmra.mxu0 %vm279_vm0, %v4305_v12 }
  0x2e   : > { %3401 = vmatmul.msk.f32.gmra.mxu2 %vm279_vm0, %v4291_v10 }
  0x33   : > { %3382 = vmatmul.msk.f32.gmra.mxu1 %vm279_vm0, %v4305_v12  ;;  %3362 = vmatmul.msk.f32.gmra.mxu0 %vm279_vm0, %v4312_v13 }
  0x36   : > { %3402 = vmatmul.msk.f32.gmra.mxu2 %vm279_vm0, %v4298_v11 }
  0x3b   : > { %3383 = vmatmul.msk.f32.gmra.mxu1 %vm279_vm0, %v4312_v13  ;;  %3363 = vmatmul.msk.f32.gmra.mxu0 %vm279_vm0, %v4319_v14 }
  0x3e   : > { %3403 = vmatmul.msk.f32.gmra.mxu2 %vm279_vm0, %v4305_v12 }
  0x43   : > { %3384 = vmatmul.msk.f32.gmra.mxu1 %vm279_vm0, %v4319_v14  ;;  %3364 = vmatmul.msk.f32.gmra.mxu0 %vm279_vm0, %v4326_v15 }
  0x46   : > { %3404 = vmatmul.msk.f32.gmra.mxu2 %vm279_vm0, %v4312_v13 }
  0x4b   : > { %3385 = vmatmul.msk.f32.gmra.mxu1 %vm279_vm0, %v4326_v15  ;;  %3365 = vmatmul.msk.f32.gmra.mxu0 %vm279_vm0, %v4333_v16 }
  0x4e   : > { %3405 = vmatmul.msk.f32.gmra.mxu2 %vm279_vm0, %v4319_v14 }
  0x53   : > { %3386 = vmatmul.msk.f32.gmra.mxu1 %vm279_vm0, %v4333_v16  ;;  %3366 = vmatmul.msk.f32.gmra.mxu0 %vm279_vm0, %v4340_v17 }
  0x56   : > { %3406 = vmatmul.msk.f32.gmra.mxu2 %vm279_vm0, %v4326_v15 }
  0x5b   : > { %3387 = vmatmul.msk.f32.gmra.mxu1 %vm279_vm0, %v4340_v17  ;;  %3367 = vmatmul.msk.f32.gmra.mxu0 %vm279_vm0, %v4347_v18 }
  0x5e   : > { %3407 = vmatmul.msk.f32.gmra.mxu2 %vm279_vm0, %v4333_v16 }
  0x63   : > { %3388 = vmatmul.msk.f32.gmra.mxu1 %vm279_vm0, %v4347_v18  ;;  %3368 = vmatmul.msk.f32.gmra.mxu0 %vm279_vm0, %v4354_v19 }
  0x66   : > { %3408 = vmatmul.msk.f32.gmra.mxu2 %vm279_vm0, %v4340_v17 }
  0x6b   : > { %3389 = vmatmul.msk.f32.gmra.mxu1 %vm279_vm0, %v4354_v19  ;;  %3369 = vmatmul.msk.f32.gmra.mxu0 %vm279_vm0, %v4366_v21 }
  0x6e   : > { %3409 = vmatmul.msk.f32.gmra.mxu2 %vm279_vm0, %v4347_v18 }
  0x73   : > { %3390 = vmatmul.msk.f32.gmra.mxu1 %vm279_vm0, %v4366_v21  ;;  %3370 = vmatmul.msk.f32.gmra.mxu0 %vm279_vm0, %v4376_v23 }
  0x76   : > { %3410 = vmatmul.msk.f32.gmra.mxu2 %vm279_vm0, %v4354_v19 }
  0x7b   : > { %3391 = vmatmul.msk.f32.gmra.mxu1 %vm279_vm0, %v4376_v23 }
  0x7e   : > { %3411 = vmatmul.msk.f32.gmra.mxu2 %vm279_vm0, %v4366_v21 }
  0x83   : > { %3392 = vmatmul.msk.f32.gmra.mxu1 %vm279_vm0, %v4272_v5 }
  0x86   : > { %3412 = vmatmul.msk.f32.gmra.mxu2 %vm279_vm0, %v4376_v23 }
  0x8b   : > { %3393 = vmatmul.msk.f32.gmra.mxu1 %vm279_vm0, %v4359_v20 }
  0x8e   : > { %3413 = vmatmul.msk.f32.gmra.mxu2 %vm279_vm0, %v4272_v5 }
  0x90   : > { %v4390_v24 = vpop.f32.mrf.mxu1  ;;  %v4420_v44 = vpop.f32.mrf.mxu0 }
  0x91   : > { %v346_v9 = vadd.f32 %v4498_v4, %v4420_v44 }
  0x93   : > { %3394 = vmatmul.msk.f32.gmra.mxu1 %vm279_vm0, %v4373_v22 }
  0x96   : > { %3414 = vmatmul.msk.f32.gmra.mxu2 %vm279_vm0, %v4359_v20 }
  0x98   : > { %v4394_v25 = vpop.f32.mrf.mxu1  ;;  %v4435_v49 = vpop.f32.mrf.mxu0 }
  0x99   : > { %v421_v7 = vadd.f32 %v4427_v45, %v4394_v25  ;;  %v349_v25 = vadd.f32 %v4498_v4, %v4435_v49 }
  0x9e   : > { %3415 = vmatmul.msk.f32.gmra.mxu2 %vm279_vm0, %v4373_v22 }
  0xa0   : > { %v4396_v26 = vpop.f32.mrf.mxu1  ;;  %v351_v52 = vpop.f32.mrf.mxu0 }
  0xa1   : > { %v424_v3 = vadd.f32 %v4427_v45, %v4396_v26 }
  0xa8   : > { %v4398_v27 = vpop.f32.mrf.mxu1  ;;  %v354_v56 = vpop.f32.mrf.mxu0 }
  0xa9   : > { %v427_v1 = vadd.f32 %v4427_v45, %v4398_v27 }
  0xb0   : > { %v4400_v28 = vpop.f32.mrf.mxu1  ;;  %v357_v59 = vpop.f32.mrf.mxu0 }
  0xb1   : > { %v430_v0 = vadd.f32 %v4427_v45, %v4400_v28 }
  0xb8   : > { %v4402_v29 = vpop.f32.mrf.mxu1  ;;  %v360_v63 = vpop.f32.mrf.mxu0 }
  0xb9   : > { %v433_v62 = vadd.f32 %v4427_v45, %v4402_v29  ;;  %v361_v8 = vadd.f32 %v4498_v4, %v360_v63 }
  0xc0   : > { %v4404_v30 = vpop.f32.mrf.mxu1  ;;  %v363_v2 = vpop.f32.mrf.mxu0 }
  0xc1   : > { %v436_v61 = vadd.f32 %v4427_v45, %v4404_v30  ;;  %v364_v27 = vadd.f32 %v4498_v4, %v363_v2  ;;  %v352_v30 = vadd.f32 %v4498_v4, %v351_v52 }
  0xc8   : > { %v438_v31 = vpop.f32.mrf.mxu1  ;;  %v366_v26 = vpop.f32.mrf.mxu0 }
  0xc9   : > { %v439_v60 = vadd.f32 %v4427_v45, %v438_v31  ;;  %v367_v29 = vadd.f32 %v4498_v4, %v366_v26 }
  0xd0   : > { %v441_v32 = vpop.f32.mrf.mxu1  ;;  %v369_v28 = vpop.f32.mrf.mxu0 }
  0xd1   : > { %v442_v58 = vadd.f32 %v4427_v45, %v441_v32  ;;  %v370_v32 = vadd.f32 %v4498_v4, %v369_v28  ;;  %v546_v28 = vld [vmem:[%s6377_s3 + $0x18] sm:$0xff] }
  0xd8   : > { %v444_v33 = vpop.f32.mrf.mxu1  ;;  %v372_v31 = vpop.f32.mrf.mxu0 }
  0xd9   : > { %v445_v57 = vadd.f32 %v4427_v45, %v444_v33  ;;  %v355_v33 = vadd.f32 %v4498_v4, %v354_v56 }
  0xe0   : > { %v447_v34 = vpop.f32.mrf.mxu1 }
  0xe1   : > { %v448_v55 = vadd.f32 %v4427_v45, %v447_v34  ;;  %v373_v34 = vadd.f32 %v4498_v4, %v372_v31 }
  0xe8   : > { %v450_v35 = vpop.f32.mrf.mxu1 }
  0xe9   : > { %v451_v54 = vadd.f32 %v4427_v45, %v450_v35  ;;  %v375_v35 = vpop.f32.mrf.mxu0 }
  0xea   : > { %v376_v41 = vadd.f32 %v4498_v4, %v375_v35 }
  0xf0   : > { %v453_v36 = vpop.f32.mrf.mxu1 }
  0xf1   : > { %v454_v53 = vadd.f32 %v4427_v45, %v453_v36  ;;  %v358_v36 = vadd.f32 %v4498_v4, %v357_v59  ;;  %v543_v59 = vld [vmem:[%s6377_s3] sm:$0xff] }
  0xf8   : > { %v456_v37 = vpop.f32.mrf.mxu1 }
  0xf9   : > { %v457_v51 = vadd.f32 %v4427_v45, %v456_v37  ;;  %v387_v37 = vpop.f32.mrf.mxu2 }
 0x100   : > { %v459_v42 = vpop.f32.mrf.mxu1 }
 0x101   : > { %v460_v50 = vadd.f32 %v4427_v45, %v459_v42  ;;  %v3469_v42 = vld [vmem:[%s6375_s1 + $0xa0] sm:$0xff]  ;;  %v390_v44 = vpop.f32.mrf.mxu2 }
 0x102   : > { %1031 = vmatpush.msra.mxu2 %v3469_v42 }
 0x103   : > { %3474 = vmatmul.msk.f32.vlgmr.msra.gmra.mxu2 %vm279_vm0, %v4275_v6 }
 0x108   : > { %v462_v43 = vpop.f32.mrf.mxu1 }
 0x109   : > { %v463_v48 = vadd.f32 %v4427_v45, %v462_v43  ;;  %v378_v43 = vpop.f32.mrf.mxu0 }
 0x10b   : > { %3475 = vmatmul.msk.f32.gmra.mxu2 %vm279_vm0, %v4291_v10 }
 0x110   : > { %v465_v46 = vpop.f32.mrf.mxu1 }
 0x111   : > { %v466_v47 = vadd.f32 %v4427_v45, %v465_v46  ;;  %v379_v45 = vadd.f32 %v4498_v4, %v378_v43  ;;  %v381_v46 = vpop.f32.mrf.mxu0 }
 0x113   : > { %3416 = vmatpush.xpose.msk.msrb.mxu0 %vm559_vm1, %v466_v47  ;;  %3858 = vmatpush.xpose.msk.msra.mxu3 %vm559_vm1, %v466_v47  ;;  %v382_v47 = vadd.f32 %v4498_v4, %v381_v46 }
 0x114   : > { %3476 = vmatmul.msk.f32.gmra.mxu2 %vm279_vm0, %v4298_v11 }
 0x117   : > { %3417 = vmatpush.xpose.msk.msrb.mxu0 %vm559_vm1, %v463_v48  ;;  %3859 = vmatpush.xpose.msk.msra.mxu3 %vm559_vm1, %v463_v48  ;;  %v4559_v48 = vpop.f32.mrf.mxu2 }
 0x11b   : > { %3418 = vmatpush.xpose.msk.msrb.mxu0 %vm559_vm1, %v460_v50  ;;  %3860 = vmatpush.xpose.msk.msra.mxu3 %vm559_vm1, %v460_v50  ;;  %v385_v50 = vadd.f32 %v4498_v4, %v4390_v24 }
 0x11c   : > { %3477 = vmatmul.msk.f32.gmra.mxu2 %vm279_vm0, %v4305_v12 }
 0x11f   : > { %3419 = vmatpush.xpose.msk.msrb.mxu0 %vm559_vm1, %v457_v51  ;;  %3861 = vmatpush.xpose.msk.msra.mxu3 %vm559_vm1, %v457_v51  ;;  %v4564_v49 = vpop.f32.mrf.mxu2  ;;  %v388_v51 = vadd.f32 %v4498_v4, %v387_v37 }
 0x123   : > { %3420 = vmatpush.xpose.msk.msrb.mxu0 %vm559_vm1, %v454_v53  ;;  %3862 = vmatpush.xpose.msk.msra.mxu3 %vm559_vm1, %v454_v53  ;;  %v391_v53 = vadd.f32 %v4498_v4, %v390_v44  ;;  %v549_v4 = vld [vmem:[%s6377_s3 + $0x30] sm:$0xff] }
 0x124   : > { %3478 = vmatmul.msk.f32.gmra.mxu2 %vm279_vm0, %v4312_v13 }
 0x127   : > { %3421 = vmatpush.xpose.msk.msrb.mxu0 %vm559_vm1, %v451_v54  ;;  %3863 = vmatpush.xpose.msk.msra.mxu3 %vm559_vm1, %v451_v54  ;;  %v4572_v52 = vpop.f32.mrf.mxu2 }
 0x12b   : > { %3422 = vmatpush.xpose.msk.msrb.mxu0 %vm559_vm1, %v448_v55  ;;  %3864 = vmatpush.xpose.msk.msra.mxu3 %vm559_vm1, %v448_v55 }
 0x12c   : > { %3479 = vmatmul.msk.f32.gmra.mxu2 %vm279_vm0, %v4319_v14 }
 0x12f   : > { %3423 = vmatpush.xpose.msk.msrb.mxu0 %vm559_vm1, %v445_v57  ;;  %3865 = vmatpush.xpose.msk.msra.mxu3 %vm559_vm1, %v445_v57  ;;  %v4578_v54 = vpop.f32.mrf.mxu2 }
 0x133   : > { %3424 = vmatpush.xpose.msk.msrb.mxu0 %vm559_vm1, %v442_v58  ;;  %3866 = vmatpush.xpose.msk.msra.mxu3 %vm559_vm1, %v442_v58 }
 0x134   : > { %3480 = vmatmul.msk.f32.gmra.mxu2 %vm279_vm0, %v4326_v15 }
 0x137   : > { %3425 = vmatpush.xpose.msk.msrb.mxu0 %vm559_vm1, %v439_v60  ;;  %3867 = vmatpush.xpose.msk.msra.mxu3 %vm559_vm1, %v439_v60  ;;  %v4583_v24 = vpop.f32.mrf.mxu2 }
 0x13b   : > { %3426 = vmatpush.xpose.msk.msrb.mxu0 %vm559_vm1, %v436_v61  ;;  %3868 = vmatpush.xpose.msk.msra.mxu3 %vm559_vm1, %v436_v61 }
 0x13c   : > { %3481 = vmatmul.msk.f32.gmra.mxu2 %vm279_vm0, %v4333_v16 }
 0x13f   : > { %3427 = vmatpush.xpose.msk.msrb.mxu0 %vm559_vm1, %v433_v62  ;;  %3869 = vmatpush.xpose.msk.msra.mxu3 %vm559_vm1, %v433_v62  ;;  %v4587_v55 = vpop.f32.mrf.mxu2 }
 0x143   : > { %3428 = vmatpush.xpose.msk.msrb.mxu0 %vm559_vm1, %v430_v0  ;;  %3870 = vmatpush.xpose.msk.msra.mxu3 %vm559_vm1, %v430_v0  ;;  %v544_v0 = vld [vmem:[%s6377_s3 + $0x8] sm:$0xff] }
 0x144   : > { %3482 = vmatmul.msk.f32.gmra.mxu2 %vm279_vm0, %v4340_v17 }
 0x147   : > { %3429 = vmatpush.xpose.msk.msrb.mxu0 %vm559_vm1, %v427_v1  ;;  %3871 = vmatpush.xpose.msk.msra.mxu3 %vm559_vm1, %v427_v1  ;;  %v4591_v56 = vpop.f32.mrf.mxu2 }
 0x14b   : > { %3430 = vmatpush.xpose.msk.msrb.mxu0 %vm559_vm1, %v424_v3  ;;  %3872 = vmatpush.xpose.msk.msra.mxu3 %vm559_vm1, %v424_v3 }
 0x14c   : > { %3483 = vmatmul.msk.f32.gmra.mxu2 %vm279_vm0, %v4347_v18 }
 0x14f   : > { %3431 = vmatpush.xpose.msk.msrb.mxu0 %vm559_vm1, %v421_v7  ;;  %3873 = vmatpush.xpose.msk.msra.mxu3 %vm559_vm1, %v421_v7  ;;  %v4595_v57 = vpop.f32.mrf.mxu2 }
 0x152   : > { %3432 = vmatmul.msk.f32.vlgmr.msrb.gmra.mxu0 %vm559_vm1, %v346_v9  ;;  %3437 = vmatmul.msk.f32.vlgmr.msra.gmra.mxu3 %vm559_vm1, %v361_v8  ;;  %v545_v8 = vld [vmem:[%s6377_s3 + $0x10] sm:$0xff] }
 0x154   : > { %3484 = vmatmul.msk.f32.gmra.mxu2 %vm279_vm0, %v4354_v19 }
 0x157   : > { %v519_v58 = vpop.f32.mrf.mxu2 }
 0x15a   : > { %3433 = vmatmul.msk.f32.gmra.mxu0 %vm559_vm1, %v349_v25  ;;  %3438 = vmatmul.msk.f32.gmra.mxu3 %vm559_vm1, %v364_v27 }
 0x15c   : > { %3485 = vmatmul.msk.f32.gmra.mxu2 %vm279_vm0, %v4366_v21 }
 0x15f   : > { %v522_v61 = vpop.f32.mrf.mxu2 }
 0x162   : > { %3434 = vmatmul.msk.f32.gmra.mxu0 %vm559_vm1, %v352_v30  ;;  %3439 = vmatmul.msk.f32.gmra.mxu3 %vm559_vm1, %v367_v29 }
 0x164   : > { %3486 = vmatmul.msk.f32.gmra.mxu2 %vm279_vm0, %v4376_v23 }
 0x167   : > { %v525_v2 = vpop.f32.mrf.mxu2 }
 0x16a   : > { %3435 = vmatmul.msk.f32.gmra.mxu0 %vm559_vm1, %v355_v33  ;;  %3440 = vmatmul.msk.f32.gmra.mxu3 %vm559_vm1, %v370_v32  ;;  %v547_v32 = vld [vmem:[%s6377_s3 + $0x20] sm:$0xff] }
 0x16c   : > { %3487 = vmatmul.msk.f32.gmra.mxu2 %vm279_vm0, %v4272_v5 }
 0x16f   : > { %v528_v27 = vpop.f32.mrf.mxu2 }
 0x170   : > { %v529_v46 = vadd.f32 %v3884_v39, %v528_v27 }
 0x172   : > { %3436 = vmatmul.msk.f32.gmra.mxu0 %vm559_vm1, %v358_v36  ;;  %3441 = vmatmul.msk.f32.gmra.mxu3 %vm559_vm1, %v373_v34  ;;  %v548_v36 = vld [vmem:[%s6377_s3 + $0x28] sm:$0xff] }
 0x174   : > { %3488 = vmatmul.msk.f32.gmra.mxu2 %vm279_vm0, %v4359_v20 }
 0x177   : > { %v531_v30 = vpop.f32.mrf.mxu2 }
 0x17a   : > { %3442 = vmatmul.msk.f32.gmra.mxu3 %vm559_vm1, %v376_v41 }
 0x17c   : > { %3489 = vmatmul.msk.f32.gmra.mxu2 %vm279_vm0, %v4373_v22 }
 0x17f   : > { %v534_v34 = vpop.f32.mrf.mxu2 }
 0x180   : > { %v535_v44 = vadd.f32 %v3884_v39, %v534_v34 }
 0x182   : > { %3443 = vmatmul.msk.f32.gmra.mxu3 %vm559_vm1, %v379_v45  ;;  %v532_v45 = vadd.f32 %v3884_v39, %v531_v30 }
 0x187   : > { %v537_v5 = vpop.f32.mrf.mxu2 }
 0x188   : > { %v538_v42 = vadd.f32 %v3884_v39, %v537_v5 }
 0x18a   : > { %3444 = vmatmul.msk.f32.gmra.mxu3 %vm559_vm1, %v382_v47 }
 0x18f   : > { %v540_v20 = vpop.f32.mrf.mxu2 }
 0x190   : > { %v541_v43 = vadd.f32 %v3884_v39, %v540_v20 }
 0x192   : > { %3445 = vmatmul.msk.f32.gmra.mxu3 %vm559_vm1, %v385_v50  ;;  %865 = vmatpush.msra.mxu0 %v541_v43  ;;  %v526_v50 = vadd.f32 %v3884_v39, %v525_v2  ;;  %v505_v2 = vadd.f32 %v3884_v39, %v4578_v54 }
 0x194   : > { %866 = vmatpush.msra.mxu0 %v538_v42  ;;  %v552_v42 = vld [vmem:[%s6377_s3 + $0x48] sm:$0xff] }
 0x196   : > { %867 = vmatpush.msra.mxu0 %v535_v44 }
 0x197   : > { %v4664_v47 = vpop.f32.mrf.mxu2 }
 0x198   : > { %868 = vmatpush.msra.mxu0 %v532_v45 }
 0x19a   : > { %3446 = vmatmul.msk.f32.gmra.mxu3 %vm559_vm1, %v388_v51  ;;  %v523_v51 = vadd.f32 %v3884_v39, %v522_v61  ;;  %869 = vmatpush.msra.mxu0 %v529_v46 }
 0x19c   : > { %870 = vmatpush.msra.mxu0 %v526_v50 }
 0x19e   : > { %871 = vmatpush.msra.mxu0 %v523_v51  ;;  %v553_v51 = vld [vmem:[%s6377_s3 + $0x50] sm:$0xff] }
 0x1a2   : > { %3447 = vmatmul.msk.f32.gmra.mxu3 %vm559_vm1, %v391_v53  ;;  %v520_v53 = vadd.f32 %v3884_v39, %v519_v58  ;;  %v502_v58 = vadd.f32 %v3884_v39, %v4572_v52 }
 0x1a4   : > { %872 = vmatpush.msra.mxu0 %v520_v53 }
 0x1cf   : > { %v673_v60 = vpop.f32.mrf.mxu0 }
 0x1d0   : > { %v4604_v62 = vadd.f32 %v673_v60, %v543_v59  ;;  %v517_v59 = vadd.f32 %v3884_v39, %v4595_v57  ;;  %v4667_v60 = vpop.f32.mrf.mxu2  ;;  %v499_v57 = vadd.f32 %v3884_v39, %v4564_v49 }
 0x1d2   : > { %721 = vmax.xlane.f32.xlu0 %v4604_v62  ;;  %873 = vmatpush.msra.mxu0 %v517_v59 }
 0x1d5   : > { %v688_v63 = vpop.f32.mrf.mxu3 }
 0x1d6   : > { %v4650_v37 = vadd.f32 %v688_v63, %v548_v36  ;;  %v514_v63 = vadd.f32 %v3884_v39, %v4591_v56  ;;  %v496_v56 = vadd.f32 %v3884_v39, %v4559_v48 }
 0x1d7   : > { %v676_v1 = vpop.f32.mrf.mxu0 }
 0x1d8   : > { %v4612_v3 = vadd.f32 %v676_v1, %v544_v0  ;;  %v511_v0 = vadd.f32 %v3884_v39, %v4587_v55  ;;  %v508_v1 = vadd.f32 %v3884_v39, %v4583_v24  ;;  %874 = vmatpush.msra.mxu0 %v514_v63  ;;  %v4673_v61 = vpop.f32.mrf.mxu2 }
 0x1da   : > { %723 = vmax.xlane.f32.xlu0 %v4612_v3  ;;  %875 = vmatpush.msra.mxu0 %v511_v0 }
 0x1dc   : > { %876 = vmatpush.msra.mxu0 %v508_v1 }
 0x1dd   : > { %v691_v7 = vpop.f32.mrf.mxu3 }
 0x1de   : > { %v4623_v9 = vadd.f32 %v691_v7, %v549_v4  ;;  %877 = vmatpush.msra.mxu0 %v505_v2 }
 0x1df   : > { %v679_v26 = vpop.f32.mrf.mxu0 }
 0x1e0   : > { %v4625_v25 = vadd.f32 %v679_v26, %v545_v8  ;;  %878 = vmatpush.msra.mxu0 %v502_v58  ;;  %v4678_v55 = vpop.f32.mrf.mxu2 }
 0x1e2   : > { %725 = vmax.xlane.f32.xlu1 %v4625_v25  ;;  %733 = vmax.xlane.f32.xlu0 %v4623_v9 }
 0x1e3   : > { %879 = vmatpush.msra.mxu0 %v499_v57 }
 0x1e5   : > { %v694_v40 = vpop.f32.mrf.mxu3  ;;  %880 = vmatpush.msra.mxu0 %v496_v56  ;;  %v554_v56 = vld [vmem:[%s6377_s3 + $0x58] sm:$0xff] }
 0x1e6   : > { %v4661_v41 = vadd.f32 %v694_v40, %v550_v38 }
 0x1e7   : > { %v682_v29 = vpop.f32.mrf.mxu0 }
 0x1e8   : > { %v4634_v31 = vadd.f32 %v682_v29, %v546_v28  ;;  %v4680_v24 = vpop.f32.mrf.mxu2 }
 0x1ea   : > { %727 = vmax.xlane.f32.xlu1 %v4634_v31 }
 0x1ed   : > { %v697_v7 = vpop.f32.mrf.mxu3 }
 0x1ef   : > { %v685_v33 = vpop.f32.mrf.mxu0 }
 0x1f0   : > { %v4642_v35 = vadd.f32 %v685_v33, %v547_v32  ;;  %v4682_v4 = vpop.f32.mrf.mxu2 }
 0x1f2   : > { %729 = vmax.xlane.f32.xlu2 %v4642_v35 }
 0x1f5   : > { %v700_v26 = vpop.f32.mrf.mxu3 }
 0x1f6   : > { %v4713_v44 = vadd.f32 %v700_v26, %v552_v42  ;;  %v556_v42 = vld [vmem:[%s6377_s3 + $0x68] sm:$0xff] }
 0x1f8   : > { %v4684_v54 = vpop.f32.mrf.mxu2 }
 0x1fa   : > { %731 = vmax.xlane.f32.xlu2 %v4650_v37 }
 0x1fd   : > { %v703_v34 = vpop.f32.mrf.mxu3 }
 0x1fe   : > { %v4725_v63 = vadd.f32 %v703_v34, %v553_v51 }
 0x200   : > { %v4686_v8 = vpop.f32.mrf.mxu2 }
 0x202   : > { %735 = vmax.xlane.f32.xlu2 %v4661_v41 }
 0x205   : > { %v706_v20 = vpop.f32.mrf.mxu3 }
 0x208   : > { %v4689_v48 = vpop.f32.mrf.mxu2 }
 0x20d   : > { %v709_v59 = vpop.f32.mrf.mxu3 }
 0x210   : > { %v4694_v33 = vpop.f32.mrf.mxu2 }
 0x218   : > { %v4705_v40 = vpop.f32.mrf.mxu2 }
 0x220   : > { %v4717_v50 = vpop.f32.mrf.mxu2 }
 0x228   : > { %v1069_v58 = vpop.f32.mrf.mxu2 }
 0x245   : > { %v722_v52 = vpop.xlane.xlu0 %721 }
 0x246   : > { %v753_v49 = vsub.f32 %v4604_v62, %v722_v52  ;;  %v551_v62 = vld [vmem:[%s6377_s3 + $0x40] sm:$0xff] }
 0x247   : > { %v4701_v38 = vadd.f32 %v697_v7, %v551_v62 }
 0x248   : > { %v769_v27 = vmul.f32 1.442695, %v753_v49  ;;  %v4736_v49 = vadd.f32 %v706_v20, %v554_v56 }
 0x24a   : > { %3895 = vpow2.f32 %v769_v27  ;;  %v712_v27 = vpop.f32.mrf.mxu3 }
 0x24d   : > { %v724_v28 = vpop.xlane.xlu0 %723 }
 0x24e   : > { %v754_v29 = vsub.f32 %v4612_v3, %v724_v28 }
 0x250   : > { %v4692_v30 = vpop.eup %3895  ;;  %v771_v32 = vmul.f32 1.442695, %v754_v29  ;;  %v1072_v29 = vpop.f32.mrf.mxu2 }
 0x251   : > { %801 = vadd.xlane.f32.xlu1 %v4692_v30 }
 0x252   : > { %3897 = vpow2.f32 %v771_v32 }
 0x255   : > { %v726_v36 = vpop.xlane.xlu1 %725  ;;  %v734_v1 = vpop.xlane.xlu0 %733 }
 0x256   : > { %v755_v5 = vsub.f32 %v4625_v25, %v726_v36  ;;  %v759_v57 = vsub.f32 %v4623_v9, %v734_v1  ;;  %v555_v9 = vld [vmem:[%s6377_s3 + $0x60] sm:$0xff]  ;;  %v558_v1 = vld [vmem:[%s6377_s3 + $0x78] sm:$0xff] }
 0x257   : > { %v4746_v34 = vadd.f32 %v709_v59, %v555_v9 }
 0x258   : > { %v4703_v39 = vpop.eup %3897  ;;  %v773_v3 = vmul.f32 1.442695, %v755_v5  ;;  %v781_v52 = vmul.f32 1.442695, %v759_v57  ;;  %v715_v5 = vpop.f32.mrf.mxu3 }
 0x259   : > { %737 = vmax.xlane.f32.xlu1 %v4701_v38  ;;  %803 = vadd.xlane.f32.xlu0 %v4703_v39 }
 0x25a   : > { %3899 = vpow2.f32 %v773_v3  ;;  %v1075_v3 = vpop.f32.mrf.mxu2 }
 0x25d   : > { %v728_v43 = vpop.xlane.xlu1 %727 }
 0x25e   : > { %v756_v25 = vsub.f32 %v4634_v31, %v728_v43  ;;  %v3885_v43 = vld [vmem:[%s6376_s2 + $0x5] ss:$0 sm:$0xff] }
 0x25f   : > { %v1073_v56 = vadd.f32 %v3885_v43, %v1072_v29  ;;  %v1046_v29 = vadd.f32 %v3885_v43, %v4680_v24  ;;  %v1040_v9 = vadd.f32 %v3885_v43, %v4673_v61  ;;  %v3451_v24 = vld [vmem:[%s6375_s1 + $0x38] sm:$0xff] }
 0x260   : > { %v4715_v45 = vpop.eup %3899  ;;  %v775_v46 = vmul.f32 1.442695, %v756_v25  ;;  %953 = vmatpush.msra.mxu1 %v3451_v24 }
 0x261   : > { %805 = vadd.xlane.f32.xlu2 %v4715_v45  ;;  %739 = vmax.xlane.f32.xlu0 %v4713_v44 }
 0x262   : > { %3901 = vpow2.f32 %v775_v46  ;;  %v4766_v46 = vadd.f32 %v712_v27, %v556_v42  ;;  %v1061_v27 = vadd.f32 %v3885_v43, %v4694_v33  ;;  %v3492_v33 = vld [vmem:[%s6375_s1 + $0x130] sm:$0xff] }
 0x265   : > { %v730_v53 = vpop.xlane.xlu2 %729 }
 0x266   : > { %v757_v31 = vsub.f32 %v4642_v35, %v730_v53  ;;  %v1078_v53 = vpop.f32.mrf.mxu2 }
 0x267   : > { %v1079_v59 = vadd.f32 %v3885_v43, %v1078_v53 }
 0x268   : > { %v4727_v0 = vpop.eup %3901  ;;  %v777_v2 = vmul.f32 1.442695, %v757_v31  ;;  %v718_v31 = vpop.f32.mrf.mxu3 }
 0x269   : > { %741 = vmax.xlane.f32.xlu2 %v4725_v63  ;;  %807 = vadd.xlane.f32.xlu1 %v4727_v0  ;;  %v4777_v57 = vadd.f32 %v718_v31, %v558_v1 }
 0x26a   : > { %3903 = vpow2.f32 %v777_v2  ;;  %v1076_v2 = vadd.f32 %v3885_v43, %v1075_v3  ;;  %3527 = vmatpush.xpose.msk.msrb.mxu0 %vm559_vm1, %v1079_v59 }
 0x26d   : > { %v732_v7 = vpop.xlane.xlu2 %731 }
 0x26e   : > { %v758_v35 = vsub.f32 %v4650_v37, %v732_v7  ;;  %3528 = vmatpush.xpose.msk.msrb.mxu0 %vm559_vm1, %v1076_v2  ;;  %v1070_v7 = vadd.f32 %v3885_v43, %v1069_v58  ;;  %v1055_v58 = vadd.f32 %v3885_v43, %v4686_v8  ;;  %v3491_v8 = vld [vmem:[%s6375_s1 + $0x128] sm:$0xff] }
 0x270   : > { %v4738_v26 = vpop.eup %3903  ;;  %v779_v28 = vmul.f32 1.442695, %v758_v35  ;;  %v1067_v35 = vadd.f32 %v3885_v43, %v4717_v50  ;;  %v1052_v50 = vadd.f32 %v3885_v43, %v4684_v54  ;;  %v3490_v54 = vld [vmem:[%s6375_s1 + $0x120] sm:$0xff] }
 0x271   : > { %743 = vmax.xlane.f32.xlu1 %v4736_v49  ;;  %809 = vadd.xlane.f32.xlu0 %v4738_v26 }
 0x272   : > { %3905 = vpow2.f32 %v779_v28  ;;  %3529 = vmatpush.xpose.msk.msrb.mxu0 %vm559_vm1, %v1073_v56  ;;  %v1058_v28 = vadd.f32 %v3885_v43, %v4689_v48  ;;  %v1049_v48 = vadd.f32 %v3885_v43, %v4682_v4  ;;  %v1043_v4 = vadd.f32 %v3885_v43, %v4678_v55 }
 0x273   : > { %3907 = vpow2.f32 %v781_v52  ;;  %v1064_v52 = vadd.f32 %v3885_v43, %v4705_v40  ;;  %v3493_v40 = vld [vmem:[%s6375_s1 + $0x138] sm:$0xff]  ;;  %v1034_v55 = vadd.f32 %v3885_v43, %v4664_v47 }
 0x274   : > { %1103 = vmatpush.msrb.mxu3 %v3493_v40 }
 0x275   : > { %v736_v32 = vpop.xlane.xlu2 %735 }
 0x276   : > { %v760_v37 = vsub.f32 %v4661_v41, %v736_v32  ;;  %v557_v41 = vld [vmem:[%s6377_s3 + $0x70] sm:$0xff]  ;;  %3530 = vmatpush.xpose.msk.msrb.mxu0 %vm559_vm1, %v1070_v7  ;;  %1104 = vmatpush.msrb.mxu3 %v3492_v33  ;;  %v1037_v32 = vadd.f32 %v3885_v43, %v4667_v60 }
 0x277   : > { %v4764_v25 = vadd.f32 %v715_v5, %v557_v41 }
 0x278   : > { %v4748_v62 = vpop.eup %3905  ;;  %v783_v36 = vmul.f32 1.442695, %v760_v37  ;;  %1105 = vmatpush.msrb.mxu3 %v3491_v8 }
 0x279   : > { %v4750_v20 = vpop.eup %3907  ;;  %811 = vadd.xlane.f32.xlu2 %v4748_v62  ;;  %745 = vmax.xlane.f32.xlu0 %v4746_v34 }
 0x27a   : > { %3909 = vpow2.f32 %v783_v36  ;;  %813 = vadd.xlane.f32.xlu1 %v4750_v20  ;;  %3531 = vmatpush.xpose.msk.msrb.mxu0 %vm559_vm1, %v1067_v35 }
 0x27b   : > { %1106 = vmatpush.msrb.mxu3 %v3490_v54 }
 0x27c   : > { %3495 = vmatmul.msk.f32.vlgmr.msrb.gmra.mxu3 %vm279_vm0, %v4275_v6 }
 0x27e   : > { %3532 = vmatpush.xpose.msk.msrb.mxu0 %vm559_vm1, %v1064_v52  ;;  %v3449_v52 = vld [vmem:[%s6375_s1 + $0x28] sm:$0xff] }
 0x280   : > { %v4768_v51 = vpop.eup %3909 }
 0x281   : > { %747 = vmax.xlane.f32.xlu2 %v4766_v46  ;;  %815 = vadd.xlane.f32.xlu0 %v4768_v51 }
 0x282   : > { %749 = vmax.xlane.f32.xlu1 %v4764_v25  ;;  %3533 = vmatpush.xpose.msk.msrb.mxu0 %vm559_vm1, %v1061_v27 }
 0x284   : > { %3496 = vmatmul.msk.f32.gmra.mxu3 %vm279_vm0, %v4291_v10 }
 0x286   : > { %3534 = vmatpush.xpose.msk.msrb.mxu0 %vm559_vm1, %v1058_v28 }
 0x289   : > { %751 = vmax.xlane.f32.xlu0 %v4777_v57 }
 0x28a   : > { %3535 = vmatpush.xpose.msk.msrb.mxu0 %vm559_vm1, %v1055_v58 }
 0x28c   : > { %3497 = vmatmul.msk.f32.gmra.mxu3 %vm279_vm0, %v4298_v11 }
 0x28e   : > { %3536 = vmatpush.xpose.msk.msrb.mxu0 %vm559_vm1, %v1052_v50 }
 0x292   : > { %3537 = vmatpush.xpose.msk.msrb.mxu0 %vm559_vm1, %v1049_v48 }
 0x294   : > { %3498 = vmatmul.msk.f32.gmra.mxu3 %vm279_vm0, %v4305_v12 }
 0x296   : > { %3538 = vmatpush.xpose.msk.msrb.mxu0 %vm559_vm1, %v1046_v29 }
 0x29a   : > { %3539 = vmatpush.xpose.msk.msrb.mxu0 %vm559_vm1, %v1043_v4 }
 0x29c   : > { %3499 = vmatmul.msk.f32.gmra.mxu3 %vm279_vm0, %v4312_v13  ;;  %v3450_v13 = vld [vmem:[%s6375_s1 + $0x30] sm:$0xff] }
 0x29d   : > { %954 = vmatpush.msra.mxu1 %v3450_v13 }
 0x29e   : > { %3540 = vmatpush.xpose.msk.msrb.mxu0 %vm559_vm1, %v1040_v9 }
 0x29f   : > { %955 = vmatpush.msra.mxu1 %v3449_v52 }
 0x2a2   : > { %3541 = vmatpush.xpose.msk.msrb.mxu0 %vm559_vm1, %v1037_v32  ;;  %v4885_v32 = vld [vmem:[%s4269_s13 + $0x10] sm:$0xff] }
 0x2a4   : > { %3500 = vmatmul.msk.f32.gmra.mxu3 %vm279_vm0, %v4319_v14 }
 0x2a6   : > { %3542 = vmatpush.xpose.msk.msrb.mxu0 %vm559_vm1, %v1034_v55 }
 0x2ac   : > { %3501 = vmatmul.msk.f32.gmra.mxu3 %vm279_vm0, %v4326_v15 }
 0x2b4   : > { %3502 = vmatmul.msk.f32.gmra.mxu3 %vm279_vm0, %v4333_v16 }
 0x2bc   : > { %3503 = vmatmul.msk.f32.gmra.mxu3 %vm279_vm0, %v4340_v17 }
 0x2c4   : > { %v802_v61 = vpop.xlane.xlu1 %801  ;;  %3504 = vmatmul.msk.f32.gmra.mxu3 %vm279_vm0, %v4347_v18 }
 0x2c5   : > { %3911 = vrcp.f32 %v802_v61 }
 0x2cb   : > { %v3912_v60 = vpop.eup %3911 }
 0x2cc   : > { %v738_v37 = vpop.xlane.xlu1 %737  ;;  %v804_v36 = vpop.xlane.xlu0 %803  ;;  %v849_v5 = vmul.f32 %v3912_v60, %v4692_v30  ;;  %3505 = vmatmul.msk.f32.gmra.mxu3 %vm279_vm0, %v4354_v19  ;;  %v4900_v19 = vld [vmem:[%s4269_s13 + $0x18] sm:$0xff]  ;;  %v4910_v60 = vld [vmem:[%s4269_s13 + $0x20] sm:$0xff] }
 0x2cd   : > { %v761_v3 = vsub.f32 %v4701_v38, %v738_v37  ;;  %3913 = vrcp.f32 %v804_v36  ;;  %v4927_v37 = vld [vmem:[%s4269_s13 + $0x30] sm:$0xff] }
 0x2ce   : > { %881 = vmatmul.f32.vlgmr.msra.gmra.mxu0 %v849_v5  ;;  %v4932_v36 = vld [vmem:[%s4269_s13 + $0x70] sm:$0xff]  ;;  %v930_v5 = vld [vmem:[%s6378_s4] sm:$0xff] }
 0x2cf   : > { %v785_v11 = vmul.f32 1.442695, %v761_v3  ;;  %1721 = vmatpush.msra.mxu3 %v930_v5  ;;  %v4947_v3 = vld [vmem:[%s4269_s13 + $0x40] sm:$0xff] }
 0x2d1   : > { %3915 = vpow2.f32 %v785_v11 }
 0x2d3   : > { %v3914_v47 = vpop.eup %3913 }
 0x2d4   : > { %v806_v41 = vpop.xlane.xlu2 %805  ;;  %v740_v42 = vpop.xlane.xlu0 %739  ;;  %v850_v43 = vmul.f32 %v3914_v47, %v4703_v39  ;;  %3506 = vmatmul.msk.f32.gmra.mxu3 %vm279_vm0, %v4366_v21  ;;  %v4922_v21 = vld [vmem:[%s4269_s13 + $0x68] sm:$0xff] }
 0x2d5   : > { %3917 = vrcp.f32 %v806_v41  ;;  %v762_v12 = vsub.f32 %v4713_v44, %v740_v42  ;;  %v4954_v47 = vld [vmem:[%s4269_s13 + $0x48] sm:$0xff] }
 0x2d6   : > { %884 = vmatmul.f32.gmra.mxu0 %v850_v43  ;;  %v4968_v43 = vld [vmem:[%s4269_s13 + $0x58] sm:$0xff] }
 0x2d7   : > { %v4838_v30 = vpop.eup %3915  ;;  %v787_v38 = vmul.f32 1.442695, %v762_v12 }
 0x2d8   : > { %817 = vadd.xlane.f32.xlu2 %v4838_v30 }
 0x2d9   : > { %3919 = vpow2.f32 %v787_v38 }
 0x2db   : > { %v3918_v53 = vpop.eup %3917 }
 0x2dc   : > { %v742_v39 = vpop.xlane.xlu2 %741  ;;  %v808_v59 = vpop.xlane.xlu1 %807  ;;  %v851_v44 = vmul.f32 %v3918_v53, %v4715_v45  ;;  %3507 = vmatmul.msk.f32.gmra.mxu3 %vm279_vm0, %v4376_v23  ;;  %v4937_v23 = vld [vmem:[%s4269_s13 + $0x38] sm:$0xff]  ;;  %v4976_v53 = vld [vmem:[%s4269_s13 + $0x60] sm:$0xff] }
 0x2dd   : > { %v763_v31 = vsub.f32 %v4725_v63, %v742_v39  ;;  %3921 = vrcp.f32 %v808_v59 }
 0x2de   : > { %887 = vmatmul.f32.gmra.mxu0 %v851_v44 }
 0x2df   : > { %v4848_v14 = vpop.eup %3919  ;;  %v789_v1 = vmul.f32 1.442695, %v763_v31 }
 0x2e0   : > { %819 = vadd.xlane.f32.xlu1 %v4848_v14 }
 0x2e1   : > { %3923 = vpow2.f32 %v789_v1 }
 0x2e3   : > { %v3922_v2 = vpop.eup %3921 }
 0x2e4   : > { %v744_v56 = vpop.xlane.xlu1 %743  ;;  %v810_v7 = vpop.xlane.xlu0 %809  ;;  %v852_v35 = vmul.f32 %v3922_v2, %v4727_v0  ;;  %v3448_v0 = vld [vmem:[%s6375_s1 + $0x20] sm:$0xff]  ;;  %3508 = vmatmul.msk.f32.gmra.mxu3 %vm279_vm0, %v4922_v21 }
 0x2e5   : > { %v764_v45 = vsub.f32 %v4736_v49, %v744_v56  ;;  %3925 = vrcp.f32 %v810_v7  ;;  %956 = vmatpush.msra.mxu1 %v3448_v0 }
 0x2e6   : > { %890 = vmatmul.f32.gmra.mxu0 %v852_v35  ;;  %3453 = vmatmul.msk.f32.vlgmr.msra.gmra.mxu1 %vm279_vm0, %v4275_v6 }
 0x2e7   : > { %v4855_v15 = vpop.eup %3923  ;;  %v791_v63 = vmul.f32 1.442695, %v764_v45 }
 0x2e8   : > { %821 = vadd.xlane.f32.xlu2 %v4855_v15 }
 0x2e9   : > { %3927 = vpow2.f32 %v791_v63 }
 0x2eb   : > { %v3926_v49 = vpop.eup %3925 }
 0x2ec   : > { %v812_v27 = vpop.xlane.xlu2 %811  ;;  %v746_v16 = vpop.xlane.xlu0 %745  ;;  %v853_v28 = vmul.f32 %v3926_v49, %v4738_v26  ;;  %3509 = vmatmul.msk.f32.gmra.mxu3 %vm279_vm0, %v4932_v36 }
 0x2ed   : > { %3929 = vrcp.f32 %v812_v27  ;;  %v814_v58 = vpop.xlane.xlu1 %813  ;;  %v765_v50 = vsub.f32 %v4746_v34, %v746_v16  ;;  %v4997_v27 = vld [vmem:[%s4269_s13 + $0x78] sm:$0xff] }
 0x2ee   : > { %893 = vmatmul.f32.gmra.mxu0 %v853_v28  ;;  %3454 = vmatmul.msk.f32.gmra.mxu1 %vm279_vm0, %v4291_v10 }
 0x2ef   : > { %v4870_v40 = vpop.eup %3927  ;;  %v793_v33 = vmul.f32 1.442695, %v765_v50 }
 0x2f0   : > { %823 = vadd.xlane.f32.xlu0 %v4870_v40 }
 0x2f1   : > { %3931 = vpow2.f32 %v793_v33 }
 0x2f2   : > { %3933 = vrcp.f32 %v814_v58 }
 0x2f3   : > { %v3930_v48 = vpop.eup %3929 }
 0x2f4   : > { %v748_v26 = vpop.xlane.xlu2 %747  ;;  %v816_v8 = vpop.xlane.xlu0 %815  ;;  %v854_v6 = vmul.f32 %v3930_v48, %v4748_v62  ;;  %3510 = vmatmul.msk.f32.gmra.mxu3 %vm279_vm0, %v4373_v22  ;;  %v4961_v22 = vld [vmem:[%s4269_s13 + $0x50] sm:$0xff] }
 0x2f5   : > { %v766_v34 = vsub.f32 %v4766_v46, %v748_v26  ;;  %v750_v17 = vpop.xlane.xlu1 %749 }
 0x2f6   : > { %v767_v54 = vsub.f32 %v4764_v25, %v750_v17  ;;  %896 = vmatmul.f32.gmra.mxu0 %v854_v6  ;;  %3455 = vmatmul.msk.f32.gmra.mxu1 %vm279_vm0, %v4885_v32 }
 0x2f7   : > { %v4880_v29 = vpop.eup %3931  ;;  %v795_v4 = vmul.f32 1.442695, %v766_v34 }
 0x2f8   : > { %v797_v9 = vmul.f32 1.442695, %v767_v54  ;;  %825 = vadd.xlane.f32.xlu1 %v4880_v29  ;;  %v3934_v62 = vpop.eup %3933 }
 0x2f9   : > { %3935 = vpow2.f32 %v795_v4  ;;  %v855_v46 = vmul.f32 %v3934_v62, %v4750_v20 }
 0x2fa   : > { %3937 = vpow2.f32 %v797_v9 }
 0x2fb   : > { %3939 = vrcp.f32 %v816_v8 }
 0x2fc   : > { %v752_v10 = vpop.xlane.xlu0 %751 }
 0x2fd   : > { %v768_v18 = vsub.f32 %v4777_v57, %v752_v10 }
 0x2fe   : > { %899 = vmatmul.f32.gmra.mxu0 %v855_v46  ;;  %3456 = vmatmul.msk.f32.gmra.mxu1 %vm279_vm0, %v4900_v19 }
 0x2ff   : > { %v4892_v25 = vpop.eup %3935  ;;  %v799_v24 = vmul.f32 1.442695, %v768_v18  ;;  %v4951_v11 = vpop.f32.mrf.mxu3 }
 0x300   : > { %v4894_v55 = vpop.eup %3937  ;;  %827 = vadd.xlane.f32.xlu2 %v4892_v25 }
 0x301   : > { %v3940_v20 = vpop.eup %3939  ;;  %3941 = vpow2.f32 %v799_v24  ;;  %829 = vadd.xlane.f32.xlu0 %v4894_v55 }
 0x302   : > { %v856_v57 = vmul.f32 %v3940_v20, %v4768_v51  ;;  %v4917_v51 = vld [vmem:[%s4269_s13 + $0x28] sm:$0xff] }
 0x306   : > { %902 = vmatmul.f32.gmra.mxu0 %v856_v57  ;;  %3457 = vmatmul.msk.f32.gmra.mxu1 %vm279_vm0, %v4910_v60 }
 0x307   : > { %v4906_v61 = vpop.eup %3941  ;;  %v4958_v41 = vpop.f32.mrf.mxu3 }
 0x308   : > { %831 = vadd.xlane.f32.xlu1 %v4906_v61 }
 0x30e   : > { %3458 = vmatmul.msk.f32.gmra.mxu1 %vm279_vm0, %v4917_v51 }
 0x30f   : > { %v4965_v42 = vpop.f32.mrf.mxu3 }
 0x316   : > { %3459 = vmatmul.msk.f32.gmra.mxu1 %vm279_vm0, %v4927_v37 }
 0x317   : > { %v4972_v12 = vpop.f32.mrf.mxu3 }
 0x31e   : > { %3460 = vmatmul.msk.f32.gmra.mxu1 %vm279_vm0, %v4937_v23 }
 0x31f   : > { %v4980_v39 = vpop.f32.mrf.mxu3 }
 0x326   : > { %3461 = vmatmul.msk.f32.gmra.mxu1 %vm279_vm0, %v4947_v3 }
 0x327   : > { %v4986_v2 = vpop.f32.mrf.mxu3 }
 0x32e   : > { %3462 = vmatmul.msk.f32.gmra.mxu1 %vm279_vm0, %v4954_v47 }
 0x336   : > { %3463 = vmatmul.msk.f32.gmra.mxu1 %vm279_vm0, %v4961_v22 }
 0x33e   : > { %3464 = vmatmul.msk.f32.gmra.mxu1 %vm279_vm0, %v4968_v43 }
 0x346   : > { %3465 = vmatmul.msk.f32.gmra.mxu1 %vm279_vm0, %v4976_v53 }
 0x34b   : > { %v882_v38 = vpop.f32.mrf.mxu0  ;;  %v818_v13 = vpop.xlane.xlu2 %817 }
 0x34c   : > { %3943 = vrcp.f32 %v818_v13  ;;  %3576 = vmatmul.msk.f32.vlgmr.msra.gmra.mxu3 %vm559_vm1, %v882_v38 }
 0x34e   : > { %3466 = vmatmul.msk.f32.gmra.mxu1 %vm279_vm0, %v4922_v21 }
 0x352   : > { %v3944_v59 = vpop.eup %3943 }
 0x353   : > { %v885_v44 = vpop.f32.mrf.mxu0  ;;  %v820_v31 = vpop.xlane.xlu1 %819  ;;  %v857_v1 = vmul.f32 %v3944_v59, %v4838_v30 }
 0x354   : > { %3945 = vrcp.f32 %v820_v31  ;;  %3577 = vmatmul.msk.f32.gmra.mxu3 %vm559_vm1, %v885_v44  ;;  %v4992_v30 = vpop.f32.mrf.mxu3 }
 0x355   : > { %905 = vmatmul.f32.gmra.mxu0 %v857_v1  ;;  %v3886_v1 = vld [vmem:[%s6376_s2 + $0x9] ss:$0 sm:$0xff] }
 0x356   : > { %3467 = vmatmul.msk.f32.gmra.mxu1 %vm279_vm0, %v4932_v36 }
 0x35a   : > { %v3946_v56 = vpop.eup %3945 }
 0x35b   : > { %v822_v7 = vpop.xlane.xlu2 %821  ;;  %v888_v35 = vpop.f32.mrf.mxu0  ;;  %v858_v45 = vmul.f32 %v3946_v56, %v4848_v14 }
 0x35c   : > { %3947 = vrcp.f32 %v822_v7  ;;  %3578 = vmatmul.msk.f32.gmra.mxu3 %vm559_vm1, %v888_v35  ;;  %v5001_v14 = vpop.f32.mrf.mxu3 }
 0x35d   : > { %908 = vmatmul.f32.gmra.mxu0 %v858_v45 }
 0x35e   : > { %3468 = vmatmul.msk.f32.gmra.mxu1 %vm279_vm0, %v4997_v27 }
 0x362   : > { %v3948_v63 = vpop.eup %3947 }
 0x363   : > { %v891_v52 = vpop.f32.mrf.mxu0  ;;  %v824_v0 = vpop.xlane.xlu0 %823  ;;  %v859_v49 = vmul.f32 %v3948_v63, %v4855_v15 }
 0x364   : > { %3949 = vrcp.f32 %v824_v0  ;;  %3579 = vmatmul.msk.f32.gmra.mxu3 %vm559_vm1, %v891_v52  ;;  %v1132_v15 = vpop.f32.mrf.mxu3  ;;  %v958_v62 = vpop.f32.mrf.mxu1 }
 0x365   : > { %911 = vmatmul.f32.gmra.mxu0 %v859_v49 }
 0x36a   : > { %v3950_v16 = vpop.eup %3949 }
 0x36b   : > { %v894_v28 = vpop.f32.mrf.mxu0  ;;  %v826_v58 = vpop.xlane.xlu1 %825  ;;  %v860_v50 = vmul.f32 %v3950_v16, %v4870_v40 }
 0x36c   : > { %3951 = vrcp.f32 %v826_v58  ;;  %3580 = vmatmul.msk.f32.gmra.mxu3 %vm559_vm1, %v894_v28  ;;  %v1135_v34 = vpop.f32.mrf.mxu3  ;;  %v961_v20 = vpop.f32.mrf.mxu1 }
 0x36d   : > { %914 = vmatmul.f32.gmra.mxu0 %v860_v50  ;;  %v1136_v50 = vadd.f32 %v3886_v1, %v1135_v34 }
 0x372   : > { %v3952_v33 = vpop.eup %3951 }
 0x373   : > { %v828_v48 = vpop.xlane.xlu2 %827  ;;  %v897_v26 = vpop.f32.mrf.mxu0  ;;  %v861_v8 = vmul.f32 %v3952_v33, %v4880_v29  ;;  %v1133_v33 = vadd.f32 %v3886_v1, %v1132_v15  ;;  %v1118_v15 = vadd.f32 %v3886_v1, %v4972_v12 }
 0x374   : > { %3953 = vrcp.f32 %v828_v48  ;;  %3581 = vmatmul.msk.f32.gmra.mxu3 %vm559_vm1, %v897_v26  ;;  %v830_v6 = vpop.xlane.xlu0 %829  ;;  %v1138_v10 = vpop.f32.mrf.mxu3  ;;  %v1130_v48 = vadd.f32 %v3886_v1, %v5001_v14  ;;  %v1127_v26 = vadd.f32 %v3886_v1, %v4992_v30  ;;  %v1115_v14 = vadd.f32 %v3886_v1, %v4965_v42 }
 0x375   : > { %917 = vmatmul.f32.gmra.mxu0 %v861_v8  ;;  %3955 = vrcp.f32 %v830_v6  ;;  %v964_v13 = vpop.f32.mrf.mxu1  ;;  %v1139_v16 = vadd.f32 %v3886_v1, %v1138_v10  ;;  %v1124_v6 = vadd.f32 %v3886_v1, %v4986_v2  ;;  %v1112_v30 = vadd.f32 %v3886_v1, %v4958_v41 }
 0x376   : > { %v1109_v2 = vadd.f32 %v3886_v1, %v4951_v11 }
 0x37a   : > { %v3954_v17 = vpop.eup %3953 }
 0x37b   : > { %v900_v54 = vpop.f32.mrf.mxu0  ;;  %v862_v40 = vmul.f32 %v3954_v17, %v4892_v25  ;;  %v832_v4 = vpop.xlane.xlu1 %831  ;;  %v5015_v25 = vld [vmem:[%s6376_s2 + $0x1] ss:$0 sm:$0xff] }
 0x37c   : > { %3582 = vmatmul.msk.f32.gmra.mxu3 %vm559_vm1, %v900_v54  ;;  %v3956_v9 = vpop.eup %3955  ;;  %3957 = vrcp.f32 %v832_v4  ;;  %v1141_v24 = vpop.f32.mrf.mxu3  ;;  %v959_v38 = vadd.f32 %v5015_v25, %v958_v62  ;;  %v962_v59 = vadd.f32 %v5015_v25, %v961_v20  ;;  %v1121_v54 = vadd.f32 %v3886_v1, %v4980_v39 }
 0x37d   : > { %920 = vmatmul.f32.gmra.mxu0 %v862_v40  ;;  %v863_v46 = vmul.f32 %v3956_v9, %v4894_v55  ;;  %v967_v44 = vpop.f32.mrf.mxu1  ;;  %v1142_v49 = vadd.f32 %v3886_v1, %v1141_v24 }
 0x37e   : > { %v968_v35 = vadd.f32 %v5015_v25, %v967_v44 }
 0x382   : > { %v3958_v18 = vpop.eup %3957 }
 0x383   : > { %v903_v29 = vpop.f32.mrf.mxu0  ;;  %v864_v57 = vmul.f32 %v3958_v18, %v4906_v61  ;;  %v965_v61 = vadd.f32 %v5015_v25, %v964_v13  ;;  %v3511_v13 = vld [vmem:[%s6377_s3 + $0x80] sm:$0xff] }
 0x384   : > { %3583 = vmatmul.msk.f32.gmra.mxu3 %vm559_vm1, %v903_v29  ;;  %v1144_v5 = vpop.f32.mrf.mxu3 }
 0x385   : > { %923 = vmatmul.f32.gmra.mxu0 %v863_v46  ;;  %v970_v56 = vpop.f32.mrf.mxu1  ;;  %v1145_v0 = vadd.f32 %v3886_v1, %v1144_v5 }
 0x386   : > { %v971_v28 = vadd.f32 %v5015_v25, %v970_v56 }
 0x38c   : > { %v1147_v55 = vpop.f32.mrf.mxu3 }
 0x38d   : > { %926 = vmatmul.f32.gmra.mxu0 %v864_v57  ;;  %v1148_v52 = vadd.f32 %v3886_v1, %v1147_v55  ;;  %v973_v58 = vpop.f32.mrf.mxu1 }
 0x38e   : > { %v974_v8 = vadd.f32 %v5015_v25, %v973_v58 }
 0x394   : > { %v1150_v31 = vpop.f32.mrf.mxu3 }
 0x395   : > { %3543 = vmatmul.msk.f32.vlgmr.msrb.gmra.mxu0 %vm559_vm1, %v959_v38  ;;  %v1151_v45 = vadd.f32 %v3886_v1, %v1150_v31  ;;  %v976_v17 = vpop.f32.mrf.mxu1 }
 0x396   : > { %v977_v34 = vadd.f32 %v5015_v25, %v976_v17 }
 0x39c   : > { %v1153_v7 = vpop.f32.mrf.mxu3 }
 0x39d   : > { %3544 = vmatmul.msk.f32.gmra.mxu0 %vm559_vm1, %v962_v59  ;;  %v1154_v63 = vadd.f32 %v3886_v1, %v1153_v7  ;;  %v979_v39 = vpop.f32.mrf.mxu1 }
 0x39e   : > { %v980_v40 = vadd.f32 %v5015_v25, %v979_v39 }
 0x39f   : > { %1478 = vmatpush.msrb.mxu1 %v1154_v63 }
 0x3a1   : > { %1479 = vmatpush.msrb.mxu1 %v1151_v45  ;;  %v3513_v45 = vld [vmem:[%s6377_s3 + $0x90] sm:$0xff] }
 0x3a3   : > { %1480 = vmatpush.msrb.mxu1 %v1148_v52 }
 0x3a5   : > { %3545 = vmatmul.msk.f32.gmra.mxu0 %vm559_vm1, %v965_v61  ;;  %1481 = vmatpush.msrb.mxu1 %v1145_v0  ;;  %v982_v9 = vpop.f32.mrf.mxu1  ;;  %v3512_v61 = vld [vmem:[%s6377_s3 + $0x88] sm:$0xff] }
 0x3a6   : > { %v983_v62 = vadd.f32 %v5015_v25, %v982_v9 }
 0x3a7   : > { %1482 = vmatpush.msrb.mxu1 %v1142_v49 }
 0x3a9   : > { %1483 = vmatpush.msrb.mxu1 %v1139_v16  ;;  %v3514_v16 = vld [vmem:[%s6377_s3 + $0x98] sm:$0xff] }
 0x3ab   : > { %1484 = vmatpush.msrb.mxu1 %v1136_v50 }
 0x3ad   : > { %3546 = vmatmul.msk.f32.gmra.mxu0 %vm559_vm1, %v968_v35  ;;  %1485 = vmatpush.msrb.mxu1 %v1133_v33  ;;  %v985_v29 = vpop.f32.mrf.mxu1 }
 0x3ae   : > { %v986_v46 = vadd.f32 %v5015_v25, %v985_v29 }
 0x3af   : > { %1486 = vmatpush.msrb.mxu1 %v1130_v48  ;;  %v3515_v48 = vld [vmem:[%s6377_s3 + $0xa0] sm:$0xff] }
 0x3b1   : > { %1487 = vmatpush.msrb.mxu1 %v1127_v26 }
 0x3b3   : > { %1488 = vmatpush.msrb.mxu1 %v1124_v6  ;;  %v3516_v6 = vld [vmem:[%s6377_s3 + $0xa8] sm:$0xff] }
 0x3b5   : > { %3547 = vmatmul.msk.f32.gmra.mxu0 %vm559_vm1, %v971_v28  ;;  %1489 = vmatpush.msrb.mxu1 %v1121_v54  ;;  %v988_v24 = vpop.f32.mrf.mxu1 }
 0x3b6   : > { %v989_v20 = vadd.f32 %v5015_v25, %v988_v24 }
 0x3b7   : > { %1490 = vmatpush.msrb.mxu1 %v1118_v15 }
 0x3b9   : > { %1491 = vmatpush.msrb.mxu1 %v1115_v14 }
 0x3bb   : > { %1492 = vmatpush.msrb.mxu1 %v1112_v30 }
 0x3bd   : > { %3548 = vmatmul.msk.f32.gmra.mxu0 %vm559_vm1, %v974_v8  ;;  %1493 = vmatpush.msrb.mxu1 %v1109_v2  ;;  %v991_v5 = vpop.f32.mrf.mxu1 }
 0x3be   : > { %v992_v38 = vadd.f32 %v5015_v25, %v991_v5  ;;  %v3520_v5 = vld [vmem:[%s6377_s3 + $0xc8] sm:$0xff] }
 0x3c5   : > { %3549 = vmatmul.msk.f32.gmra.mxu0 %vm559_vm1, %v977_v34  ;;  %v994_v44 = vpop.f32.mrf.mxu1  ;;  %v3518_v34 = vld [vmem:[%s6377_s3 + $0xb8] sm:$0xff] }
 0x3c6   : > { %v995_v31 = vadd.f32 %v5015_v25, %v994_v44 }
 0x3cd   : > { %3550 = vmatmul.msk.f32.gmra.mxu0 %vm559_vm1, %v980_v40  ;;  %v997_v7 = vpop.f32.mrf.mxu1 }
 0x3ce   : > { %v998_v35 = vadd.f32 %v5015_v25, %v997_v7 }
 0x3d2   : > { %v906_v12 = vpop.f32.mrf.mxu0 }
 0x3d3   : > { %3584 = vmatmul.msk.f32.gmra.mxu3 %vm559_vm1, %v906_v12 }
 0x3d5   : > { %3551 = vmatmul.msk.f32.gmra.mxu0 %vm559_vm1, %v983_v62  ;;  %v1000_v0 = vpop.f32.mrf.mxu1 }
 0x3d6   : > { %v1001_v49 = vadd.f32 %v5015_v25, %v1000_v0 }
 0x3da   : > { %v909_v42 = vpop.f32.mrf.mxu0 }
 0x3db   : > { %3585 = vmatmul.msk.f32.gmra.mxu3 %vm559_vm1, %v909_v42 }
 0x3dd   : > { %3552 = vmatmul.msk.f32.gmra.mxu0 %vm559_vm1, %v986_v46  ;;  %v1003_v50 = vpop.f32.mrf.mxu1 }
 0x3de   : > { %v1004_v33 = vadd.f32 %v5015_v25, %v1003_v50  ;;  %v3517_v25 = vld [vmem:[%s6377_s3 + $0xb0] sm:$0xff]  ;;  %v3523_v50 = vld [vmem:[%s6377_s3 + $0xe0] sm:$0xff] }
 0x3e2   : > { %v912_v41 = vpop.f32.mrf.mxu0 }
 0x3e3   : > { %3586 = vmatmul.msk.f32.gmra.mxu3 %vm559_vm1, %v912_v41 }
 0x3e5   : > { %3553 = vmatmul.msk.f32.gmra.mxu0 %vm559_vm1, %v989_v20 }
 0x3ea   : > { %v915_v11 = vpop.f32.mrf.mxu0 }
 0x3eb   : > { %3587 = vmatmul.msk.f32.gmra.mxu3 %vm559_vm1, %v915_v11 }
 0x3ed   : > { %3554 = vmatmul.msk.f32.gmra.mxu0 %vm559_vm1, %v992_v38 }
 0x3f2   : > { %v918_v4 = vpop.f32.mrf.mxu0 }
 0x3f3   : > { %3588 = vmatmul.msk.f32.gmra.mxu3 %vm559_vm1, %v918_v4 }
 0x3f5   : > { %3555 = vmatmul.msk.f32.gmra.mxu0 %vm559_vm1, %v995_v31  ;;  %v3521_v31 = vld [vmem:[%s6377_s3 + $0xd0] sm:$0xff] }
 0x3fa   : > { %v921_v10 = vpop.f32.mrf.mxu0 }
 0x3fb   : > { %3589 = vmatmul.msk.f32.gmra.mxu3 %vm559_vm1, %v921_v10  ;;  %v3519_v10 = vld [vmem:[%s6377_s3 + $0xc0] sm:$0xff] }
 0x3fd   : > { %3556 = vmatmul.msk.f32.gmra.mxu0 %vm559_vm1, %v998_v35 }
 0x402   : > { %v924_v18 = vpop.f32.mrf.mxu0 }
 0x403   : > { %3590 = vmatmul.msk.f32.gmra.mxu3 %vm559_vm1, %v924_v18 }
 0x405   : > { %3557 = vmatmul.msk.f32.gmra.mxu0 %vm559_vm1, %v1001_v49 }
 0x40a   : > { %v927_v57 = vpop.f32.mrf.mxu0 }
 0x40b   : > { %3591 = vmatmul.msk.f32.gmra.mxu3 %vm559_vm1, %v927_v57 }
 0x40d   : > { %3558 = vmatmul.msk.f32.gmra.mxu0 %vm559_vm1, %v1004_v33 }
 0x412   : > { %v1286_v55 = vpop.f32.mrf.mxu0 }
 0x413   : > { %v1287_v59 = vadd.f32 %v3511_v13, %v1286_v55 }
 0x415   : > { %1334 = vmax.xlane.f32.xlu2 %v1287_v59 }
 0x41a   : > { %v1289_v1 = vpop.f32.mrf.mxu0 }
 0x41b   : > { %v1290_v56 = vadd.f32 %v3512_v61, %v1289_v1 }
 0x41d   : > { %1336 = vmax.xlane.f32.xlu0 %v1290_v56 }
 0x422   : > { %v1292_v63 = vpop.f32.mrf.mxu0 }
 0x423   : > { %v1293_v52 = vadd.f32 %v3513_v45, %v1292_v63  ;;  %v3522_v63 = vld [vmem:[%s6377_s3 + $0xd8] sm:$0xff] }
 0x425   : > { %1338 = vmax.xlane.f32.xlu1 %v1293_v52 }
 0x42a   : > { %v1295_v28 = vpop.f32.mrf.mxu0 }
 0x42b   : > { %v1296_v58 = vadd.f32 %v3514_v16, %v1295_v28 }
 0x42d   : > { %1340 = vmax.xlane.f32.xlu2 %v1296_v58 }
 0x432   : > { %v1298_v26 = vpop.f32.mrf.mxu0 }
 0x433   : > { %v1299_v8 = vadd.f32 %v3515_v48, %v1298_v26 }
 0x435   : > { %1342 = vmax.xlane.f32.xlu0 %v1299_v8 }
 0x43a   : > { %v1301_v17 = vpop.f32.mrf.mxu0 }
 0x43b   : > { %v1302_v54 = vadd.f32 %v3516_v6, %v1301_v17 }
 0x43d   : > { %1344 = vmax.xlane.f32.xlu1 %v1302_v54 }
 0x442   : > { %v1304_v15 = vpop.f32.mrf.mxu0 }
 0x443   : > { %v5089_v14 = vadd.f32 %v3517_v25, %v1304_v15 }
 0x445   : > { %1346 = vmax.xlane.f32.xlu2 %v5089_v14 }
 0x44a   : > { %v1307_v30 = vpop.f32.mrf.mxu0 }
 0x44b   : > { %v5095_v2 = vadd.f32 %v3518_v34, %v1307_v30 }
 0x44d   : > { %1348 = vmax.xlane.f32.xlu1 %v5095_v2 }
 0x452   : > { %v1310_v39 = vpop.f32.mrf.mxu0 }
 0x453   : > { %v5104_v46 = vadd.f32 %v3519_v10, %v1310_v39 }
 0x45a   : > { %v1313_v4 = vpop.f32.mrf.mxu0 }
 0x45b   : > { %v5113_v13 = vadd.f32 %v3520_v5, %v1313_v4 }
 0x462   : > { %v1316_v57 = vpop.f32.mrf.mxu0 }
 0x46a   : > { %v1319_v61 = vpop.f32.mrf.mxu0 }
 0x46b   : > { %v5131_v49 = vadd.f32 %v3522_v63, %v1319_v61 }
 0x488   : > { %v1335_v40 = vpop.xlane.xlu2 %1334 }
 0x489   : > { %v1366_v12 = vsub.f32 %v1287_v59, %v1335_v40  ;;  %v3525_v40 = vld [vmem:[%s6377_s3 + $0xf0] sm:$0xff] }
 0x48b   : > { %v1382_v42 = vmul.f32 1.442695, %v1366_v12 }
 0x48d   : > { %3959 = vpow2.f32 %v1382_v42 }
 0x490   : > { %v1337_v41 = vpop.xlane.xlu0 %1336 }
 0x491   : > { %v1367_v11 = vsub.f32 %v1290_v56, %v1337_v41  ;;  %v5122_v56 = vadd.f32 %v3521_v31, %v1316_v57  ;;  %v3526_v41 = vld [vmem:[%s6377_s3 + $0xf8] sm:$0xff] }
 0x493   : > { %v5098_v9 = vpop.eup %3959  ;;  %v1384_v62 = vmul.f32 1.442695, %v1367_v11 }
 0x494   : > { %1414 = vadd.xlane.f32.xlu0 %v5098_v9 }
 0x495   : > { %3961 = vpow2.f32 %v1384_v62 }
 0x498   : > { %v1339_v29 = vpop.xlane.xlu1 %1338 }
 0x499   : > { %v1368_v18 = vsub.f32 %v1293_v52, %v1339_v29  ;;  %v1322_v52 = vpop.f32.mrf.mxu0 }
 0x49a   : > { %v5140_v48 = vadd.f32 %v3523_v50, %v1322_v52 }
 0x49b   : > { %v5106_v24 = vpop.eup %3961  ;;  %v1386_v20 = vmul.f32 1.442695, %v1368_v18 }
 0x49c   : > { %1416 = vadd.xlane.f32.xlu2 %v5106_v24  ;;  %1350 = vmax.xlane.f32.xlu0 %v5104_v46 }
 0x49d   : > { %3963 = vpow2.f32 %v1386_v20 }
 0x4a0   : > { %v1341_v38 = vpop.xlane.xlu2 %1340 }
 0x4a1   : > { %v1369_v55 = vsub.f32 %v1296_v58, %v1341_v38 }
 0x4a3   : > { %v5115_v59 = vpop.eup %3963  ;;  %v1388_v44 = vmul.f32 1.442695, %v1369_v55 }
 0x4a4   : > { %1418 = vadd.xlane.f32.xlu1 %v5115_v59  ;;  %1352 = vmax.xlane.f32.xlu2 %v5113_v13 }
 0x4a5   : > { %3965 = vpow2.f32 %v1388_v44 }
 0x4a8   : > { %v1343_v1 = vpop.xlane.xlu0 %1342 }
 0x4a9   : > { %v1370_v7 = vsub.f32 %v1299_v8, %v1343_v1  ;;  %v1325_v8 = vpop.f32.mrf.mxu0 }
 0x4ab   : > { %v5124_v35 = vpop.eup %3965  ;;  %v1390_v45 = vmul.f32 1.442695, %v1370_v7 }
 0x4ac   : > { %1354 = vmax.xlane.f32.xlu1 %v5122_v56  ;;  %1420 = vadd.xlane.f32.xlu0 %v5124_v35 }
 0x4ad   : > { %3967 = vpow2.f32 %v1390_v45 }
 0x4b0   : > { %v1345_v0 = vpop.xlane.xlu1 %1344 }
 0x4b1   : > { %v1371_v16 = vsub.f32 %v1302_v54, %v1345_v0  ;;  %v3524_v54 = vld [vmem:[%s6377_s3 + $0xe8] sm:$0xff]  ;;  %v1328_v39 = vpop.f32.mrf.mxu0 }
 0x4b2   : > { %v5150_v15 = vadd.f32 %v3524_v54, %v1325_v8  ;;  %v5160_v12 = vadd.f32 %v3525_v40, %v1328_v39 }
 0x4b3   : > { %v5133_v28 = vpop.eup %3967  ;;  %v1392_v58 = vmul.f32 1.442695, %v1371_v16 }
 0x4b4   : > { %1422 = vadd.xlane.f32.xlu2 %v5133_v28  ;;  %1356 = vmax.xlane.f32.xlu0 %v5131_v49 }
 0x4b5   : > { %3969 = vpow2.f32 %v1392_v58 }
 0x4b8   : > { %v1347_v33 = vpop.xlane.xlu2 %1346 }
 0x4b9   : > { %v1372_v26 = vsub.f32 %v5089_v14, %v1347_v33 }
 0x4bb   : > { %v5143_v6 = vpop.eup %3969  ;;  %v1394_v17 = vmul.f32 1.442695, %v1372_v26 }
 0x4bc   : > { %1424 = vadd.xlane.f32.xlu1 %v5143_v6  ;;  %1358 = vmax.xlane.f32.xlu2 %v5140_v48 }
 0x4bd   : > { %3971 = vpow2.f32 %v1394_v17 }
 0x4c0   : > { %v1349_v25 = vpop.xlane.xlu1 %1348 }
 0x4c1   : > { %v1373_v34 = vsub.f32 %v5095_v2, %v1349_v25  ;;  %v1331_v2 = vpop.f32.mrf.mxu0 }
 0x4c2   : > { %v5169_v11 = vadd.f32 %v3526_v41, %v1331_v2 }
 0x4c3   : > { %v5153_v30 = vpop.eup %3971  ;;  %v1396_v14 = vmul.f32 1.442695, %v1373_v34 }
 0x4c4   : > { %1360 = vmax.xlane.f32.xlu1 %v5150_v15  ;;  %1426 = vadd.xlane.f32.xlu0 %v5153_v30 }
 0x4c5   : > { %3973 = vpow2.f32 %v1396_v14 }
 0x4cb   : > { %v5162_v42 = vpop.eup %3973 }
 0x4cc   : > { %1428 = vadd.xlane.f32.xlu2 %v5162_v42  ;;  %1362 = vmax.xlane.f32.xlu0 %v5160_v12 }
 0x4d4   : > { %1364 = vmax.xlane.f32.xlu2 %v5169_v11 }
 0x507   : > { %v1415_v4 = vpop.xlane.xlu0 %1414 }
 0x508   : > { %3975 = vrcp.f32 %v1415_v4 }
 0x50e   : > { %v3976_v62 = vpop.eup %3975 }
 0x50f   : > { %v1462_v10 = vmul.f32 %v3976_v62, %v5098_v9  ;;  %v1351_v29 = vpop.xlane.xlu0 %1350  ;;  %v1417_v18 = vpop.xlane.xlu2 %1416 }
 0x510   : > { %v1374_v20 = vsub.f32 %v5104_v46, %v1351_v29  ;;  %3977 = vrcp.f32 %v1417_v18 }
 0x511   : > { %1494 = vmatmul.f32.vlgmr.msrb.gmra.mxu1 %v1462_v10 }
 0x512   : > { %v1398_v57 = vmul.f32 1.442695, %v1374_v20 }
 0x514   : > { %3979 = vpow2.f32 %v1398_v57 }
 0x516   : > { %v3978_v5 = vpop.eup %3977 }
 0x517   : > { %v1419_v38 = vpop.xlane.xlu1 %1418  ;;  %v1353_v55 = vpop.xlane.xlu2 %1352  ;;  %v1463_v44 = vmul.f32 %v3978_v5, %v5106_v24 }
 0x518   : > { %3981 = vrcp.f32 %v1419_v38  ;;  %v1375_v31 = vsub.f32 %v5113_v13, %v1353_v55  ;;  %v3559_v38 = vld [vmem:[%s6378_s4 + $0x8] sm:$0xff] }
 0x519   : > { %1497 = vmatmul.f32.gmra.mxu1 %v1463_v44  ;;  %1608 = vmatpush.msrb.mxu2 %v3559_v38 }
 0x51a   : > { %v5176_v61 = vpop.eup %3979  ;;  %v1400_v9 = vmul.f32 1.442695, %v1375_v31 }
 0x51b   : > { %1430 = vadd.xlane.f32.xlu1 %v5176_v61 }
 0x51c   : > { %3983 = vpow2.f32 %v1400_v9 }
 0x51e   : > { %v3982_v46 = vpop.eup %3981 }
 0x51f   : > { %v1355_v1 = vpop.xlane.xlu1 %1354  ;;  %v1421_v7 = vpop.xlane.xlu0 %1420  ;;  %v1464_v45 = vmul.f32 %v3982_v46, %v5115_v59 }
 0x520   : > { %v1376_v63 = vsub.f32 %v5122_v56, %v1355_v1  ;;  %3985 = vrcp.f32 %v1421_v7  ;;  %v3615_v1 = vld [vmem:[%s6375_s1 + $0xd0] sm:$0xff] }
 0x521   : > { %1500 = vmatmul.f32.gmra.mxu1 %v1464_v45 }
 0x522   : > { %v5181_v24 = vpop.eup %3983  ;;  %v1402_v52 = vmul.f32 1.442695, %v1376_v63 }
 0x523   : > { %1432 = vadd.xlane.f32.xlu0 %v5181_v24 }
 0x524   : > { %3987 = vpow2.f32 %v1402_v52 }
 0x526   : > { %v3986_v13 = vpop.eup %3985 }
 0x527   : > { %v1357_v0 = vpop.xlane.xlu0 %1356  ;;  %v1423_v16 = vpop.xlane.xlu2 %1422  ;;  %v1465_v58 = vmul.f32 %v3986_v13, %v5124_v35 }
 0x528   : > { %v1377_v50 = vsub.f32 %v5131_v49, %v1357_v0  ;;  %3989 = vrcp.f32 %v1423_v16 }
 0x529   : > { %1503 = vmatmul.f32.gmra.mxu1 %v1465_v58 }
 0x52a   : > { %v5186_v59 = vpop.eup %3987  ;;  %v1404_v56 = vmul.f32 1.442695, %v1377_v50 }
 0x52b   : > { %1434 = vadd.xlane.f32.xlu1 %v5186_v59 }
 0x52c   : > { %3991 = vpow2.f32 %v1404_v56 }
 0x52e   : > { %v3990_v33 = vpop.eup %3989 }
 0x52f   : > { %v1425_v26 = vpop.xlane.xlu1 %1424  ;;  %v1359_v8 = vpop.xlane.xlu2 %1358  ;;  %v1466_v17 = vmul.f32 %v3990_v33, %v5133_v28 }
 0x530   : > { %3993 = vrcp.f32 %v1425_v26  ;;  %v1378_v54 = vsub.f32 %v5140_v48, %v1359_v8 }
 0x531   : > { %1506 = vmatmul.f32.gmra.mxu1 %v1466_v17 }
 0x532   : > { %v5191_v35 = vpop.eup %3991  ;;  %v1406_v49 = vmul.f32 1.442695, %v1378_v54 }
 0x533   : > { %1436 = vadd.xlane.f32.xlu2 %v5191_v35 }
 0x534   : > { %3995 = vpow2.f32 %v1406_v49 }
 0x536   : > { %v3994_v25 = vpop.eup %3993 }
 0x537   : > { %v1361_v34 = vpop.xlane.xlu1 %1360  ;;  %v1427_v14 = vpop.xlane.xlu0 %1426  ;;  %v1467_v39 = vmul.f32 %v3994_v25, %v5143_v6 }
 0x538   : > { %v1379_v40 = vsub.f32 %v5150_v15, %v1361_v34  ;;  %3997 = vrcp.f32 %v1427_v14 }
 0x539   : > { %1509 = vmatmul.f32.gmra.mxu1 %v1467_v39 }
 0x53a   : > { %v5196_v28 = vpop.eup %3995  ;;  %v1408_v2 = vmul.f32 1.442695, %v1379_v40 }
 0x53b   : > { %1438 = vadd.xlane.f32.xlu0 %v5196_v28 }
 0x53c   : > { %3999 = vpow2.f32 %v1408_v2 }
 0x53e   : > { %v3998_v48 = vpop.eup %3997 }
 0x53f   : > { %v1363_v41 = vpop.xlane.xlu0 %1362  ;;  %v1429_v4 = vpop.xlane.xlu2 %1428  ;;  %v1468_v62 = vmul.f32 %v3998_v48, %v5153_v30 }
 0x540   : > { %v1380_v10 = vsub.f32 %v5160_v12, %v1363_v41  ;;  %4001 = vrcp.f32 %v1429_v4  ;;  %v5244_v41 = vld [vmem:[%s4269_s13] sm:$0xff]  ;;  %v5249_v4 = vld [vmem:[%s4269_s13 + $0x8] sm:$0xff] }
 0x541   : > { %1512 = vmatmul.f32.gmra.mxu1 %v1468_v62 }
 0x542   : > { %v5201_v6 = vpop.eup %3999  ;;  %v1410_v15 = vmul.f32 1.442695, %v1380_v10 }
 0x543   : > { %1440 = vadd.xlane.f32.xlu1 %v5201_v6 }
 0x544   : > { %4003 = vpow2.f32 %v1410_v15  ;;  %v3595_v15 = vld [vmem:[%s6375_s1 + $0x58] sm:$0xff] }
 0x545   : > { %1793 = vmatpush.msra.mxu0 %v3595_v15 }
 0x546   : > { %v4002_v29 = vpop.eup %4001 }
 0x547   : > { %v1365_v18 = vpop.xlane.xlu2 %1364  ;;  %v1469_v20 = vmul.f32 %v4002_v29, %v5162_v42  ;;  %v3616_v42 = vld [vmem:[%s6375_s1 + $0xd8] sm:$0xff] }
 0x548   : > { %v1381_v57 = vsub.f32 %v5169_v11, %v1365_v18  ;;  %1868 = vmatpush.msra.mxu1 %v3616_v42  ;;  %v3592_v42 = vld [vmem:[%s6375_s1 + $0x40] sm:$0xff] }
 0x549   : > { %1515 = vmatmul.f32.gmra.mxu1 %v1469_v20 }
 0x54a   : > { %v5206_v5 = vpop.eup %4003  ;;  %v1412_v30 = vmul.f32 1.442695, %v1381_v57  ;;  %1869 = vmatpush.msra.mxu1 %v3615_v1 }
 0x54b   : > { %1442 = vadd.xlane.f32.xlu2 %v5206_v5 }
 0x54c   : > { %4005 = vpow2.f32 %v1412_v30 }
 0x552   : > { %v5209_v12 = vpop.eup %4005 }
 0x553   : > { %1444 = vadd.xlane.f32.xlu0 %v5209_v12 }
 0x58e   : > { %v1495_v11 = vpop.f32.mrf.mxu1  ;;  %v1431_v55 = vpop.xlane.xlu1 %1430 }
 0x58f   : > { %4007 = vrcp.f32 %v1431_v55  ;;  %3560 = vmatmul.msk.f32.vlgmr.msrb.gmra.mxu2 %vm559_vm1, %v1495_v11 }
 0x595   : > { %v4008_v44 = vpop.eup %4007 }
 0x596   : > { %v1498_v31 = vpop.f32.mrf.mxu1  ;;  %v1433_v9 = vpop.xlane.xlu0 %1432  ;;  %v1470_v46 = vmul.f32 %v4008_v44, %v5176_v61  ;;  %v5318_v44 = vld [vmem:[%s4269_s13 + $0x10] sm:$0xff] }
 0x597   : > { %4009 = vrcp.f32 %v1433_v9  ;;  %3561 = vmatmul.msk.f32.gmra.mxu2 %vm559_vm1, %v1498_v31 }
 0x598   : > { %1518 = vmatmul.f32.gmra.mxu1 %v1470_v46 }
 0x59d   : > { %v4010_v7 = vpop.eup %4009 }
 0x59e   : > { %v1435_v45 = vpop.xlane.xlu1 %1434  ;;  %v1501_v63 = vpop.f32.mrf.mxu1  ;;  %v1471_v52 = vmul.f32 %v4010_v7, %v5181_v24  ;;  %v3614_v24 = vld [vmem:[%s6375_s1 + $0xc8] sm:$0xff] }
 0x59f   : > { %4011 = vrcp.f32 %v1435_v45  ;;  %3562 = vmatmul.msk.f32.gmra.mxu2 %vm559_vm1, %v1501_v63  ;;  %1870 = vmatpush.msra.mxu1 %v3614_v24 }
 0x5a0   : > { %1521 = vmatmul.f32.gmra.mxu1 %v1471_v52  ;;  %v5358_v52 = vld [vmem:[%s4269_s13 + $0x68] sm:$0xff] }
 0x5a5   : > { %v4012_v13 = vpop.eup %4011 }
 0x5a6   : > { %v1504_v61 = vpop.f32.mrf.mxu1  ;;  %v1437_v0 = vpop.xlane.xlu2 %1436  ;;  %v1472_v16 = vmul.f32 %v4012_v13, %v5186_v59  ;;  %v3613_v59 = vld [vmem:[%s6375_s1 + $0xc0] sm:$0xff] }
 0x5a7   : > { %4013 = vrcp.f32 %v1437_v0  ;;  %3563 = vmatmul.msk.f32.gmra.mxu2 %vm559_vm1, %v1504_v61  ;;  %1871 = vmatpush.msra.mxu1 %v3613_v59  ;;  %v3636_v61 = vld [vmem:[%s6375_s1 + $0x150] sm:$0xff] }
 0x5a8   : > { %1524 = vmatmul.f32.gmra.mxu1 %v1472_v16 }
 0x5ad   : > { %v4014_v58 = vpop.eup %4013 }
 0x5ae   : > { %v1507_v50 = vpop.f32.mrf.mxu1  ;;  %v1439_v56 = vpop.xlane.xlu0 %1438  ;;  %v1473_v33 = vmul.f32 %v4014_v58, %v5191_v35  ;;  %v3635_v58 = vld [vmem:[%s6375_s1 + $0x148] sm:$0xff] }
 0x5af   : > { %4015 = vrcp.f32 %v1439_v56  ;;  %3564 = vmatmul.msk.f32.gmra.mxu2 %vm559_vm1, %v1507_v50  ;;  %v3634_v50 = vld [vmem:[%s6375_s1 + $0x140] sm:$0xff]  ;;  %v5381_v56 = vld [vmem:[%s4269_s13 + $0x70] sm:$0xff] }
 0x5b0   : > { %1527 = vmatmul.f32.gmra.mxu1 %v1473_v33 }
 0x5b5   : > { %v4016_v26 = vpop.eup %4015 }
 0x5b6   : > { %v1441_v8 = vpop.xlane.xlu1 %1440  ;;  %v1510_v17 = vpop.f32.mrf.mxu1  ;;  %v1474_v54 = vmul.f32 %v4016_v26, %v5196_v28 }
 0x5b7   : > { %4017 = vrcp.f32 %v1441_v8  ;;  %3565 = vmatmul.msk.f32.gmra.mxu2 %vm559_vm1, %v1510_v17 }
 0x5b8   : > { %1530 = vmatmul.f32.gmra.mxu1 %v1474_v54 }
 0x5bd   : > { %v4018_v35 = vpop.eup %4017 }
 0x5be   : > { %v1513_v49 = vpop.f32.mrf.mxu1  ;;  %v1443_v25 = vpop.xlane.xlu2 %1442  ;;  %v1475_v34 = vmul.f32 %v4018_v35, %v5201_v6 }
 0x5bf   : > { %4019 = vrcp.f32 %v1443_v25  ;;  %3566 = vmatmul.msk.f32.gmra.mxu2 %vm559_vm1, %v1513_v49 }
 0x5c0   : > { %1533 = vmatmul.f32.gmra.mxu1 %v1475_v34  ;;  %v5416_v34 = vld [vmem:[%s4269_s13 + $0x18] sm:$0xff] }
 0x5c5   : > { %v4020_v14 = vpop.eup %4019 }
 0x5c6   : > { %v1516_v39 = vpop.f32.mrf.mxu1  ;;  %v1445_v40 = vpop.xlane.xlu0 %1444  ;;  %v1476_v28 = vmul.f32 %v4020_v14, %v5206_v5  ;;  %v3594_v5 = vld [vmem:[%s6375_s1 + $0x50] sm:$0xff] }
 0x5c7   : > { %4021 = vrcp.f32 %v1445_v40  ;;  %3567 = vmatmul.msk.f32.gmra.mxu2 %vm559_vm1, %v1516_v39  ;;  %1794 = vmatpush.msra.mxu0 %v3594_v5 }
 0x5c8   : > { %1536 = vmatmul.f32.gmra.mxu1 %v1476_v28 }
 0x5cd   : > { %v4022_v2 = vpop.eup %4021 }
 0x5ce   : > { %v1477_v48 = vmul.f32 %v4022_v2, %v5209_v12 }
 0x5d0   : > { %1539 = vmatmul.f32.gmra.mxu1 %v1477_v48  ;;  %v5431_v48 = vld [vmem:[%s4269_s13 + $0x20] sm:$0xff] }
 0x5d8   : > { %3618 = vmatmul.msk.f32.vlgmr.msra.gmra.mxu1 %vm279_vm0, %v5244_v41 }
 0x5e0   : > { %3619 = vmatmul.msk.f32.gmra.mxu1 %vm279_vm0, %v5249_v4 }
 0x5e8   : > { %3620 = vmatmul.msk.f32.gmra.mxu1 %vm279_vm0, %v4885_v32 }
 0x5f0   : > { %3621 = vmatmul.msk.f32.gmra.mxu1 %vm279_vm0, %v4900_v19 }
 0x5f8   : > { %3622 = vmatmul.msk.f32.gmra.mxu1 %vm279_vm0, %v4910_v60 }
 0x600   : > { %3623 = vmatmul.msk.f32.gmra.mxu1 %vm279_vm0, %v4917_v51 }
 0x608   : > { %3624 = vmatmul.msk.f32.gmra.mxu1 %vm279_vm0, %v4927_v37 }
 0x610   : > { %3625 = vmatmul.msk.f32.gmra.mxu1 %vm279_vm0, %v4937_v23 }
 0x615   : > { %v1519_v62 = vpop.f32.mrf.mxu1 }
 0x616   : > { %3568 = vmatmul.msk.f32.gmra.mxu2 %vm559_vm1, %v1519_v62 }
 0x618   : > { %3626 = vmatmul.msk.f32.gmra.mxu1 %vm279_vm0, %v4947_v3 }
 0x61d   : > { %v1522_v32 = vpop.f32.mrf.mxu1 }
 0x61e   : > { %3569 = vmatmul.msk.f32.gmra.mxu2 %vm559_vm1, %v1522_v32 }
 0x620   : > { %3627 = vmatmul.msk.f32.gmra.mxu1 %vm279_vm0, %v4954_v47 }
 0x625   : > { %v1525_v10 = vpop.f32.mrf.mxu1 }
 0x626   : > { %3570 = vmatmul.msk.f32.gmra.mxu2 %vm559_vm1, %v1525_v10  ;;  %v5442_v10 = vld [vmem:[%s6376_s2 + $0x2] ss:$0 sm:$0xff] }
 0x628   : > { %3628 = vmatmul.msk.f32.gmra.mxu1 %vm279_vm0, %v4961_v22 }
 0x62d   : > { %v1528_v6 = vpop.f32.mrf.mxu1 }
 0x62e   : > { %3571 = vmatmul.msk.f32.gmra.mxu2 %vm559_vm1, %v1528_v6 }
 0x630   : > { %3629 = vmatmul.msk.f32.gmra.mxu1 %vm279_vm0, %v4968_v43 }
 0x635   : > { %v1531_v29 = vpop.f32.mrf.mxu1 }
 0x636   : > { %3572 = vmatmul.msk.f32.gmra.mxu2 %vm559_vm1, %v1531_v29 }
 0x638   : > { %3630 = vmatmul.msk.f32.gmra.mxu1 %vm279_vm0, %v4976_v53 }
 0x63d   : > { %v1534_v18 = vpop.f32.mrf.mxu1 }
 0x63e   : > { %3573 = vmatmul.msk.f32.gmra.mxu2 %vm559_vm1, %v1534_v18  ;;  %v5452_v18 = vld [vmem:[%s4269_s13 + $0x28] sm:$0xff] }
 0x640   : > { %3631 = vmatmul.msk.f32.gmra.mxu1 %vm279_vm0, %v4922_v21 }
 0x645   : > { %v1537_v20 = vpop.f32.mrf.mxu1 }
 0x646   : > { %3574 = vmatmul.msk.f32.gmra.mxu2 %vm559_vm1, %v1537_v20 }
 0x648   : > { %3632 = vmatmul.msk.f32.gmra.mxu1 %vm279_vm0, %v4932_v36  ;;  %v3593_v36 = vld [vmem:[%s6375_s1 + $0x48] sm:$0xff] }
 0x649   : > { %1795 = vmatpush.msra.mxu0 %v3593_v36 }
 0x64b   : > { %1796 = vmatpush.msra.mxu0 %v3592_v42  ;;  %v5472_v42 = vld [vmem:[%s4269_s13 + $0x38] sm:$0xff] }
 0x64c   : > { %3597 = vmatmul.msk.f32.vlgmr.msra.gmra.mxu0 %vm279_vm0, %v5244_v41 }
 0x64d   : > { %v1540_v57 = vpop.f32.mrf.mxu1 }
 0x64e   : > { %3575 = vmatmul.msk.f32.gmra.mxu2 %vm559_vm1, %v1540_v57 }
 0x650   : > { %3633 = vmatmul.msk.f32.gmra.mxu1 %vm279_vm0, %v4997_v27 }
 0x654   : > { %3598 = vmatmul.msk.f32.gmra.mxu0 %vm279_vm0, %v5249_v4 }
 0x655   : > { %v5295_v30 = vpop.f32.mrf.mxu1 }
 0x65c   : > { %3599 = vmatmul.msk.f32.gmra.mxu0 %vm279_vm0, %v5318_v44 }
 0x65d   : > { %v5297_v21 = vpop.f32.mrf.mxu1 }
 0x664   : > { %3600 = vmatmul.msk.f32.gmra.mxu0 %vm279_vm0, %v4900_v19 }
 0x665   : > { %v5299_v12 = vpop.f32.mrf.mxu1 }
 0x66c   : > { %3601 = vmatmul.msk.f32.gmra.mxu0 %vm279_vm0, %v4910_v60 }
 0x66d   : > { %v5304_v38 = vpop.f32.mrf.mxu1 }
 0x674   : > { %3602 = vmatmul.msk.f32.gmra.mxu0 %vm279_vm0, %v4917_v51 }
 0x675   : > { %v5311_v11 = vpop.f32.mrf.mxu1 }
 0x67c   : > { %3603 = vmatmul.msk.f32.gmra.mxu0 %vm279_vm0, %v4927_v37  ;;  %v5340_v37 = vpop.f32.mrf.mxu2 }
 0x67d   : > { %v5315_v55 = vpop.f32.mrf.mxu1 }
 0x684   : > { %3604 = vmatmul.msk.f32.gmra.mxu0 %vm279_vm0, %v4937_v23  ;;  %v5345_v23 = vld [vmem:[%s6376_s2 + $0x6] ss:$0 sm:$0xff] }
 0x685   : > { %v1891_v31 = vpop.f32.mrf.mxu1  ;;  %v1889_v35 = vadd.f32 %v5345_v23, %v5315_v55  ;;  %v1886_v49 = vadd.f32 %v5345_v23, %v5311_v11  ;;  %v1883_v39 = vadd.f32 %v5345_v23, %v5304_v38  ;;  %v1880_v28 = vadd.f32 %v5345_v23, %v5299_v12 }
 0x686   : > { %v1892_v17 = vadd.f32 %v5345_v23, %v1891_v31  ;;  %v1877_v62 = vadd.f32 %v5345_v23, %v5297_v21  ;;  %v1874_v15 = vadd.f32 %v5345_v23, %v5295_v30  ;;  %v5463_v30 = vld [vmem:[%s4269_s13 + $0x30] sm:$0xff] }
 0x68c   : > { %3605 = vmatmul.msk.f32.gmra.mxu0 %vm279_vm0, %v4947_v3 }
 0x68d   : > { %v1894_v9 = vpop.f32.mrf.mxu1 }
 0x68e   : > { %v1895_v8 = vadd.f32 %v5345_v23, %v1894_v9 }
 0x694   : > { %3606 = vmatmul.msk.f32.gmra.mxu0 %vm279_vm0, %v4954_v47 }
 0x695   : > { %v1897_v46 = vpop.f32.mrf.mxu1 }
 0x696   : > { %v1898_v26 = vadd.f32 %v5345_v23, %v1897_v46  ;;  %v5483_v46 = vld [vmem:[%s4269_s13 + $0x40] sm:$0xff] }
 0x69c   : > { %3607 = vmatmul.msk.f32.gmra.mxu0 %vm279_vm0, %v4961_v22  ;;  %v5353_v22 = vpop.f32.mrf.mxu2 }
 0x69d   : > { %v1900_v1 = vpop.f32.mrf.mxu1 }
 0x69e   : > { %v1901_v24 = vadd.f32 %v5345_v23, %v1900_v1 }
 0x6a4   : > { %3608 = vmatmul.msk.f32.gmra.mxu0 %vm279_vm0, %v4968_v43  ;;  %v5371_v16 = vpop.f32.mrf.mxu2 }
 0x6a5   : > { %v1903_v7 = vpop.f32.mrf.mxu1 }
 0x6a6   : > { %v1904_v33 = vadd.f32 %v5345_v23, %v1903_v7 }
 0x6ac   : > { %3609 = vmatmul.msk.f32.gmra.mxu0 %vm279_vm0, %v4976_v53  ;;  %v3637_v53 = vld [vmem:[%s6375_s1 + $0x158] sm:$0xff]  ;;  %v5393_v59 = vpop.f32.mrf.mxu2 }
 0x6ad   : > { %v1906_v45 = vpop.f32.mrf.mxu1  ;;  %1943 = vmatpush.msra.mxu2 %v3637_v53  ;;  %v5514_v53 = vld [vmem:[%s4269_s13 + $0x58] sm:$0xff] }
 0x6ae   : > { %v1907_v0 = vadd.f32 %v5345_v23, %v1906_v45 }
 0x6af   : > { %1944 = vmatpush.msra.mxu2 %v3636_v61 }
 0x6b1   : > { %1945 = vmatpush.msra.mxu2 %v3635_v58 }
 0x6b3   : > { %1946 = vmatpush.msra.mxu2 %v3634_v50 }
 0x6b4   : > { %3610 = vmatmul.msk.f32.gmra.mxu0 %vm279_vm0, %v5358_v52  ;;  %3639 = vmatmul.msk.f32.vlgmr.msra.gmra.mxu2 %vm279_vm0, %v5244_v41  ;;  %v5402_v54 = vpop.f32.mrf.mxu2 }
 0x6b5   : > { %v1909_v19 = vpop.f32.mrf.mxu1 }
 0x6b6   : > { %v1910_v13 = vadd.f32 %v5345_v23, %v1909_v19  ;;  %v5492_v19 = vld [vmem:[%s4269_s13 + $0x48] sm:$0xff] }
 0x6bc   : > { %3611 = vmatmul.msk.f32.gmra.mxu0 %vm279_vm0, %v5381_v56  ;;  %3640 = vmatmul.msk.f32.gmra.mxu2 %vm279_vm0, %v5249_v4  ;;  %v5420_v14 = vpop.f32.mrf.mxu2 }
 0x6bd   : > { %v1912_v60 = vpop.f32.mrf.mxu1 }
 0x6be   : > { %v1913_v43 = vadd.f32 %v5345_v23, %v1912_v60 }
 0x6c4   : > { %3612 = vmatmul.msk.f32.gmra.mxu0 %vm279_vm0, %v4997_v27  ;;  %3641 = vmatmul.msk.f32.gmra.mxu2 %vm279_vm0, %v5318_v44  ;;  %v5407_v27 = vpop.f32.mrf.mxu3  ;;  %v5437_v32 = vpop.f32.mrf.mxu2 }
 0x6c5   : > { %v1915_v51 = vpop.f32.mrf.mxu1 }
 0x6c6   : > { %v1916_v47 = vadd.f32 %v5345_v23, %v1915_v51 }
 0x6c9   : > { %v1798_v25 = vpop.f32.mrf.mxu0 }
 0x6ca   : > { %v1799_v29 = vadd.f32 %v5442_v10, %v1798_v25 }
 0x6cc   : > { %3642 = vmatmul.msk.f32.gmra.mxu2 %vm279_vm0, %v5416_v34  ;;  %v5424_v40 = vpop.f32.mrf.mxu3  ;;  %v5457_v57 = vpop.f32.mrf.mxu2 }
 0x6cd   : > { %v1918_v3 = vpop.f32.mrf.mxu1 }
 0x6ce   : > { %v1919_v63 = vadd.f32 %v5345_v23, %v1918_v3  ;;  %v5503_v3 = vld [vmem:[%s4269_s13 + $0x50] sm:$0xff] }
 0x6d0   : > { %3671 = vmatpush.xpose.msk.msrb.mxu3 %vm559_vm1, %v1919_v63 }
 0x6d1   : > { %v1801_v2 = vpop.f32.mrf.mxu0 }
 0x6d2   : > { %v1802_v5 = vadd.f32 %v5442_v10, %v1801_v2 }
 0x6d4   : > { %3672 = vmatpush.xpose.msk.msrb.mxu3 %vm559_vm1, %v1916_v47  ;;  %3643 = vmatmul.msk.f32.gmra.mxu2 %vm279_vm0, %v5431_v48  ;;  %v5445_v6 = vpop.f32.mrf.mxu3  ;;  %v5468_v36 = vpop.f32.mrf.mxu2 }
 0x6d5   : > { %6381 = vst [vmem:[#allocation2_spill] sm:$0xff] %v5468_v36 }
 0x6d8   : > { %3673 = vmatpush.xpose.msk.msrb.mxu3 %vm559_vm1, %v1913_v43 }
 0x6d9   : > { %v1804_v20 = vpop.f32.mrf.mxu0 }
 0x6da   : > { %v1805_v38 = vadd.f32 %v5442_v10, %v1804_v20 }
 0x6dc   : > { %3674 = vmatpush.xpose.msk.msrb.mxu3 %vm559_vm1, %v1910_v13  ;;  %3644 = vmatmul.msk.f32.gmra.mxu2 %vm279_vm0, %v5452_v18  ;;  %v5460_v21 = vpop.f32.mrf.mxu3  ;;  %v5479_v31 = vpop.f32.mrf.mxu2 }
 0x6dd   : > { %6382 = vst [vmem:[#allocation3_spill] sm:$0xff] %v5479_v31 }
 0x6e0   : > { %3675 = vmatpush.xpose.msk.msrb.mxu3 %vm559_vm1, %v1907_v0 }
 0x6e1   : > { %v1807_v12 = vpop.f32.mrf.mxu0 }
 0x6e2   : > { %v1808_v9 = vadd.f32 %v5442_v10, %v1807_v12 }
 0x6e4   : > { %3676 = vmatpush.xpose.msk.msrb.mxu3 %vm559_vm1, %v1904_v33  ;;  %3645 = vmatmul.msk.f32.gmra.mxu2 %vm279_vm0, %v5463_v30  ;;  %v5476_v11 = vpop.f32.mrf.mxu3  ;;  %v5496_v60 = vpop.f32.mrf.mxu2  ;;  %v5525_v33 = vld [vmem:[%s4269_s13 + $0x60] sm:$0xff] }
 0x6e5   : > { %6383 = vst [vmem:[#allocation4_spill] sm:$0xff] %v5496_v60 }
 0x6e8   : > { %3677 = vmatpush.xpose.msk.msrb.mxu3 %vm559_vm1, %v1901_v24 }
 0x6e9   : > { %v1810_v55 = vpop.f32.mrf.mxu0 }
 0x6ea   : > { %v1811_v7 = vadd.f32 %v5442_v10, %v1810_v55 }
 0x6ec   : > { %3678 = vmatpush.xpose.msk.msrb.mxu3 %vm559_vm1, %v1898_v26  ;;  %3646 = vmatmul.msk.f32.gmra.mxu2 %vm279_vm0, %v5472_v42  ;;  %v5488_v1 = vpop.f32.mrf.mxu3  ;;  %v5507_v47 = vpop.f32.mrf.mxu2 }
 0x6ed   : > { %6384 = vst [vmem:[#allocation5_spill] sm:$0xff] %v5507_v47 }
 0x6f0   : > { %3679 = vmatpush.xpose.msk.msrb.mxu3 %vm559_vm1, %v1895_v8 }
 0x6f1   : > { %v1813_v45 = vpop.f32.mrf.mxu0 }
 0x6f2   : > { %v1814_v23 = vadd.f32 %v5442_v10, %v1813_v45 }
 0x6f4   : > { %3680 = vmatpush.xpose.msk.msrb.mxu3 %vm559_vm1, %v1892_v17  ;;  %3647 = vmatmul.msk.f32.gmra.mxu2 %vm279_vm0, %v5483_v46  ;;  %v5499_v51 = vpop.f32.mrf.mxu3  ;;  %v5519_v0 = vpop.f32.mrf.mxu2 }
 0x6f5   : > { %6386 = vst [vmem:[#allocation7_spill] sm:$0xff] %v5519_v0 }
 0x6f8   : > { %3681 = vmatpush.xpose.msk.msrb.mxu3 %vm559_vm1, %v1889_v35  ;;  %v5543_v35 = vld [vmem:[%s4269_s13 + $0x78] sm:$0xff] }
 0x6f9   : > { %v1816_v63 = vpop.f32.mrf.mxu0 }
 0x6fa   : > { %v1817_v43 = vadd.f32 %v5442_v10, %v1816_v63 }
 0x6fc   : > { %3682 = vmatpush.xpose.msk.msrb.mxu3 %vm559_vm1, %v1886_v49  ;;  %3648 = vmatmul.msk.f32.gmra.mxu2 %vm279_vm0, %v5492_v19  ;;  %v5511_v13 = vpop.f32.mrf.mxu3  ;;  %v5530_v24 = vpop.f32.mrf.mxu2 }
 0x6fd   : > { %6385 = vst [vmem:[#allocation6_spill] sm:$0xff] %v5511_v13 }
 0x6fe   : > { %6388 = vst [vmem:[#allocation9_spill] sm:$0xff] %v5530_v24 }
 0x700   : > { %3683 = vmatpush.xpose.msk.msrb.mxu3 %vm559_vm1, %v1883_v39 }
 0x701   : > { %v1819_v61 = vpop.f32.mrf.mxu0 }
 0x702   : > { %v1820_v58 = vadd.f32 %v5442_v10, %v1819_v61 }
 0x704   : > { %3684 = vmatpush.xpose.msk.msrb.mxu3 %vm559_vm1, %v1880_v28  ;;  %3649 = vmatmul.msk.f32.gmra.mxu2 %vm279_vm0, %v5503_v3  ;;  %v5522_v50 = vpop.f32.mrf.mxu3  ;;  %v5538_v8 = vpop.f32.mrf.mxu2 }
 0x705   : > { %6387 = vst [vmem:[#allocation8_spill] sm:$0xff] %v5522_v50 }
 0x706   : > { %6390 = vst [vmem:[#allocation11_spill] sm:$0xff] %v5538_v8 }
 0x708   : > { %3685 = vmatpush.xpose.msk.msrb.mxu3 %vm559_vm1, %v1877_v62 }
 0x709   : > { %v1822_v62 = vpop.f32.mrf.mxu0 }
 0x70c   : > { %3686 = vmatpush.xpose.msk.msrb.mxu3 %vm559_vm1, %v1874_v15  ;;  %3650 = vmatmul.msk.f32.gmra.mxu2 %vm279_vm0, %v5514_v53  ;;  %v5534_v26 = vpop.f32.mrf.mxu3  ;;  %v5547_v49 = vpop.f32.mrf.mxu2  ;;  %v1823_v15 = vadd.f32 %v5442_v10, %v1822_v62 }
 0x70d   : > { %6389 = vst [vmem:[#allocation10_spill] sm:$0xff] %v5534_v26 }
 0x70e   : > { %6392 = vst [vmem:[#allocation13_spill] sm:$0xff] %v5547_v49 }
 0x70f   : > { %3687 = vmatmul.msk.f32.vlgmr.msrb.gmra.mxu3 %vm559_vm1, %v1799_v29 }
 0x714   : > { %3651 = vmatmul.msk.f32.gmra.mxu2 %vm279_vm0, %v5525_v33  ;;  %v5540_v17 = vpop.f32.mrf.mxu3 }
 0x715   : > { %6391 = vst [vmem:[#allocation12_spill] sm:$0xff] %v5540_v17 }
 0x717   : > { %3688 = vmatmul.msk.f32.gmra.mxu3 %vm559_vm1, %v1802_v5  ;;  %v1825_v5 = vpop.f32.mrf.mxu0 }
 0x718   : > { %v1826_v12 = vadd.f32 %v5442_v10, %v1825_v5 }
 0x71c   : > { %3652 = vmatmul.msk.f32.gmra.mxu2 %vm279_vm0, %v5358_v52  ;;  %v5549_v25 = vpop.f32.mrf.mxu3 }
 0x71d   : > { %6393 = vst [vmem:[#allocation14_spill] sm:$0xff] %v5549_v25 }
 0x71f   : > { %3689 = vmatmul.msk.f32.gmra.mxu3 %vm559_vm1, %v1805_v38 }
 0x724   : > { %3653 = vmatmul.msk.f32.gmra.mxu2 %vm279_vm0, %v5381_v56  ;;  %v5553_v28 = vpop.f32.mrf.mxu3 }
 0x725   : > { %6394 = vst [vmem:[#allocation15_spill] sm:$0xff] %v5553_v28 }
 0x727   : > { %3690 = vmatmul.msk.f32.gmra.mxu3 %vm559_vm1, %v1808_v9  ;;  %v1828_v9 = vpop.f32.mrf.mxu0 }
 0x72c   : > { %3654 = vmatmul.msk.f32.gmra.mxu2 %vm279_vm0, %v5543_v35  ;;  %v5559_v29 = vpop.f32.mrf.mxu3 }
 0x72d   : > { %6395 = vst [vmem:[#allocation16_spill] sm:$0xff] %v5559_v29 }
 0x72f   : > { %3691 = vmatmul.msk.f32.gmra.mxu3 %vm559_vm1, %v1811_v7  ;;  %v1829_v7 = vadd.f32 %v5442_v10, %v1828_v9  ;;  %v1831_v63 = vpop.f32.mrf.mxu0 }
 0x734   : > { %v5567_v55 = vpop.f32.mrf.mxu3 }
 0x735   : > { %6396 = vst [vmem:[#allocation17_spill] sm:$0xff] %v5567_v55 }
 0x737   : > { %3692 = vmatmul.msk.f32.gmra.mxu3 %vm559_vm1, %v1814_v23  ;;  %v5551_v39 = vpop.f32.mrf.mxu2 }
 0x73c   : > { %v5573_v23 = vpop.f32.mrf.mxu3 }
 0x73d   : > { %6397 = vst [vmem:[#allocation18_spill] sm:$0xff] %v5573_v23 }
 0x73f   : > { %3693 = vmatmul.msk.f32.gmra.mxu3 %vm559_vm1, %v1817_v43  ;;  %v5555_v2 = vpop.f32.mrf.mxu2  ;;  %v1832_v43 = vadd.f32 %v5442_v10, %v1831_v63 }
 0x747   : > { %3694 = vmatmul.msk.f32.gmra.mxu3 %vm559_vm1, %v1820_v58  ;;  %v5561_v20 = vpop.f32.mrf.mxu2  ;;  %v3655_v58 = vld [vmem:[%s6377_s3 + $0x100] sm:$0xff] }
 0x74f   : > { %3695 = vmatmul.msk.f32.gmra.mxu3 %vm559_vm1, %v1823_v15  ;;  %v5565_v38 = vpop.f32.mrf.mxu2  ;;  %v1834_v15 = vpop.f32.mrf.mxu0 }
 0x757   : > { %3696 = vmatmul.msk.f32.gmra.mxu3 %vm559_vm1, %v1826_v12  ;;  %v5571_v45 = vpop.f32.mrf.mxu2  ;;  %v1835_v12 = vadd.f32 %v5442_v10, %v1834_v15 }
 0x75f   : > { %3697 = vmatmul.msk.f32.gmra.mxu3 %vm559_vm1, %v1829_v7  ;;  %v5577_v61 = vpop.f32.mrf.mxu2  ;;  %v3656_v7 = vld [vmem:[%s6377_s3 + $0x108] sm:$0xff] }
 0x767   : > { %3698 = vmatmul.msk.f32.gmra.mxu3 %vm559_vm1, %v1832_v43  ;;  %v5587_v9 = vpop.f32.mrf.mxu2  ;;  %v1837_v43 = vpop.f32.mrf.mxu0 }
 0x768   : > { %v1838_v49 = vadd.f32 %v5442_v10, %v1837_v43 }
 0x76f   : > { %3699 = vmatmul.msk.f32.gmra.mxu3 %vm559_vm1, %v1835_v12  ;;  %v1840_v12 = vpop.f32.mrf.mxu0 }
 0x770   : > { %v1841_v8 = vadd.f32 %v5442_v10, %v1840_v12  ;;  %v3742_v12 = vld [vmem:[%s6375_s1 + $0xe8] sm:$0xff] }
 0x777   : > { %3700 = vmatmul.msk.f32.gmra.mxu3 %vm559_vm1, %v1838_v49  ;;  %v3658_v49 = vld [vmem:[%s6377_s3 + $0x118] sm:$0xff]  ;;  %v1843_v43 = vpop.f32.mrf.mxu0 }
 0x778   : > { %v1844_v24 = vadd.f32 %v5442_v10, %v1843_v43  ;;  %v3659_v10 = vld [vmem:[%s6377_s3 + $0x120] sm:$0xff] }
 0x77f   : > { %3701 = vmatmul.msk.f32.gmra.mxu3 %vm559_vm1, %v1841_v8  ;;  %v3743_v8 = vld [vmem:[%s6375_s1 + $0xf0] sm:$0xff] }
 0x787   : > { %3702 = vmatmul.msk.f32.gmra.mxu3 %vm559_vm1, %v1844_v24  ;;  %v3741_v24 = vld [vmem:[%s6375_s1 + $0xe0] sm:$0xff] }
 0x792   : > { %v2126_v62 = vpop.f32.mrf.mxu3 }
 0x793   : > { %v5582_v5 = vadd.f32 %v3655_v58, %v2126_v62  ;;  %v5597_v58 = vpop.f32.mrf.mxu2  ;;  %v3657_v62 = vld [vmem:[%s6377_s3 + $0x110] sm:$0xff] }
 0x795   : > { %2174 = vmax.xlane.f32.xlu1 %v5582_v5 }
 0x79a   : > { %v2129_v63 = vpop.f32.mrf.mxu3 }
 0x79b   : > { %v5592_v23 = vadd.f32 %v3656_v7, %v2129_v63  ;;  %v1972_v7 = vpop.f32.mrf.mxu2 }
 0x79d   : > { %2176 = vmax.xlane.f32.xlu2 %v5592_v23 }
 0x7a2   : > { %v2132_v15 = vpop.f32.mrf.mxu3 }
 0x7a3   : > { %v5602_v55 = vadd.f32 %v3657_v62, %v2132_v15  ;;  %v3744_v62 = vld [vmem:[%s6375_s1 + $0xf8] sm:$0xff]  ;;  %v1975_v15 = vpop.f32.mrf.mxu2 }
 0x7a4   : > { %2611 = vmatpush.msra.mxu3 %v3744_v62  ;;  %v3660_v62 = vld [vmem:[%s6377_s3 + $0x128] sm:$0xff] }
 0x7a5   : > { %2178 = vmax.xlane.f32.xlu0 %v5602_v55 }
 0x7a6   : > { %2612 = vmatpush.msra.mxu3 %v3743_v8 }
 0x7a8   : > { %2613 = vmatpush.msra.mxu3 %v3742_v12 }
 0x7aa   : > { %v2135_v63 = vpop.f32.mrf.mxu3  ;;  %2614 = vmatpush.msra.mxu3 %v3741_v24 }
 0x7ab   : > { %v5610_v29 = vadd.f32 %v3658_v49, %v2135_v63  ;;  %3746 = vmatmul.msk.f32.vlgmr.msra.gmra.mxu3 %vm279_vm0, %v5244_v41  ;;  %v1978_v43 = vpop.f32.mrf.mxu2 }
 0x7ad   : > { %2180 = vmax.xlane.f32.xlu1 %v5610_v29 }
 0x7b2   : > { %v2138_v49 = vpop.f32.mrf.mxu3 }
 0x7b3   : > { %v5630_v63 = vadd.f32 %v3659_v10, %v2138_v49  ;;  %3747 = vmatmul.msk.f32.gmra.mxu3 %vm279_vm0, %v5249_v4  ;;  %v1981_v12 = vpop.f32.mrf.mxu2  ;;  %v3661_v10 = vld [vmem:[%s6377_s3 + $0x130] sm:$0xff] }
 0x7b5   : > { %2182 = vmax.xlane.f32.xlu2 %v5630_v63 }
 0x7ba   : > { %v2141_v8 = vpop.f32.mrf.mxu3 }
 0x7bb   : > { %v5638_v28 = vadd.f32 %v3660_v62, %v2141_v8  ;;  %3748 = vmatmul.msk.f32.gmra.mxu3 %vm279_vm0, %v5318_v44  ;;  %v1984_v49 = vpop.f32.mrf.mxu2  ;;  %v3662_v62 = vld [vmem:[%s6377_s3 + $0x138] sm:$0xff]  ;;  %v3890_v44 = vld [vmem:[%s6376_s2 + $0xa] ss:$0 sm:$0xff] }
 0x7bc   : > { %v1985_v47 = vadd.f32 %v3890_v44, %v1984_v49  ;;  %v1982_v17 = vadd.f32 %v3890_v44, %v1981_v12  ;;  %v1979_v60 = vadd.f32 %v3890_v44, %v1978_v43  ;;  %v1976_v26 = vadd.f32 %v3890_v44, %v1975_v15 }
 0x7bd   : > { %2184 = vmax.xlane.f32.xlu0 %v5638_v28  ;;  %v1973_v31 = vadd.f32 %v3890_v44, %v1972_v7  ;;  %v1967_v49 = vadd.f32 %v3890_v44, %v5587_v9 }
 0x7c2   : > { %v2144_v24 = vpop.f32.mrf.mxu3 }
 0x7c3   : > { %v5646_v41 = vadd.f32 %v3661_v10, %v2144_v24  ;;  %3749 = vmatmul.msk.f32.gmra.mxu3 %vm279_vm0, %v5416_v34  ;;  %v1987_v10 = vpop.f32.mrf.mxu2 }
 0x7c4   : > { %v1988_v25 = vadd.f32 %v3890_v44, %v1987_v10  ;;  %v1964_v10 = vadd.f32 %v3890_v44, %v5577_v61 }
 0x7c5   : > { %2186 = vmax.xlane.f32.xlu1 %v5646_v41 }
 0x7ca   : > { %v2147_v8 = vpop.f32.mrf.mxu3 }
 0x7cb   : > { %v5654_v4 = vadd.f32 %v3662_v62, %v2147_v8  ;;  %3750 = vmatmul.msk.f32.gmra.mxu3 %vm279_vm0, %v5431_v48  ;;  %v1990_v24 = vpop.f32.mrf.mxu2 }
 0x7cc   : > { %v1991_v62 = vadd.f32 %v3890_v44, %v1990_v24 }
 0x7cd   : > { %2188 = vmax.xlane.f32.xlu0 %v5654_v4 }
 0x7d3   : > { %3751 = vmatmul.msk.f32.gmra.mxu3 %vm279_vm0, %v5452_v18  ;;  %v1993_v0 = vpop.f32.mrf.mxu2 }
 0x7d4   : > { %v1994_v8 = vadd.f32 %v3890_v44, %v1993_v0  ;;  %v1970_v0 = vadd.f32 %v3890_v44, %v5597_v58 }
 0x7d6   : > { %2318 = vmatpush.msrb.mxu0 %v1994_v8  ;;  %v3664_v8 = vld [vmem:[%s6377_s3 + $0x148] sm:$0xff] }
 0x7d8   : > { %2319 = vmatpush.msrb.mxu0 %v1991_v62 }
 0x7da   : > { %2320 = vmatpush.msrb.mxu0 %v1988_v25  ;;  %v1961_v25 = vadd.f32 %v3890_v44, %v5571_v45 }
 0x7db   : > { %3752 = vmatmul.msk.f32.gmra.mxu3 %vm279_vm0, %v5463_v30 }
 0x7dc   : > { %2321 = vmatpush.msrb.mxu0 %v1985_v47  ;;  %v1955_v47 = vadd.f32 %v3890_v44, %v5561_v20 }
 0x7de   : > { %2322 = vmatpush.msrb.mxu0 %v1982_v17  ;;  %v2150_v17 = vpop.f32.mrf.mxu3 }
 0x7e0   : > { %2323 = vmatpush.msrb.mxu0 %v1979_v60  ;;  %v1958_v60 = vadd.f32 %v3890_v44, %v5565_v38 }
 0x7e2   : > { %2324 = vmatpush.msrb.mxu0 %v1976_v26  ;;  %v1952_v26 = vadd.f32 %v3890_v44, %v5555_v2 }
 0x7e3   : > { %3753 = vmatmul.msk.f32.gmra.mxu3 %vm279_vm0, %v5472_v42 }
 0x7e4   : > { %2325 = vmatpush.msrb.mxu0 %v1973_v31  ;;  %v1949_v31 = vadd.f32 %v3890_v44, %v5551_v39 }
 0x7e6   : > { %2326 = vmatpush.msrb.mxu0 %v1970_v0  ;;  %v2153_v45 = vpop.f32.mrf.mxu3 }
 0x7e8   : > { %2327 = vmatpush.msrb.mxu0 %v1967_v49  ;;  %v5708_v49 = vadd.f32 %v3664_v8, %v2153_v45  ;;  %v3666_v45 = vld [vmem:[%s6377_s3 + $0x158] sm:$0xff] }
 0x7ea   : > { %2328 = vmatpush.msrb.mxu0 %v1964_v10 }
 0x7eb   : > { %3754 = vmatmul.msk.f32.gmra.mxu3 %vm279_vm0, %v5483_v46 }
 0x7ec   : > { %2329 = vmatpush.msrb.mxu0 %v1961_v25 }
 0x7ee   : > { %2330 = vmatpush.msrb.mxu0 %v1958_v60  ;;  %v2156_v61 = vpop.f32.mrf.mxu3  ;;  %v3665_v60 = vld [vmem:[%s6377_s3 + $0x150] sm:$0xff] }
 0x7f0   : > { %2331 = vmatpush.msrb.mxu0 %v1955_v47 }
 0x7f2   : > { %2332 = vmatpush.msrb.mxu0 %v1952_v26  ;;  %v5720_v26 = vadd.f32 %v3665_v60, %v2156_v61 }
 0x7f3   : > { %3755 = vmatmul.msk.f32.gmra.mxu3 %vm279_vm0, %v5492_v19 }
 0x7f4   : > { %2333 = vmatpush.msrb.mxu0 %v1949_v31 }
 0x7f6   : > { %v2159_v58 = vpop.f32.mrf.mxu3 }
 0x7fb   : > { %3756 = vmatmul.msk.f32.gmra.mxu3 %vm279_vm0, %v5503_v3 }
 0x7fe   : > { %v2162_v62 = vpop.f32.mrf.mxu3 }
 0x803   : > { %3757 = vmatmul.msk.f32.gmra.mxu3 %vm279_vm0, %v5514_v53 }
 0x806   : > { %v2165_v47 = vpop.f32.mrf.mxu3 }
 0x808   : > { %v2175_v38 = vpop.xlane.xlu1 %2174 }
 0x809   : > { %v2206_v20 = vsub.f32 %v5582_v5, %v2175_v38  ;;  %v3663_v5 = vld [vmem:[%s6377_s3 + $0x140] sm:$0xff] }
 0x80a   : > { %v5696_v12 = vadd.f32 %v3663_v5, %v2150_v17 }
 0x80b   : > { %v2222_v9 = vmul.f32 1.442695, %v2206_v20  ;;  %3758 = vmatmul.msk.f32.gmra.mxu3 %vm279_vm0, %v5525_v33  ;;  %v5732_v20 = vadd.f32 %v3666_v45, %v2159_v58 }
 0x80d   : > { %4023 = vpow2.f32 %v2222_v9 }
 0x810   : > { %v2177_v39 = vpop.xlane.xlu2 %2176 }
 0x811   : > { %v2207_v2 = vsub.f32 %v5592_v23, %v2177_v39  ;;  %v3667_v39 = vld [vmem:[%s6377_s3 + $0x160] sm:$0xff] }
 0x813   : > { %v5688_v7 = vpop.eup %4023  ;;  %v2224_v15 = vmul.f32 1.442695, %v2207_v2  ;;  %3759 = vmatmul.msk.f32.gmra.mxu3 %vm279_vm0, %v5358_v52 }
 0x814   : > { %2254 = vadd.xlane.f32.xlu2 %v5688_v7 }
 0x815   : > { %4025 = vpow2.f32 %v2224_v15  ;;  %v5742_v15 = vadd.f32 %v3667_v39, %v2162_v62 }
 0x818   : > { %v2179_v43 = vpop.xlane.xlu0 %2178 }
 0x819   : > { %v2208_v24 = vsub.f32 %v5602_v55, %v2179_v43 }
 0x81b   : > { %v5699_v23 = vpop.eup %4025  ;;  %v2226_v44 = vmul.f32 1.442695, %v2208_v24  ;;  %3760 = vmatmul.msk.f32.gmra.mxu3 %vm279_vm0, %v5381_v56  ;;  %v2168_v56 = vpop.f32.mrf.mxu3  ;;  %v3668_v24 = vld [vmem:[%s6377_s3 + $0x168] sm:$0xff] }
 0x81c   : > { %2256 = vadd.xlane.f32.xlu1 %v5699_v23  ;;  %2190 = vmax.xlane.f32.xlu2 %v5696_v12  ;;  %v5752_v8 = vadd.f32 %v3668_v24, %v2165_v47 }
 0x81d   : > { %4027 = vpow2.f32 %v2226_v44 }
 0x820   : > { %v2181_v0 = vpop.xlane.xlu1 %2180 }
 0x821   : > { %v2209_v55 = vsub.f32 %v5610_v29, %v2181_v0 }
 0x823   : > { %v5711_v10 = vpop.eup %4027  ;;  %v2228_v25 = vmul.f32 1.442695, %v2209_v55  ;;  %3761 = vmatmul.msk.f32.gmra.mxu3 %vm279_vm0, %v5543_v35  ;;  %v2171_v5 = vpop.f32.mrf.mxu3 }
 0x824   : > { %2258 = vadd.xlane.f32.xlu0 %v5711_v10  ;;  %2192 = vmax.xlane.f32.xlu1 %v5708_v49 }
 0x825   : > { %4029 = vpow2.f32 %v2228_v25  ;;  %v3669_v25 = vld [vmem:[%s6377_s3 + $0x170] sm:$0xff] }
 0x826   : > { %v5764_v60 = vadd.f32 %v3669_v25, %v2168_v56 }
 0x828   : > { %v2183_v52 = vpop.xlane.xlu2 %2182 }
 0x829   : > { %v2210_v29 = vsub.f32 %v5630_v63, %v2183_v52 }
 0x82b   : > { %v5723_v17 = vpop.eup %4029  ;;  %v2230_v31 = vmul.f32 1.442695, %v2210_v29 }
 0x82c   : > { %2194 = vmax.xlane.f32.xlu0 %v5720_v26  ;;  %2260 = vadd.xlane.f32.xlu2 %v5723_v17 }
 0x82d   : > { %4031 = vpow2.f32 %v2230_v31 }
 0x82e   : > { %v5755_v0 = vpop.f32.mrf.mxu3 }
 0x830   : > { %v2185_v38 = vpop.xlane.xlu0 %2184 }
 0x831   : > { %v2211_v63 = vsub.f32 %v5638_v28, %v2185_v38 }
 0x833   : > { %v5735_v61 = vpop.eup %4031  ;;  %v2232_v9 = vmul.f32 1.442695, %v2211_v63 }
 0x834   : > { %2262 = vadd.xlane.f32.xlu1 %v5735_v61  ;;  %2196 = vmax.xlane.f32.xlu2 %v5732_v20 }
 0x835   : > { %4033 = vpow2.f32 %v2232_v9 }
 0x836   : > { %v5768_v52 = vpop.f32.mrf.mxu3 }
 0x838   : > { %v2187_v2 = vpop.xlane.xlu1 %2186 }
 0x839   : > { %v2212_v58 = vsub.f32 %v5646_v41, %v2187_v2 }
 0x83b   : > { %v5745_v43 = vpop.eup %4033  ;;  %v2234_v28 = vmul.f32 1.442695, %v2212_v58 }
 0x83c   : > { %2264 = vadd.xlane.f32.xlu0 %v5745_v43  ;;  %2198 = vmax.xlane.f32.xlu1 %v5742_v15 }
 0x83d   : > { %4035 = vpow2.f32 %v2234_v28 }
 0x83e   : > { %v5778_v31 = vpop.f32.mrf.mxu3 }
 0x840   : > { %v2189_v44 = vpop.xlane.xlu0 %2188 }
 0x841   : > { %v2213_v62 = vsub.f32 %v5654_v4, %v2189_v44  ;;  %v3670_v4 = vld [vmem:[%s6377_s3 + $0x178] sm:$0xff] }
 0x842   : > { %v5775_v29 = vadd.f32 %v3670_v4, %v2171_v5 }
 0x843   : > { %v5757_v41 = vpop.eup %4035  ;;  %v2236_v55 = vmul.f32 1.442695, %v2213_v62 }
 0x844   : > { %2200 = vmax.xlane.f32.xlu0 %v5752_v8  ;;  %2266 = vadd.xlane.f32.xlu2 %v5757_v41 }
 0x845   : > { %4037 = vpow2.f32 %v2236_v55 }
 0x846   : > { %v5780_v45 = vpop.f32.mrf.mxu3 }
 0x84b   : > { %v5766_v47 = vpop.eup %4037 }
 0x84c   : > { %2268 = vadd.xlane.f32.xlu1 %v5766_v47  ;;  %2202 = vmax.xlane.f32.xlu2 %v5764_v60 }
 0x84e   : > { %v5782_v56 = vpop.f32.mrf.mxu3 }
 0x854   : > { %2204 = vmax.xlane.f32.xlu1 %v5775_v29 }
 0x856   : > { %v5784_v38 = vpop.f32.mrf.mxu3 }
 0x85e   : > { %v5786_v63 = vpop.f32.mrf.mxu3 }
 0x866   : > { %v5788_v9 = vpop.f32.mrf.mxu3 }
 0x86e   : > { %v5790_v2 = vpop.f32.mrf.mxu3 }
 0x876   : > { %v5794_v62 = vpop.f32.mrf.mxu3 }
 0x887   : > { %v2255_v39 = vpop.xlane.xlu2 %2254 }
 0x888   : > { %4039 = vrcp.f32 %v2255_v39 }
 0x88e   : > { %v4040_v58 = vpop.eup %4039 }
 0x88f   : > { %v2302_v5 = vmul.f32 %v4040_v58, %v5688_v7  ;;  %v2191_v28 = vpop.xlane.xlu2 %2190  ;;  %v2257_v24 = vpop.xlane.xlu1 %2256 }
 0x890   : > { %v2214_v44 = vsub.f32 %v5696_v12, %v2191_v28  ;;  %4041 = vrcp.f32 %v2257_v24  ;;  %v5798_v7 = vpop.f32.mrf.mxu3 }
 0x891   : > { %2334 = vmatmul.f32.vlgmr.msrb.gmra.mxu0 %v2302_v5 }
 0x892   : > { %v2238_v55 = vmul.f32 1.442695, %v2214_v44 }
 0x894   : > { %4043 = vpow2.f32 %v2238_v55 }
 0x896   : > { %v4042_v25 = vpop.eup %4041 }
 0x897   : > { %v2259_v4 = vpop.xlane.xlu0 %2258  ;;  %v2193_v50 = vpop.xlane.xlu1 %2192  ;;  %v2303_v39 = vmul.f32 %v4042_v25, %v5699_v23 }
 0x898   : > { %4045 = vrcp.f32 %v2259_v4  ;;  %v2215_v36 = vsub.f32 %v5708_v49, %v2193_v50  ;;  %v5805_v23 = vpop.f32.mrf.mxu3 }
 0x899   : > { %2337 = vmatmul.f32.gmra.mxu0 %v2303_v39 }
 0x89a   : > { %v5800_v58 = vpop.eup %4043  ;;  %v2240_v12 = vmul.f32 1.442695, %v2215_v36 }
 0x89b   : > { %2270 = vadd.xlane.f32.xlu0 %v5800_v58 }
 0x89c   : > { %4047 = vpow2.f32 %v2240_v12 }
 0x89e   : > { %v4046_v5 = vpop.eup %4045 }
 0x89f   : > { %v2195_v28 = vpop.xlane.xlu0 %2194  ;;  %v2261_v24 = vpop.xlane.xlu2 %2260  ;;  %v2304_v44 = vmul.f32 %v4046_v5, %v5711_v10 }
 0x8a0   : > { %v2216_v55 = vsub.f32 %v5720_v26, %v2195_v28  ;;  %4049 = vrcp.f32 %v2261_v24  ;;  %v2652_v10 = vpop.f32.mrf.mxu3 }
 0x8a1   : > { %2340 = vmatmul.f32.gmra.mxu0 %v2304_v44 }
 0x8a2   : > { %v5807_v50 = vpop.eup %4047  ;;  %v2242_v49 = vmul.f32 1.442695, %v2216_v55 }
 0x8a3   : > { %2272 = vadd.xlane.f32.xlu2 %v5807_v50 }
 0x8a4   : > { %4051 = vpow2.f32 %v2242_v49 }
 0x8a6   : > { %v4050_v36 = vpop.eup %4049 }
 0x8a7   : > { %v2197_v25 = vpop.xlane.xlu2 %2196  ;;  %v2263_v4 = vpop.xlane.xlu1 %2262  ;;  %v2305_v39 = vmul.f32 %v4050_v36, %v5723_v17 }
 0x8a8   : > { %v2217_v12 = vsub.f32 %v5732_v20, %v2197_v25  ;;  %4053 = vrcp.f32 %v2263_v4  ;;  %v2655_v17 = vpop.f32.mrf.mxu3  ;;  %v3703_v25 = vld [vmem:[%s6378_s4 + $0x10] sm:$0xff] }
 0x8a9   : > { %2343 = vmatmul.f32.gmra.mxu0 %v2305_v39  ;;  %2448 = vmatpush.msrb.mxu1 %v3703_v25 }
 0x8aa   : > { %v5812_v26 = vpop.eup %4051  ;;  %v2244_v5 = vmul.f32 1.442695, %v2217_v12 }
 0x8ab   : > { %2274 = vadd.xlane.f32.xlu0 %v5812_v26 }
 0x8ac   : > { %4055 = vpow2.f32 %v2244_v5 }
 0x8ae   : > { %v4054_v28 = vpop.eup %4053 }
 0x8af   : > { %v2265_v24 = vpop.xlane.xlu0 %2264  ;;  %v2199_v44 = vpop.xlane.xlu1 %2198  ;;  %v2306_v55 = vmul.f32 %v4054_v28, %v5735_v61 }
 0x8b0   : > { %4057 = vrcp.f32 %v2265_v24  ;;  %v2218_v49 = vsub.f32 %v5742_v15, %v2199_v44  ;;  %v2658_v5 = vpop.f32.mrf.mxu3 }
 0x8b1   : > { %2346 = vmatmul.f32.gmra.mxu0 %v2306_v55  ;;  %v3891_v55 = vld [vmem:[%s6376_s2 + $0x7] ss:$0 sm:$0xff] }
 0x8b2   : > { %v5817_v20 = vpop.eup %4055  ;;  %v2246_v36 = vmul.f32 1.442695, %v2218_v49 }
 0x8b3   : > { %2276 = vadd.xlane.f32.xlu1 %v5817_v20 }
 0x8b4   : > { %4059 = vpow2.f32 %v2246_v36 }
 0x8b6   : > { %v4058_v4 = vpop.eup %4057 }
 0x8b7   : > { %v2201_v39 = vpop.xlane.xlu0 %2200  ;;  %v2267_v12 = vpop.xlane.xlu2 %2266  ;;  %v2307_v61 = vmul.f32 %v4058_v4, %v5745_v43 }
 0x8b8   : > { %v2219_v15 = vsub.f32 %v5752_v8, %v2201_v39  ;;  %4061 = vrcp.f32 %v2267_v12  ;;  %v2661_v25 = vpop.f32.mrf.mxu3 }
 0x8b9   : > { %2349 = vmatmul.f32.gmra.mxu0 %v2307_v61  ;;  %v2662_v12 = vadd.f32 %v3891_v55, %v2661_v25  ;;  %v2659_v61 = vadd.f32 %v3891_v55, %v2658_v5  ;;  %v2650_v5 = vadd.f32 %v3891_v55, %v5805_v23  ;;  %v2638_v23 = vadd.f32 %v3891_v55, %v5788_v9 }
 0x8ba   : > { %v5825_v28 = vpop.eup %4059  ;;  %v2248_v24 = vmul.f32 1.442695, %v2219_v15  ;;  %v2626_v9 = vadd.f32 %v3891_v55, %v5780_v45 }
 0x8bb   : > { %2278 = vadd.xlane.f32.xlu2 %v5825_v28  ;;  %3799 = vmatpush.xpose.msk.msra.mxu1 %vm559_vm1, %v2662_v12 }
 0x8bc   : > { %4063 = vpow2.f32 %v2248_v24 }
 0x8be   : > { %v4062_v44 = vpop.eup %4061 }
 0x8bf   : > { %v2203_v49 = vpop.xlane.xlu2 %2202  ;;  %v2269_v36 = vpop.xlane.xlu1 %2268  ;;  %v2308_v43 = vmul.f32 %v4062_v44, %v5757_v41  ;;  %3800 = vmatpush.xpose.msk.msra.mxu1 %vm559_vm1, %v2659_v61 }
 0x8c0   : > { %v2220_v8 = vsub.f32 %v5764_v60, %v2203_v49  ;;  %4065 = vrcp.f32 %v2269_v36  ;;  %v2656_v60 = vadd.f32 %v3891_v55, %v2655_v17  ;;  %v2653_v36 = vadd.f32 %v3891_v55, %v2652_v10 }
 0x8c1   : > { %2352 = vmatmul.f32.gmra.mxu0 %v2308_v43  ;;  %v2641_v10 = vadd.f32 %v3891_v55, %v5790_v2  ;;  %v2635_v17 = vadd.f32 %v3891_v55, %v5786_v63  ;;  %v3723_v2 = vld [vmem:[%s6375_s1 + $0x78] sm:$0xff]  ;;  %v2623_v63 = vadd.f32 %v3891_v55, %v5778_v31  ;;  %v3722_v31 = vld [vmem:[%s6375_s1 + $0x70] sm:$0xff] }
 0x8c2   : > { %v5833_v4 = vpop.eup %4063  ;;  %v2250_v39 = vmul.f32 1.442695, %v2220_v8  ;;  %2536 = vmatpush.msrb.mxu2 %v3723_v2 }
 0x8c3   : > { %2280 = vadd.xlane.f32.xlu0 %v5833_v4  ;;  %3801 = vmatpush.xpose.msk.msra.mxu1 %vm559_vm1, %v2656_v60 }
 0x8c4   : > { %4067 = vpow2.f32 %v2250_v39  ;;  %2537 = vmatpush.msrb.mxu2 %v3722_v31 }
 0x8c6   : > { %v4066_v15 = vpop.eup %4065 }
 0x8c7   : > { %v2205_v24 = vpop.xlane.xlu1 %2204  ;;  %v2309_v13 = vmul.f32 %v4066_v15, %v5766_v47  ;;  %3802 = vmatpush.xpose.msk.msra.mxu1 %vm559_vm1, %v2653_v36 }
 0x8c8   : > { %v2221_v41 = vsub.f32 %v5775_v29, %v2205_v24  ;;  %v2647_v29 = vadd.f32 %v3891_v55, %v5798_v7  ;;  %v2632_v7 = vadd.f32 %v3891_v55, %v5784_v38  ;;  %v2620_v38 = vadd.f32 %v3891_v55, %v5768_v52 }
 0x8c9   : > { %2355 = vmatmul.f32.gmra.mxu0 %v2309_v13  ;;  %v2644_v13 = vadd.f32 %v3891_v55, %v5794_v62  ;;  %v2629_v62 = vadd.f32 %v3891_v55, %v5782_v56  ;;  %v2617_v56 = vadd.f32 %v3891_v55, %v5755_v0 }
 0x8ca   : > { %v5840_v44 = vpop.eup %4067  ;;  %v2252_v49 = vmul.f32 1.442695, %v2221_v41 }
 0x8cb   : > { %2282 = vadd.xlane.f32.xlu1 %v5840_v44  ;;  %3803 = vmatpush.xpose.msk.msra.mxu1 %vm559_vm1, %v2650_v5 }
 0x8cc   : > { %4069 = vpow2.f32 %v2252_v49  ;;  %v5892_v49 = vld [vmem:[%s4269_s13] sm:$0xff] }
 0x8cf   : > { %3804 = vmatpush.xpose.msk.msra.mxu1 %vm559_vm1, %v2647_v29 }
 0x8d2   : > { %v5846_v47 = vpop.eup %4069 }
 0x8d3   : > { %2284 = vadd.xlane.f32.xlu2 %v5846_v47  ;;  %3805 = vmatpush.xpose.msk.msra.mxu1 %vm559_vm1, %v2644_v13  ;;  %v4182_v13 = vld [vmem:[%s4269_s13 + $0x8] sm:$0xff] }
 0x8d7   : > { %3806 = vmatpush.xpose.msk.msra.mxu1 %vm559_vm1, %v2641_v10 }
 0x8db   : > { %3807 = vmatpush.xpose.msk.msra.mxu1 %vm559_vm1, %v2638_v23 }
 0x8df   : > { %3808 = vmatpush.xpose.msk.msra.mxu1 %vm559_vm1, %v2635_v17 }
 0x8e3   : > { %3809 = vmatpush.xpose.msk.msra.mxu1 %vm559_vm1, %v2632_v7 }
 0x8e7   : > { %3810 = vmatpush.xpose.msk.msra.mxu1 %vm559_vm1, %v2629_v62  ;;  %v4183_v62 = vld [vmem:[%s4269_s13 + $0x10] sm:$0xff] }
 0x8eb   : > { %3811 = vmatpush.xpose.msk.msra.mxu1 %vm559_vm1, %v2626_v9 }
 0x8ef   : > { %3812 = vmatpush.xpose.msk.msra.mxu1 %vm559_vm1, %v2623_v63 }
 0x8f3   : > { %3813 = vmatpush.xpose.msk.msra.mxu1 %vm559_vm1, %v2620_v38 }
 0x8f7   : > { %3814 = vmatpush.xpose.msk.msra.mxu1 %vm559_vm1, %v2617_v56 }
 0x90e   : > { %v2271_v43 = vpop.xlane.xlu0 %2270  ;;  %v2335_v8 = vpop.f32.mrf.mxu0 }
 0x90f   : > { %4071 = vrcp.f32 %v2271_v43  ;;  %3704 = vmatmul.msk.f32.vlgmr.msrb.gmra.mxu1 %vm559_vm1, %v2335_v8 }
 0x915   : > { %v4072_v45 = vpop.eup %4071 }
 0x916   : > { %v2273_v52 = vpop.xlane.xlu2 %2272  ;;  %v2338_v25 = vpop.f32.mrf.mxu0  ;;  %v2310_v39 = vmul.f32 %v4072_v45, %v5800_v58  ;;  %v3721_v58 = vld [vmem:[%s6375_s1 + $0x68] sm:$0xff] }
 0x917   : > { %4073 = vrcp.f32 %v2273_v52  ;;  %3705 = vmatmul.msk.f32.gmra.mxu1 %vm559_vm1, %v2338_v25  ;;  %2538 = vmatpush.msrb.mxu2 %v3721_v58 }
 0x918   : > { %2358 = vmatmul.f32.gmra.mxu0 %v2310_v39  ;;  %v4186_v39 = vld [vmem:[%s4269_s13 + $0x18] sm:$0xff] }
 0x91d   : > { %v4074_v0 = vpop.eup %4073 }
 0x91e   : > { %v2275_v55 = vpop.xlane.xlu0 %2274  ;;  %v2341_v12 = vpop.f32.mrf.mxu0  ;;  %v2311_v61 = vmul.f32 %v4074_v0, %v5807_v50  ;;  %v3720_v50 = vld [vmem:[%s6375_s1 + $0x60] sm:$0xff] }
 0x91f   : > { %4075 = vrcp.f32 %v2275_v55  ;;  %3706 = vmatmul.msk.f32.gmra.mxu1 %vm559_vm1, %v2341_v12  ;;  %2539 = vmatpush.msrb.mxu2 %v3720_v50  ;;  %v4187_v12 = vld [vmem:[%s4269_s13 + $0x20] sm:$0xff] }
 0x920   : > { %2361 = vmatmul.f32.gmra.mxu0 %v2311_v61  ;;  %3725 = vmatmul.msk.f32.vlgmr.msrb.gmra.mxu2 %vm279_vm0, %v5892_v49  ;;  %v5974_v61 = vld [vmem:[%s6376_s2 + $0x3] ss:$0 sm:$0xff] }
 0x925   : > { %v4076_v15 = vpop.eup %4075 }
 0x926   : > { %v2277_v24 = vpop.xlane.xlu1 %2276  ;;  %v2344_v41 = vpop.f32.mrf.mxu0  ;;  %v2312_v60 = vmul.f32 %v4076_v15, %v5812_v26 }
 0x927   : > { %4077 = vrcp.f32 %v2277_v24  ;;  %3707 = vmatmul.msk.f32.gmra.mxu1 %vm559_vm1, %v2344_v41 }
 0x928   : > { %2364 = vmatmul.f32.gmra.mxu0 %v2312_v60  ;;  %3726 = vmatmul.msk.f32.gmra.mxu2 %vm279_vm0, %v4182_v13  ;;  %v4188_v60 = vld [vmem:[%s4269_s13 + $0x28] sm:$0xff] }
 0x92d   : > { %v4078_v26 = vpop.eup %4077 }
 0x92e   : > { %v2279_v36 = vpop.xlane.xlu2 %2278  ;;  %v2347_v5 = vpop.f32.mrf.mxu0  ;;  %v2313_v29 = vmul.f32 %v4078_v26, %v5817_v20 }
 0x92f   : > { %4079 = vrcp.f32 %v2279_v36  ;;  %3708 = vmatmul.msk.f32.gmra.mxu1 %vm559_vm1, %v2347_v5 }
 0x930   : > { %2367 = vmatmul.f32.gmra.mxu0 %v2313_v29  ;;  %3727 = vmatmul.msk.f32.gmra.mxu2 %vm279_vm0, %v4183_v62  ;;  %v4190_v29 = vld [vmem:[%s4269_s13 + $0x38] sm:$0xff] }
 0x935   : > { %v4080_v10 = vpop.eup %4079 }
 0x936   : > { %v2281_v23 = vpop.xlane.xlu0 %2280  ;;  %v2350_v17 = vpop.f32.mrf.mxu0  ;;  %v2314_v7 = vmul.f32 %v4080_v10, %v5825_v28 }
 0x937   : > { %4081 = vrcp.f32 %v2281_v23  ;;  %3709 = vmatmul.msk.f32.gmra.mxu1 %vm559_vm1, %v2350_v17  ;;  %v4191_v17 = vld [vmem:[%s4269_s13 + $0x40] sm:$0xff] }
 0x938   : > { %2370 = vmatmul.f32.gmra.mxu0 %v2314_v7  ;;  %3728 = vmatmul.msk.f32.gmra.mxu2 %vm279_vm0, %v5416_v34  ;;  %v5930_v34 = vld [vmem:[%s4269_s13 + $0x68] sm:$0xff] }
 0x93d   : > { %v4082_v20 = vpop.eup %4081 }
 0x93e   : > { %v2283_v2 = vpop.xlane.xlu1 %2282  ;;  %v2353_v9 = vpop.f32.mrf.mxu0  ;;  %v2315_v63 = vmul.f32 %v4082_v20, %v5833_v4  ;;  %v4192_v20 = vld [vmem:[%s4269_s13 + $0x48] sm:$0xff] }
 0x93f   : > { %4083 = vrcp.f32 %v2283_v2  ;;  %3710 = vmatmul.msk.f32.gmra.mxu1 %vm559_vm1, %v2353_v9 }
 0x940   : > { %2373 = vmatmul.f32.gmra.mxu0 %v2315_v63  ;;  %3729 = vmatmul.msk.f32.gmra.mxu2 %vm279_vm0, %v5431_v48 }
 0x945   : > { %v4084_v28 = vpop.eup %4083 }
 0x946   : > { %v2285_v38 = vpop.xlane.xlu2 %2284  ;;  %v2356_v56 = vpop.f32.mrf.mxu0  ;;  %v2316_v43 = vmul.f32 %v4084_v28, %v5840_v44  ;;  %v4193_v28 = vld [vmem:[%s4269_s13 + $0x50] sm:$0xff] }
 0x947   : > { %4085 = vrcp.f32 %v2285_v38  ;;  %3711 = vmatmul.msk.f32.gmra.mxu1 %vm559_vm1, %v2356_v56 }
 0x948   : > { %2376 = vmatmul.f32.gmra.mxu0 %v2316_v43  ;;  %3730 = vmatmul.msk.f32.gmra.mxu2 %vm279_vm0, %v5452_v18  ;;  %v5936_v18 = vld [vmem:[%s4269_s13 + $0x70] sm:$0xff]  ;;  %v4194_v43 = vld [vmem:[%s4269_s13 + $0x58] sm:$0xff] }
 0x94d   : > { %v4086_v4 = vpop.eup %4085 }
 0x94e   : > { %v2317_v8 = vmul.f32 %v4086_v4, %v5846_v47 }
 0x950   : > { %2379 = vmatmul.f32.gmra.mxu0 %v2317_v8  ;;  %3731 = vmatmul.msk.f32.gmra.mxu2 %vm279_vm0, %v5463_v30 }
 0x958   : > { %3732 = vmatmul.msk.f32.gmra.mxu2 %vm279_vm0, %v5472_v42 }
 0x960   : > { %3733 = vmatmul.msk.f32.gmra.mxu2 %vm279_vm0, %v5483_v46  ;;  %v3765_v46 = vld [vmem:[%s6375_s1 + $0x178] sm:$0xff] }
 0x961   : > { %2686 = vmatpush.msra.mxu0 %v3765_v46 }
 0x968   : > { %3734 = vmatmul.msk.f32.gmra.mxu2 %vm279_vm0, %v5492_v19  ;;  %v3764_v19 = vld [vmem:[%s6375_s1 + $0x170] sm:$0xff] }
 0x969   : > { %2687 = vmatpush.msra.mxu0 %v3764_v19 }
 0x970   : > { %3735 = vmatmul.msk.f32.gmra.mxu2 %vm279_vm0, %v5503_v3  ;;  %v3763_v3 = vld [vmem:[%s6375_s1 + $0x168] sm:$0xff] }
 0x971   : > { %2688 = vmatpush.msra.mxu0 %v3763_v3 }
 0x978   : > { %3736 = vmatmul.msk.f32.gmra.mxu2 %vm279_vm0, %v5514_v53  ;;  %v3762_v53 = vld [vmem:[%s6375_s1 + $0x160] sm:$0xff] }
 0x979   : > { %2689 = vmatpush.msra.mxu0 %v3762_v53 }
 0x97a   : > { %3767 = vmatmul.msk.f32.vlgmr.msra.gmra.mxu0 %vm279_vm0, %v5892_v49  ;;  %v4189_v49 = vld [vmem:[%s4269_s13 + $0x30] sm:$0xff] }
 0x980   : > { %3737 = vmatmul.msk.f32.gmra.mxu2 %vm279_vm0, %v5525_v33 }
 0x982   : > { %3768 = vmatmul.msk.f32.gmra.mxu0 %vm279_vm0, %v4182_v13 }
 0x988   : > { %3738 = vmatmul.msk.f32.gmra.mxu2 %vm279_vm0, %v5930_v34 }
 0x98a   : > { %3769 = vmatmul.msk.f32.gmra.mxu0 %vm279_vm0, %v4183_v62 }
 0x98c   : > { %v5963_v52 = vpop.f32.mrf.mxu1 }
 0x990   : > { %3739 = vmatmul.msk.f32.gmra.mxu2 %vm279_vm0, %v5936_v18 }
 0x992   : > { %3770 = vmatmul.msk.f32.gmra.mxu0 %vm279_vm0, %v4186_v39 }
 0x994   : > { %v5976_v15 = vpop.f32.mrf.mxu1 }
 0x995   : > { %v2359_v48 = vpop.f32.mrf.mxu0 }
 0x996   : > { %3712 = vmatmul.msk.f32.gmra.mxu1 %vm559_vm1, %v2359_v48 }
 0x998   : > { %3740 = vmatmul.msk.f32.gmra.mxu2 %vm279_vm0, %v5543_v35 }
 0x99a   : > { %3771 = vmatmul.msk.f32.gmra.mxu0 %vm279_vm0, %v4187_v12 }
 0x99c   : > { %v5982_v58 = vpop.f32.mrf.mxu1 }
 0x99d   : > { %v2362_v30 = vpop.f32.mrf.mxu0 }
 0x99e   : > { %3713 = vmatmul.msk.f32.gmra.mxu1 %vm559_vm1, %v2362_v30 }
 0x9a2   : > { %3772 = vmatmul.msk.f32.gmra.mxu0 %vm279_vm0, %v4188_v60  ;;  %v3783_v60 = vld [vmem:[%s6377_s3 + $0x180] sm:$0xff] }
 0x9a3   : > { %v2541_v45 = vpop.f32.mrf.mxu2 }
 0x9a4   : > { %v2542_v24 = vadd.f32 %v5974_v61, %v2541_v45  ;;  %v5989_v5 = vpop.f32.mrf.mxu1 }
 0x9a5   : > { %v2365_v42 = vpop.f32.mrf.mxu0 }
 0x9a6   : > { %3714 = vmatmul.msk.f32.gmra.mxu1 %vm559_vm1, %v2365_v42 }
 0x9aa   : > { %3773 = vmatmul.msk.f32.gmra.mxu0 %vm279_vm0, %v4189_v49 }
 0x9ab   : > { %v2544_v0 = vpop.f32.mrf.mxu2 }
 0x9ac   : > { %v2545_v50 = vadd.f32 %v5974_v61, %v2544_v0  ;;  %v5995_v23 = vpop.f32.mrf.mxu1 }
 0x9ad   : > { %v2368_v44 = vpop.f32.mrf.mxu0 }
 0x9ae   : > { %3715 = vmatmul.msk.f32.gmra.mxu1 %vm559_vm1, %v2368_v44 }
 0x9b2   : > { %3774 = vmatmul.msk.f32.gmra.mxu0 %vm279_vm0, %v4190_v29 }
 0x9b3   : > { %v2547_v41 = vpop.f32.mrf.mxu2 }
 0x9b4   : > { %v2548_v36 = vadd.f32 %v5974_v61, %v2547_v41  ;;  %v6004_v2 = vpop.f32.mrf.mxu1 }
 0x9b5   : > { %v2371_v47 = vpop.f32.mrf.mxu0 }
 0x9b6   : > { %3716 = vmatmul.msk.f32.gmra.mxu1 %vm559_vm1, %v2371_v47 }
 0x9ba   : > { %3775 = vmatmul.msk.f32.gmra.mxu0 %vm279_vm0, %v4191_v17 }
 0x9bb   : > { %v2550_v26 = vpop.f32.mrf.mxu2 }
 0x9bc   : > { %v2551_v10 = vadd.f32 %v5974_v61, %v2550_v26  ;;  %v6010_v38 = vpop.f32.mrf.mxu1 }
 0x9bd   : > { %v2374_v31 = vpop.f32.mrf.mxu0 }
 0x9be   : > { %3717 = vmatmul.msk.f32.gmra.mxu1 %vm559_vm1, %v2374_v31 }
 0x9c2   : > { %3776 = vmatmul.msk.f32.gmra.mxu0 %vm279_vm0, %v4192_v20 }
 0x9c3   : > { %v2553_v13 = vpop.f32.mrf.mxu2 }
 0x9c4   : > { %v2554_v7 = vadd.f32 %v5974_v61, %v2553_v13  ;;  %v6017_v48 = vpop.f32.mrf.mxu1  ;;  %v3784_v13 = vld [vmem:[%s6377_s3 + $0x188] sm:$0xff] }
 0x9c5   : > { %v2377_v25 = vpop.f32.mrf.mxu0 }
 0x9c6   : > { %3718 = vmatmul.msk.f32.gmra.mxu1 %vm559_vm1, %v2377_v25 }
 0x9ca   : > { %3777 = vmatmul.msk.f32.gmra.mxu0 %vm279_vm0, %v4193_v28 }
 0x9cb   : > { %v2556_v62 = vpop.f32.mrf.mxu2 }
 0x9cc   : > { %v2557_v9 = vadd.f32 %v5974_v61, %v2556_v62 }
 0x9cd   : > { %v2380_v55 = vpop.f32.mrf.mxu0 }
 0x9ce   : > { %3719 = vmatmul.msk.f32.gmra.mxu1 %vm559_vm1, %v2380_v55 }
 0x9d2   : > { %3778 = vmatmul.msk.f32.gmra.mxu0 %vm279_vm0, %v4194_v43 }
 0x9d3   : > { %v2559_v63 = vpop.f32.mrf.mxu2 }
 0x9d4   : > { %v2560_v56 = vadd.f32 %v5974_v61, %v2559_v63 }
 0x9d6   : > { %3815 = vmatmul.msk.f32.vlgmr.msra.gmra.mxu1 %vm559_vm1, %v2542_v24 }
 0x9da   : > { %3779 = vmatmul.msk.f32.gmra.mxu0 %vm279_vm0, %v5525_v33 }
 0x9db   : > { %v2562_v4 = vpop.f32.mrf.mxu2 }
 0x9dc   : > { %v2563_v8 = vadd.f32 %v5974_v61, %v2562_v4 }
 0x9de   : > { %3816 = vmatmul.msk.f32.gmra.mxu1 %vm559_vm1, %v2545_v50 }
 0x9e2   : > { %3780 = vmatmul.msk.f32.gmra.mxu0 %vm279_vm0, %v5930_v34 }
 0x9e3   : > { %v2565_v44 = vpop.f32.mrf.mxu2 }
 0x9e4   : > { %v2566_v34 = vadd.f32 %v5974_v61, %v2565_v44 }
 0x9e6   : > { %3817 = vmatmul.msk.f32.gmra.mxu1 %vm559_vm1, %v2548_v36 }
 0x9ea   : > { %3781 = vmatmul.msk.f32.gmra.mxu0 %vm279_vm0, %v5936_v18 }
 0x9eb   : > { %v2568_v31 = vpop.f32.mrf.mxu2 }
 0x9ee   : > { %3818 = vmatmul.msk.f32.gmra.mxu1 %vm559_vm1, %v2551_v10 }
 0x9f2   : > { %3782 = vmatmul.msk.f32.gmra.mxu0 %vm279_vm0, %v5543_v35  ;;  %v2569_v35 = vadd.f32 %v5974_v61, %v2568_v31 }
 0x9f3   : > { %v2571_v39 = vpop.f32.mrf.mxu2 }
 0x9f4   : > { %v2572_v0 = vadd.f32 %v5974_v61, %v2571_v39 }
 0x9f6   : > { %3819 = vmatmul.msk.f32.gmra.mxu1 %vm559_vm1, %v2554_v7 }
 0x9f7   : > { %v6034_v19 = vpop.f32.mrf.mxu0 }
 0x9fb   : > { %v2574_v24 = vpop.f32.mrf.mxu2 }
 0x9fc   : > { %v2575_v41 = vadd.f32 %v5974_v61, %v2574_v24 }
 0x9fe   : > { %3820 = vmatmul.msk.f32.gmra.mxu1 %vm559_vm1, %v2557_v9  ;;  %v3785_v9 = vld [vmem:[%s6377_s3 + $0x190] sm:$0xff] }
 0x9ff   : > { %v6038_v3 = vpop.f32.mrf.mxu0 }
 0xa03   : > { %v2577_v36 = vpop.f32.mrf.mxu2 }
 0xa04   : > { %v2578_v29 = vadd.f32 %v5974_v61, %v2577_v36 }
 0xa06   : > { %3821 = vmatmul.msk.f32.gmra.mxu1 %vm559_vm1, %v2560_v56 }
 0xa07   : > { %v6044_v47 = vpop.f32.mrf.mxu0 }
 0xa0b   : > { %v2580_v62 = vpop.f32.mrf.mxu2 }
 0xa0c   : > { %v2581_v20 = vadd.f32 %v5974_v61, %v2580_v62 }
 0xa0e   : > { %3822 = vmatmul.msk.f32.gmra.mxu1 %vm559_vm1, %v2563_v8  ;;  %v3786_v8 = vld [vmem:[%s6377_s3 + $0x198] sm:$0xff] }
 0xa0f   : > { %v6050_v45 = vpop.f32.mrf.mxu0 }
 0xa13   : > { %v6022_v30 = vpop.f32.mrf.mxu1  ;;  %v2583_v43 = vpop.f32.mrf.mxu2 }
 0xa14   : > { %v2584_v4 = vadd.f32 %v5974_v61, %v2583_v43 }
 0xa16   : > { %3823 = vmatmul.msk.f32.gmra.mxu1 %vm559_vm1, %v2566_v34 }
 0xa17   : > { %v6056_v55 = vpop.f32.mrf.mxu0 }
 0xa1b   : > { %v6026_v42 = vpop.f32.mrf.mxu1 }
 0xa1e   : > { %3824 = vmatmul.msk.f32.gmra.mxu1 %vm559_vm1, %v2569_v35  ;;  %v2586_v35 = vpop.f32.mrf.mxu2 }
 0xa1f   : > { %v6065_v50 = vpop.f32.mrf.mxu0  ;;  %v2587_v39 = vadd.f32 %v5974_v61, %v2586_v35  ;;  %v3789_v61 = vld [vmem:[%s6377_s3 + $0x1b0] sm:$0xff]  ;;  %v3893_v35 = vld [vmem:[%s6376_s2 + $0xb] ss:$0 sm:$0xff] }
 0xa23   : > { %v6030_v46 = vpop.f32.mrf.mxu1 }
 0xa26   : > { %3825 = vmatmul.msk.f32.gmra.mxu1 %vm559_vm1, %v2572_v0  ;;  %v3787_v0 = vld [vmem:[%s6377_s3 + $0x1a0] sm:$0xff] }
 0xa27   : > { %v6075_v10 = vpop.f32.mrf.mxu0 }
 0xa2b   : > { %v6036_v33 = vpop.f32.mrf.mxu1 }
 0xa2e   : > { %3826 = vmatmul.msk.f32.gmra.mxu1 %vm559_vm1, %v2575_v41 }
 0xa2f   : > { %v2712_v63 = vpop.f32.mrf.mxu0 }
 0xa33   : > { %v6040_v53 = vpop.f32.mrf.mxu1 }
 0xa36   : > { %3827 = vmatmul.msk.f32.gmra.mxu1 %vm559_vm1, %v2578_v29 }
 0xa37   : > { %v2715_v44 = vpop.f32.mrf.mxu0 }
 0xa3b   : > { %v6046_v18 = vpop.f32.mrf.mxu1 }
 0xa3e   : > { %3828 = vmatmul.msk.f32.gmra.mxu1 %vm559_vm1, %v2581_v20 }
 0xa3f   : > { %v2718_v24 = vpop.f32.mrf.mxu0 }
 0xa43   : > { %v6052_v25 = vpop.f32.mrf.mxu1 }
 0xa44   : > { %6398 = vst [vmem:[#allocation19_spill] sm:$0xff] %v6052_v25  ;;  %v2710_v25 = vadd.f32 %v3893_v35, %v6075_v10 }
 0xa46   : > { %3829 = vmatmul.msk.f32.gmra.mxu1 %vm559_vm1, %v2584_v4 }
 0xa47   : > { %v2721_v36 = vpop.f32.mrf.mxu0 }
 0xa4b   : > { %v6058_v12 = vpop.f32.mrf.mxu1 }
 0xa4c   : > { %6399 = vst [vmem:[#allocation20_spill] sm:$0xff] %v6058_v12  ;;  %v2713_v12 = vadd.f32 %v3893_v35, %v2712_v63  ;;  %v2692_v63 = vadd.f32 %v3893_v35, %v6034_v19  ;;  %v3791_v19 = vld [vmem:[%s6377_s3 + $0x1c0] sm:$0xff] }
 0xa4e   : > { %3830 = vmatmul.msk.f32.gmra.mxu1 %vm559_vm1, %v2587_v39 }
 0xa53   : > { %v2869_v49 = vpop.f32.mrf.mxu1 }
 0xa54   : > { %v6067_v26 = vadd.f32 %v3783_v60, %v2869_v49  ;;  %v3788_v49 = vld [vmem:[%s6377_s3 + $0x1a8] sm:$0xff] }
 0xa56   : > { %2917 = vmax.xlane.f32.xlu0 %v6067_v26 }
 0xa5b   : > { %v2872_v17 = vpop.f32.mrf.mxu1 }
 0xa5c   : > { %v6077_v7 = vadd.f32 %v3784_v13, %v2872_v17  ;;  %v2724_v17 = vpop.f32.mrf.mxu0 }
 0xa5e   : > { %2919 = vmax.xlane.f32.xlu1 %v6077_v7 }
 0xa63   : > { %v2875_v28 = vpop.f32.mrf.mxu1 }
 0xa64   : > { %v6085_v56 = vadd.f32 %v3785_v9, %v2875_v28  ;;  %v3790_v9 = vld [vmem:[%s6377_s3 + $0x1b8] sm:$0xff]  ;;  %v2727_v28 = vpop.f32.mrf.mxu0 }
 0xa66   : > { %2921 = vmax.xlane.f32.xlu2 %v6085_v56 }
 0xa6b   : > { %v2878_v34 = vpop.f32.mrf.mxu1 }
 0xa6c   : > { %v6093_v31 = vadd.f32 %v3786_v8, %v2878_v34  ;;  %v2730_v8 = vpop.f32.mrf.mxu0 }
 0xa6e   : > { %2923 = vmax.xlane.f32.xlu0 %v6093_v31 }
 0xa73   : > { %v2881_v41 = vpop.f32.mrf.mxu1 }
 0xa74   : > { %v6101_v60 = vadd.f32 %v3787_v0, %v2881_v41  ;;  %v2733_v34 = vpop.f32.mrf.mxu0 }
 0xa75   : > { %v2734_v0 = vadd.f32 %v3893_v35, %v2733_v34  ;;  %v2707_v34 = vadd.f32 %v3893_v35, %v6065_v50 }
 0xa76   : > { %2925 = vmax.xlane.f32.xlu1 %v6101_v60 }
 0xa7b   : > { %v2884_v29 = vpop.f32.mrf.mxu1 }
 0xa7c   : > { %v6107_v13 = vadd.f32 %v3788_v49, %v2884_v29  ;;  %v2736_v39 = vpop.f32.mrf.mxu0  ;;  %v2731_v49 = vadd.f32 %v3893_v35, %v2730_v8  ;;  %v2728_v29 = vadd.f32 %v3893_v35, %v2727_v28  ;;  %v2704_v8 = vadd.f32 %v3893_v35, %v6056_v55 }
 0xa7d   : > { %v2737_v41 = vadd.f32 %v3893_v35, %v2736_v39 }
 0xa7e   : > { %2927 = vmax.xlane.f32.xlu2 %v6107_v13 }
 0xa7f   : > { %3061 = vmatpush.msra.mxu2 %v2737_v41  ;;  %v3792_v41 = vld [vmem:[%s6377_s3 + $0x1c8] sm:$0xff] }
 0xa81   : > { %3062 = vmatpush.msra.mxu2 %v2734_v0 }
 0xa83   : > { %v2887_v62 = vpop.f32.mrf.mxu1  ;;  %3063 = vmatpush.msra.mxu2 %v2731_v49 }
 0xa84   : > { %v6113_v20 = vadd.f32 %v3789_v61, %v2887_v62  ;;  %v2725_v61 = vadd.f32 %v3893_v35, %v2724_v17  ;;  %v2722_v62 = vadd.f32 %v3893_v35, %v2721_v36  ;;  %v2701_v17 = vadd.f32 %v3893_v35, %v6050_v45 }
 0xa85   : > { %3064 = vmatpush.msra.mxu2 %v2728_v29  ;;  %v2698_v36 = vadd.f32 %v3893_v35, %v6044_v47 }
 0xa86   : > { %2929 = vmax.xlane.f32.xlu0 %v6113_v20 }
 0xa87   : > { %3065 = vmatpush.msra.mxu2 %v2725_v61 }
 0xa89   : > { %3066 = vmatpush.msra.mxu2 %v2722_v62 }
 0xa8b   : > { %v2890_v43 = vpop.f32.mrf.mxu1 }
 0xa8c   : > { %v6119_v4 = vadd.f32 %v3790_v9, %v2890_v43  ;;  %v2719_v9 = vadd.f32 %v3893_v35, %v2718_v24  ;;  %v2716_v43 = vadd.f32 %v3893_v35, %v2715_v44  ;;  %v2695_v44 = vadd.f32 %v3893_v35, %v6038_v3 }
 0xa8e   : > { %2931 = vmax.xlane.f32.xlu2 %v6119_v4  ;;  %3067 = vmatpush.msra.mxu2 %v2719_v9  ;;  %v3793_v9 = vld [vmem:[%s6377_s3 + $0x1d0] sm:$0xff] }
 0xa90   : > { %3068 = vmatpush.msra.mxu2 %v2716_v43 }
 0xa92   : > { %3069 = vmatpush.msra.mxu2 %v2713_v12 }
 0xa93   : > { %v2893_v10 = vpop.f32.mrf.mxu1 }
 0xa94   : > { %3070 = vmatpush.msra.mxu2 %v2710_v25  ;;  %v6140_v35 = vadd.f32 %v3791_v19, %v2893_v10 }
 0xa96   : > { %3071 = vmatpush.msra.mxu2 %v2707_v34 }
 0xa98   : > { %3072 = vmatpush.msra.mxu2 %v2704_v8 }
 0xa9a   : > { %3073 = vmatpush.msra.mxu2 %v2701_v17 }
 0xa9b   : > { %v2896_v24 = vpop.f32.mrf.mxu1 }
 0xa9c   : > { %3074 = vmatpush.msra.mxu2 %v2698_v36  ;;  %v6150_v29 = vadd.f32 %v3792_v41, %v2896_v24 }
 0xa9e   : > { %3075 = vmatpush.msra.mxu2 %v2695_v44  ;;  %v3794_v44 = vld [vmem:[%s6377_s3 + $0x1d8] sm:$0xff] }
 0xaa0   : > { %3076 = vmatpush.msra.mxu2 %v2692_v63 }
 0xac9   : > { %v2918_v50 = vpop.xlane.xlu0 %2917 }
 0xaca   : > { %v2949_v12 = vsub.f32 %v6067_v26, %v2918_v50 }
 0xacc   : > { %v2965_v55 = vmul.f32 1.442695, %v2949_v12 }
 0xace   : > { %4087 = vpow2.f32 %v2965_v55 }
 0xad1   : > { %v2920_v25 = vpop.xlane.xlu1 %2919 }
 0xad2   : > { %v2950_v45 = vsub.f32 %v6077_v7, %v2920_v25  ;;  %v2899_v7 = vpop.f32.mrf.mxu1  ;;  %v3795_v25 = vld [vmem:[%s6377_s3 + $0x1e0] sm:$0xff] }
 0xad3   : > { %v6160_v8 = vadd.f32 %v3793_v9, %v2899_v7 }
 0xad4   : > { %v6134_v47 = vpop.eup %4087  ;;  %v2967_v28 = vmul.f32 1.442695, %v2950_v45 }
 0xad5   : > { %2997 = vadd.xlane.f32.xlu1 %v6134_v47 }
 0xad6   : > { %4089 = vpow2.f32 %v2967_v28 }
 0xad9   : > { %v2922_v3 = vpop.xlane.xlu2 %2921 }
 0xada   : > { %v2951_v26 = vsub.f32 %v6085_v56, %v2922_v3  ;;  %v2902_v43 = vpop.f32.mrf.mxu1 }
 0xadb   : > { %v6170_v50 = vadd.f32 %v3794_v44, %v2902_v43 }
 0xadc   : > { %v6143_v39 = vpop.eup %4089  ;;  %v2969_v0 = vmul.f32 1.442695, %v2951_v26  ;;  %v3796_v26 = vld [vmem:[%s6377_s3 + $0x1e8] sm:$0xff] }
 0xadd   : > { %2999 = vadd.xlane.f32.xlu0 %v6143_v39  ;;  %2933 = vmax.xlane.f32.xlu1 %v6140_v35 }
 0xade   : > { %4091 = vpow2.f32 %v2969_v0 }
 0xae1   : > { %v2924_v49 = vpop.xlane.xlu0 %2923 }
 0xae2   : > { %v2952_v61 = vsub.f32 %v6093_v31, %v2924_v49  ;;  %v2905_v63 = vpop.f32.mrf.mxu1 }
 0xae3   : > { %v6180_v24 = vadd.f32 %v3795_v25, %v2905_v63 }
 0xae4   : > { %v6153_v62 = vpop.eup %4091  ;;  %v2971_v56 = vmul.f32 1.442695, %v2952_v61 }
 0xae5   : > { %3001 = vadd.xlane.f32.xlu2 %v6153_v62  ;;  %2935 = vmax.xlane.f32.xlu0 %v6150_v29 }
 0xae6   : > { %4093 = vpow2.f32 %v2971_v56  ;;  %v3797_v56 = vld [vmem:[%s6377_s3 + $0x1f0] sm:$0xff] }
 0xae9   : > { %v2926_v34 = vpop.xlane.xlu1 %2925 }
 0xaea   : > { %v2953_v17 = vsub.f32 %v6101_v60, %v2926_v34  ;;  %v2908_v19 = vpop.f32.mrf.mxu1 }
 0xaeb   : > { %v6190_v7 = vadd.f32 %v3796_v26, %v2908_v19 }
 0xaec   : > { %v6163_v36 = vpop.eup %4093  ;;  %v2973_v31 = vmul.f32 1.442695, %v2953_v17 }
 0xaed   : > { %2937 = vmax.xlane.f32.xlu2 %v6160_v8  ;;  %3003 = vadd.xlane.f32.xlu1 %v6163_v36 }
 0xaee   : > { %4095 = vpow2.f32 %v2973_v31 }
 0xaf1   : > { %v2928_v10 = vpop.xlane.xlu2 %2927 }
 0xaf2   : > { %v2954_v12 = vsub.f32 %v6107_v13, %v2928_v10  ;;  %v2911_v61 = vpop.f32.mrf.mxu1 }
 0xaf3   : > { %v6200_v9 = vadd.f32 %v3797_v56, %v2911_v61 }
 0xaf4   : > { %v6173_v55 = vpop.eup %4095  ;;  %v2975_v60 = vmul.f32 1.442695, %v2954_v12 }
 0xaf5   : > { %3005 = vadd.xlane.f32.xlu0 %v6173_v55  ;;  %2939 = vmax.xlane.f32.xlu1 %v6170_v50 }
 0xaf6   : > { %4097 = vpow2.f32 %v2975_v60 }
 0xaf9   : > { %v2930_v45 = vpop.xlane.xlu0 %2929 }
 0xafa   : > { %v2955_v28 = vsub.f32 %v6113_v20, %v2930_v45  ;;  %v2914_v34 = vpop.f32.mrf.mxu1 }
 0xafc   : > { %v6183_v3 = vpop.eup %4097  ;;  %v2977_v13 = vmul.f32 1.442695, %v2955_v28 }
 0xafd   : > { %3007 = vadd.xlane.f32.xlu2 %v6183_v3  ;;  %2941 = vmax.xlane.f32.xlu0 %v6180_v24 }
 0xafe   : > { %4099 = vpow2.f32 %v2977_v13 }
 0xb01   : > { %v2932_v0 = vpop.xlane.xlu2 %2931 }
 0xb02   : > { %v2956_v41 = vsub.f32 %v6119_v4, %v2932_v0  ;;  %v3798_v4 = vld [vmem:[%s6377_s3 + $0x1f8] sm:$0xff] }
 0xb03   : > { %v6209_v17 = vadd.f32 %v3798_v4, %v2914_v34 }
 0xb04   : > { %v6193_v49 = vpop.eup %4099  ;;  %v2979_v20 = vmul.f32 1.442695, %v2956_v41 }
 0xb05   : > { %2943 = vmax.xlane.f32.xlu2 %v6190_v7  ;;  %3009 = vadd.xlane.f32.xlu1 %v6193_v49 }
 0xb06   : > { %4101 = vpow2.f32 %v2979_v20 }
 0xb0c   : > { %v6202_v43 = vpop.eup %4101 }
 0xb0d   : > { %3011 = vadd.xlane.f32.xlu0 %v6202_v43  ;;  %2945 = vmax.xlane.f32.xlu1 %v6200_v9 }
 0xb15   : > { %2947 = vmax.xlane.f32.xlu0 %v6209_v17 }
 0xb48   : > { %v2998_v31 = vpop.xlane.xlu1 %2997 }
 0xb49   : > { %4103 = vrcp.f32 %v2998_v31 }
 0xb4f   : > { %v4104_v44 = vpop.eup %4103 }
 0xb50   : > { %v3045_v63 = vmul.f32 %v4104_v44, %v6134_v47  ;;  %v2934_v10 = vpop.xlane.xlu1 %2933  ;;  %v3000_v12 = vpop.xlane.xlu0 %2999 }
 0xb51   : > { %v2957_v60 = vsub.f32 %v6140_v35, %v2934_v10  ;;  %4105 = vrcp.f32 %v3000_v12 }
 0xb52   : > { %3077 = vmatmul.f32.vlgmr.msra.gmra.mxu2 %v3045_v63 }
 0xb53   : > { %v2981_v25 = vmul.f32 1.442695, %v2957_v60 }
 0xb55   : > { %4107 = vpow2.f32 %v2981_v25 }
 0xb57   : > { %v4106_v45 = vpop.eup %4105 }
 0xb58   : > { %v3002_v28 = vpop.xlane.xlu2 %3001  ;;  %v2936_v19 = vpop.xlane.xlu0 %2935  ;;  %v3046_v13 = vmul.f32 %v4106_v45, %v6143_v39 }
 0xb59   : > { %4109 = vrcp.f32 %v3002_v28  ;;  %v2958_v26 = vsub.f32 %v6150_v29, %v2936_v19 }
 0xb5a   : > { %3080 = vmatmul.f32.gmra.mxu2 %v3046_v13 }
 0xb5b   : > { %v6216_v0 = vpop.eup %4107  ;;  %v2983_v47 = vmul.f32 1.442695, %v2958_v26 }
 0xb5c   : > { %3013 = vadd.xlane.f32.xlu2 %v6216_v0 }
 0xb5d   : > { %4111 = vpow2.f32 %v2983_v47 }
 0xb5f   : > { %v4110_v35 = vpop.eup %4109 }
 0xb60   : > { %v2938_v41 = vpop.xlane.xlu2 %2937  ;;  %v3004_v20 = vpop.xlane.xlu1 %3003  ;;  %v3047_v61 = vmul.f32 %v4110_v35, %v6153_v62 }
 0xb61   : > { %v2959_v56 = vsub.f32 %v6160_v8, %v2938_v41  ;;  %4113 = vrcp.f32 %v3004_v20 }
 0xb62   : > { %3083 = vmatmul.f32.gmra.mxu2 %v3047_v61 }
 0xb63   : > { %v6221_v39 = vpop.eup %4111  ;;  %v2985_v4 = vmul.f32 1.442695, %v2959_v56 }
 0xb64   : > { %3015 = vadd.xlane.f32.xlu1 %v6221_v39 }
 0xb65   : > { %4115 = vpow2.f32 %v2985_v4 }
 0xb67   : > { %v4114_v29 = vpop.eup %4113 }
 0xb68   : > { %v2940_v34 = vpop.xlane.xlu1 %2939  ;;  %v3006_v31 = vpop.xlane.xlu0 %3005  ;;  %v3048_v44 = vmul.f32 %v4114_v29, %v6163_v36 }
 0xb69   : > { %v2960_v63 = vsub.f32 %v6170_v50, %v2940_v34  ;;  %4117 = vrcp.f32 %v3006_v31 }
 0xb6a   : > { %3086 = vmatmul.f32.gmra.mxu2 %v3048_v44 }
 0xb6b   : > { %v6226_v62 = vpop.eup %4115  ;;  %v2987_v8 = vmul.f32 1.442695, %v2960_v63 }
 0xb6c   : > { %3017 = vadd.xlane.f32.xlu2 %v6226_v62 }
 0xb6d   : > { %4119 = vpow2.f32 %v2987_v8 }
 0xb6f   : > { %v4118_v10 = vpop.eup %4117 }
 0xb70   : > { %v3008_v12 = vpop.xlane.xlu2 %3007  ;;  %v2942_v60 = vpop.xlane.xlu0 %2941  ;;  %v3049_v25 = vmul.f32 %v4118_v10, %v6173_v55 }
 0xb71   : > { %4121 = vrcp.f32 %v3008_v12  ;;  %v2961_v45 = vsub.f32 %v6180_v24, %v2942_v60 }
 0xb72   : > { %3089 = vmatmul.f32.gmra.mxu2 %v3049_v25 }
 0xb73   : > { %v6231_v36 = vpop.eup %4119  ;;  %v2989_v50 = vmul.f32 1.442695, %v2961_v45 }
 0xb74   : > { %3019 = vadd.xlane.f32.xlu0 %v6231_v36 }
 0xb75   : > { %4123 = vpow2.f32 %v2989_v50 }
 0xb77   : > { %v4122_v28 = vpop.eup %4121 }
 0xb78   : > { %v2944_v19 = vpop.xlane.xlu2 %2943  ;;  %v3010_v13 = vpop.xlane.xlu1 %3009  ;;  %v3050_v26 = vmul.f32 %v4122_v28, %v6183_v3 }
 0xb79   : > { %v2962_v47 = vsub.f32 %v6190_v7, %v2944_v19  ;;  %4125 = vrcp.f32 %v3010_v13 }
 0xb7a   : > { %3092 = vmatmul.f32.gmra.mxu2 %v3050_v26 }
 0xb7b   : > { %v4124_v55 = vpop.eup %4123  ;;  %v2991_v35 = vmul.f32 1.442695, %v2962_v47 }
 0xb7c   : > { %3021 = vadd.xlane.f32.xlu1 %v4124_v55 }
 0xb7d   : > { %4127 = vpow2.f32 %v2991_v35 }
 0xb7f   : > { %v4126_v24 = vpop.eup %4125 }
 0xb80   : > { %v2946_v41 = vpop.xlane.xlu1 %2945  ;;  %v3012_v20 = vpop.xlane.xlu0 %3011  ;;  %v3051_v61 = vmul.f32 %v4126_v24, %v6193_v49 }
 0xb81   : > { %v2963_v56 = vsub.f32 %v6200_v9, %v2946_v41  ;;  %4129 = vrcp.f32 %v3012_v20  ;;  %v3831_v9 = vld [vmem:[%s6378_s4 + $0x18] sm:$0xff] }
 0xb82   : > { %3095 = vmatmul.f32.gmra.mxu2 %v3051_v61  ;;  %3191 = vmatpush.msrb.mxu3 %v3831_v9 }
 0xb83   : > { %v4128_v4 = vpop.eup %4127  ;;  %v2993_v29 = vmul.f32 1.442695, %v2963_v56 }
 0xb84   : > { %3023 = vadd.xlane.f32.xlu2 %v4128_v4 }
 0xb85   : > { %4131 = vpow2.f32 %v2993_v29 }
 0xb87   : > { %v4130_v3 = vpop.eup %4129 }
 0xb88   : > { %v2948_v7 = vpop.xlane.xlu0 %2947  ;;  %v3052_v34 = vmul.f32 %v4130_v3, %v6202_v43 }
 0xb89   : > { %v2964_v31 = vsub.f32 %v6209_v17, %v2948_v7 }
 0xb8a   : > { %3098 = vmatmul.f32.gmra.mxu2 %v3052_v34 }
 0xb8b   : > { %v4132_v44 = vpop.eup %4131  ;;  %v2995_v63 = vmul.f32 1.442695, %v2964_v31 }
 0xb8c   : > { %3025 = vadd.xlane.f32.xlu0 %v4132_v44 }
 0xb8d   : > { %4133 = vpow2.f32 %v2995_v63 }
 0xb93   : > { %v4134_v49 = vpop.eup %4133 }
 0xb94   : > { %3027 = vadd.xlane.f32.xlu1 %v4134_v49 }
 0xbcf   : > { %v3014_v8 = vpop.xlane.xlu2 %3013 }
 0xbd0   : > { %4135 = vrcp.f32 %v3014_v8 }
 0xbd5   : > { %v3078_v10 = vpop.f32.mrf.mxu2 }
 0xbd6   : > { %v4136_v12 = vpop.eup %4135  ;;  %3832 = vmatmul.msk.f32.vlgmr.msrb.gmra.mxu3 %vm559_vm1, %v3078_v10  ;;  %v6261_v10 = vld [vmem:[%s6379_s5] ss:$0 sm:$0xff] }
 0xbd7   : > { %v3016_v43 = vpop.xlane.xlu1 %3015  ;;  %v3053_v17 = vmul.f32 %v4136_v12, %v6216_v0 }
 0xbd8   : > { %4137 = vrcp.f32 %v3016_v43 }
 0xbd9   : > { %3101 = vmatmul.f32.gmra.mxu2 %v3053_v17 }
 0xbdd   : > { %v3081_v60 = vpop.f32.mrf.mxu2 }
 0xbde   : > { %v4138_v25 = vpop.eup %4137  ;;  %3833 = vmatmul.msk.f32.gmra.mxu3 %vm559_vm1, %v3081_v60 }
 0xbdf   : > { %v3018_v45 = vpop.xlane.xlu2 %3017  ;;  %v3054_v50 = vmul.f32 %v4138_v25, %v6221_v39 }
 0xbe0   : > { %4139 = vrcp.f32 %v3018_v45  ;;  %v1730_v45 = vadd.f32 %v5445_v6, %v5371_v16 }
 0xbe1   : > { %3104 = vmatmul.f32.gmra.mxu2 %v3054_v50 }
 0xbe5   : > { %v3084_v28 = vpop.f32.mrf.mxu2 }
 0xbe6   : > { %v4140_v19 = vpop.eup %4139  ;;  %3834 = vmatmul.msk.f32.gmra.mxu3 %vm559_vm1, %v3084_v28 }
 0xbe7   : > { %v3020_v13 = vpop.xlane.xlu0 %3019  ;;  %v3055_v26 = vmul.f32 %v4140_v19, %v6226_v62  ;;  %v1733_v19 = vadd.f32 %v5460_v21, %v5393_v59 }
 0xbe8   : > { %4141 = vrcp.f32 %v3020_v13 }
 0xbe9   : > { %3107 = vmatmul.f32.gmra.mxu2 %v3055_v26  ;;  %v2501_v16 = vadd.f32 %v5989_v5, %v1733_v19  ;;  %v6409_v19 = vld [vmem:[#allocation7_spill] sm:$0xff] }
 0xbed   : > { %v3087_v0 = vpop.f32.mrf.mxu2 }
 0xbee   : > { %v4142_v47 = vpop.eup %4141  ;;  %3835 = vmatmul.msk.f32.gmra.mxu3 %vm559_vm1, %v3087_v0  ;;  %v1736_v0 = vadd.f32 %v5476_v11, %v5402_v54 }
 0xbef   : > { %v3022_v35 = vpop.xlane.xlu1 %3021  ;;  %v3056_v24 = vmul.f32 %v4142_v47, %v6231_v36 }
 0xbf0   : > { %4143 = vrcp.f32 %v3022_v35  ;;  %v2502_v59 = vadd.f32 %v5995_v23, %v1736_v0  ;;  %v6411_v0 = vld [vmem:[#allocation9_spill] sm:$0xff] }
 0xbf1   : > { %3110 = vmatmul.f32.gmra.mxu2 %v3056_v24  ;;  %v1739_v24 = vadd.f32 %v5488_v1, %v5420_v14 }
 0xbf3   : > { %v2503_v54 = vadd.f32 %v6004_v2, %v1739_v24  ;;  %v6413_v24 = vld [vmem:[#allocation11_spill] sm:$0xff] }
 0xbf5   : > { %v3090_v39 = vpop.f32.mrf.mxu2 }
 0xbf6   : > { %v4144_v41 = vpop.eup %4143  ;;  %3836 = vmatmul.msk.f32.gmra.mxu3 %vm559_vm1, %v3090_v39 }
 0xbf7   : > { %v3024_v20 = vpop.xlane.xlu2 %3023  ;;  %v3057_v61 = vmul.f32 %v4144_v41, %v4124_v55 }
 0xbf8   : > { %4145 = vrcp.f32 %v3024_v20  ;;  %v1742_v20 = vadd.f32 %v5499_v51, %v5437_v32 }
 0xbf9   : > { %3113 = vmatmul.f32.gmra.mxu2 %v3057_v61 }
 0xbfa   : > { %v2504_v14 = vadd.f32 %v6010_v38, %v1742_v20 }
 0xbfd   : > { %v3093_v62 = vpop.f32.mrf.mxu2 }
 0xbfe   : > { %v4146_v56 = vpop.eup %4145  ;;  %3837 = vmatmul.msk.f32.gmra.mxu3 %vm559_vm1, %v3093_v62 }
 0xbff   : > { %v3026_v29 = vpop.xlane.xlu0 %3025  ;;  %v3058_v3 = vmul.f32 %v4146_v56, %v4128_v4  ;;  %v1724_v4 = vadd.f32 %v5407_v27, %v5340_v37  ;;  %v1727_v27 = vadd.f32 %v5424_v40, %v5353_v22  ;;  %v2500_v22 = vadd.f32 %v5982_v58, %v1730_v45  ;;  %v6400_v56 = vld [vmem:[#allocation6_spill] sm:$0xff]  ;;  %v6407_v45 = vld [vmem:[#allocation5_spill] sm:$0xff] }
 0xc00   : > { %4147 = vrcp.f32 %v3026_v29  ;;  %v1745_v29 = vadd.f32 %v6400_v56, %v5457_v57 }
 0xc01   : > { %3116 = vmatmul.f32.gmra.mxu2 %v3058_v3  ;;  %v2498_v8 = vadd.f32 %v5963_v52, %v1724_v4  ;;  %v2499_v52 = vadd.f32 %v5976_v15, %v1727_v27  ;;  %v6404_v4 = vld [vmem:[#allocation10_spill] sm:$0xff]  ;;  %v6405_v27 = vld [vmem:[#allocation4_spill] sm:$0xff] }
 0xc02   : > { %v2505_v32 = vadd.f32 %v6017_v48, %v1745_v29 }
 0xc05   : > { %v3096_v7 = vpop.f32.mrf.mxu2 }
 0xc06   : > { %v4148_v36 = vpop.eup %4147  ;;  %3838 = vmatmul.msk.f32.gmra.mxu3 %vm559_vm1, %v3096_v7 }
 0xc07   : > { %v3028_v34 = vpop.xlane.xlu1 %3027  ;;  %v3059_v31 = vmul.f32 %v4148_v36, %v4132_v44  ;;  %v6401_v36 = vld [vmem:[#allocation2_spill] sm:$0xff] }
 0xc08   : > { %4149 = vrcp.f32 %v3028_v34  ;;  %v6402_v34 = vld [vmem:[#allocation8_spill] sm:$0xff] }
 0xc09   : > { %3119 = vmatmul.f32.gmra.mxu2 %v3059_v31  ;;  %v1748_v31 = vadd.f32 %v6402_v34, %v6401_v36 }
 0xc0d   : > { %v3099_v55 = vpop.f32.mrf.mxu2 }
 0xc0e   : > { %v4150_v63 = vpop.eup %4149  ;;  %3839 = vmatmul.msk.f32.gmra.mxu3 %vm559_vm1, %v3099_v55  ;;  %v2506_v55 = vadd.f32 %v6022_v30, %v1748_v31 }
 0xc0f   : > { %v3060_v9 = vmul.f32 %v4150_v63, %v4134_v49 }
 0xc11   : > { %3122 = vmatmul.f32.gmra.mxu2 %v3060_v9  ;;  %v6403_v9 = vld [vmem:[#allocation3_spill] sm:$0xff] }
 0xc59   : > { %v3193_v12 = vpop.f32.mrf.mxu3 }
 0xc5a   : > { %v3241_v44 = vadd.f32 %v3193_v12, %v2498_v8  ;;  %v1751_v8 = vadd.f32 %v6404_v4, %v6403_v9 }
 0xc5c   : > { %v3261_v49 = vadd.f32 %v6261_v10, %v3241_v44  ;;  %v3102_v37 = vpop.f32.mrf.mxu2  ;;  %v2507_v12 = vadd.f32 %v6026_v42, %v1751_v8 }
 0xc5d   : > { %3840 = vmatmul.msk.f32.gmra.mxu3 %vm559_vm1, %v3102_v37 }
 0xc5e   : > { %3277 = vst.msk [vmem:[%s6268_s23] sm:$0xff] %vm279_vm0, %v3261_v49 }
 0xc61   : > { %v3196_v43 = vpop.f32.mrf.mxu3 }
 0xc62   : > { %v3242_v17 = vadd.f32 %v3196_v43, %v2499_v52  ;;  %v6406_v52 = vld [vmem:[#allocation12_spill] sm:$0xff] }
 0xc63   : > { %v1754_v30 = vadd.f32 %v6406_v52, %v6405_v27 }
 0xc64   : > { %v3262_v60 = vadd.f32 %v6261_v10, %v3242_v17  ;;  %v3105_v25 = vpop.f32.mrf.mxu2 }
 0xc65   : > { %3841 = vmatmul.msk.f32.gmra.mxu3 %vm559_vm1, %v3105_v25  ;;  %v2508_v43 = vadd.f32 %v6030_v46, %v1754_v30 }
 0xc66   : > { %3278 = vst.msk [vmem:[%s6268_s23 + $0x8] sm:$0xff] %vm279_vm0, %v3262_v60 }
 0xc69   : > { %v3199_v40 = vpop.f32.mrf.mxu3 }
 0xc6a   : > { %v3243_v50 = vadd.f32 %v3199_v40, %v2500_v22  ;;  %v6408_v22 = vld [vmem:[#allocation14_spill] sm:$0xff] }
 0xc6b   : > { %v1757_v42 = vadd.f32 %v6408_v22, %v6407_v45 }
 0xc6c   : > { %v3263_v28 = vadd.f32 %v6261_v10, %v3243_v50  ;;  %v3108_v15 = vpop.f32.mrf.mxu2 }
 0xc6d   : > { %3842 = vmatmul.msk.f32.gmra.mxu3 %vm559_vm1, %v3108_v15  ;;  %v2509_v40 = vadd.f32 %v6036_v33, %v1757_v42 }
 0xc6e   : > { %3279 = vst.msk [vmem:[%s6268_s23 + $0x10] sm:$0xff] %vm279_vm0, %v3263_v28 }
 0xc71   : > { %v3202_v6 = vpop.f32.mrf.mxu3 }
 0xc72   : > { %v3244_v13 = vadd.f32 %v3202_v6, %v2501_v16  ;;  %v6410_v16 = vld [vmem:[#allocation15_spill] sm:$0xff] }
 0xc73   : > { %v1760_v46 = vadd.f32 %v6410_v16, %v6409_v19 }
 0xc74   : > { %v3264_v26 = vadd.f32 %v6261_v10, %v3244_v13  ;;  %v3111_v58 = vpop.f32.mrf.mxu2 }
 0xc75   : > { %3843 = vmatmul.msk.f32.gmra.mxu3 %vm559_vm1, %v3111_v58  ;;  %v2510_v6 = vadd.f32 %v6040_v53, %v1760_v46 }
 0xc76   : > { %3280 = vst.msk [vmem:[%s6268_s23 + $0x18] sm:$0xff] %vm279_vm0, %v3264_v26 }
 0xc79   : > { %v3205_v21 = vpop.f32.mrf.mxu3 }
 0xc7a   : > { %v3245_v47 = vadd.f32 %v3205_v21, %v2502_v59  ;;  %v6412_v59 = vld [vmem:[#allocation16_spill] sm:$0xff] }
 0xc7b   : > { %v1763_v33 = vadd.f32 %v6412_v59, %v6411_v0 }
 0xc7c   : > { %v3265_v35 = vadd.f32 %v6261_v10, %v3245_v47  ;;  %v3114_v5 = vpop.f32.mrf.mxu2 }
 0xc7d   : > { %3844 = vmatmul.msk.f32.gmra.mxu3 %vm559_vm1, %v3114_v5  ;;  %v2511_v21 = vadd.f32 %v6046_v18, %v1763_v33  ;;  %v6418_v18 = vld [vmem:[#allocation20_spill] sm:$0xff] }
 0xc7e   : > { %3281 = vst.msk [vmem:[%s6268_s23 + $0x20] sm:$0xff] %vm279_vm0, %v3265_v35 }
 0xc81   : > { %v3208_v11 = vpop.f32.mrf.mxu3 }
 0xc82   : > { %v3246_v39 = vadd.f32 %v3208_v11, %v2503_v54  ;;  %v6414_v54 = vld [vmem:[#allocation17_spill] sm:$0xff]  ;;  %v6415_v11 = vld [vmem:[#allocation19_spill] sm:$0xff] }
 0xc83   : > { %v1766_v53 = vadd.f32 %v6414_v54, %v6413_v24 }
 0xc84   : > { %v3266_v41 = vadd.f32 %v6261_v10, %v3246_v39  ;;  %v3117_v23 = vpop.f32.mrf.mxu2 }
 0xc85   : > { %3845 = vmatmul.msk.f32.gmra.mxu3 %vm559_vm1, %v3117_v23  ;;  %v2512_v39 = vadd.f32 %v6415_v11, %v1766_v53 }
 0xc86   : > { %3282 = vst.msk [vmem:[%s6268_s23 + $0x28] sm:$0xff] %vm279_vm0, %v3266_v41 }
 0xc89   : > { %v3211_v1 = vpop.f32.mrf.mxu3 }
 0xc8a   : > { %v3247_v61 = vadd.f32 %v3211_v1, %v2504_v14  ;;  %v6416_v14 = vld [vmem:[#allocation13_spill] sm:$0xff]  ;;  %v6417_v1 = vld [vmem:[#allocation18_spill] sm:$0xff] }
 0xc8c   : > { %v3267_v62 = vadd.f32 %v6261_v10, %v3247_v61  ;;  %v3120_v2 = vpop.f32.mrf.mxu2  ;;  %v1769_v61 = vadd.f32 %v6417_v1, %v6416_v14 }
 0xc8d   : > { %3846 = vmatmul.msk.f32.gmra.mxu3 %vm559_vm1, %v3120_v2 }
 0xc8e   : > { %3283 = vst.msk [vmem:[%s6268_s23 + $0x30] sm:$0xff] %vm279_vm0, %v3267_v62  ;;  %v2513_v62 = vadd.f32 %v6418_v18, %v1769_v61 }
 0xc91   : > { %v3214_v51 = vpop.f32.mrf.mxu3 }
 0xc92   : > { %v3248_v3 = vadd.f32 %v3214_v51, %v2505_v32 }
 0xc94   : > { %v3268_v7 = vadd.f32 %v6261_v10, %v3248_v3  ;;  %v3123_v38 = vpop.f32.mrf.mxu2 }
 0xc95   : > { %3847 = vmatmul.msk.f32.gmra.mxu3 %vm559_vm1, %v3123_v38 }
 0xc96   : > { %3284 = vst.msk [vmem:[%s6268_s23 + $0x38] sm:$0xff] %vm279_vm0, %v3268_v7 }
 0xce0   : > { %v3217_v57 = vpop.f32.mrf.mxu3 }
 0xce1   : > { %v3249_v63 = vadd.f32 %v3217_v57, %v2506_v55 }
 0xce3   : > { %v3269_v48 = vadd.f32 %v6261_v10, %v3249_v63 }
 0xce5   : > { %3285 = vst.msk [vmem:[%s6268_s23 + $0x40] sm:$0xff] %vm279_vm0, %v3269_v48 }
 0xce8   : > { %v3220_v44 = vpop.f32.mrf.mxu3 }
 0xce9   : > { %v3250_v49 = vadd.f32 %v3220_v44, %v2507_v12 }
 0xceb   : > { %v3270_v37 = vadd.f32 %v6261_v10, %v3250_v49 }
 0xced   : > { %3286 = vst.msk [vmem:[%s6268_s23 + $0x48] sm:$0xff] %vm279_vm0, %v3270_v37 }
 0xcf0   : > { %v3223_v17 = vpop.f32.mrf.mxu3 }
 0xcf1   : > { %v3251_v60 = vadd.f32 %v3223_v17, %v2508_v43 }
 0xcf3   : > { %v3271_v25 = vadd.f32 %v6261_v10, %v3251_v60 }
 0xcf5   : > { %3287 = vst.msk [vmem:[%s6268_s23 + $0x50] sm:$0xff] %vm279_vm0, %v3271_v25 }
 0xcf8   : > { %v3226_v50 = vpop.f32.mrf.mxu3 }
 0xcf9   : > { %v3252_v28 = vadd.f32 %v3226_v50, %v2509_v40 }
 0xcfb   : > { %v3272_v15 = vadd.f32 %v6261_v10, %v3252_v28 }
 0xcfd   : > { %3288 = vst.msk [vmem:[%s6268_s23 + $0x58] sm:$0xff] %vm279_vm0, %v3272_v15 }
 0xd00   : > { %v3229_v13 = vpop.f32.mrf.mxu3 }
 0xd01   : > { %v3253_v26 = vadd.f32 %v3229_v13, %v2510_v6 }
 0xd03   : > { %v3273_v58 = vadd.f32 %v6261_v10, %v3253_v26 }
 0xd05   : > { %3289 = vst.msk [vmem:[%s6268_s23 + $0x60] sm:$0xff] %vm279_vm0, %v3273_v58 }
 0xd08   : > { %v3232_v47 = vpop.f32.mrf.mxu3 }
 0xd09   : > { %v3254_v35 = vadd.f32 %v3232_v47, %v2511_v21 }
 0xd0b   : > { %v3274_v5 = vadd.f32 %v6261_v10, %v3254_v35 }
 0xd0d   : > { %3290 = vst.msk [vmem:[%s6268_s23 + $0x68] sm:$0xff] %vm279_vm0, %v3274_v5 }
 0xd10   : > { %v3235_v41 = vpop.f32.mrf.mxu3 }
 0xd11   : > { %v3255_v23 = vadd.f32 %v3235_v41, %v2512_v39 }
 0xd13   : > { %v3275_v20 = vadd.f32 %v6261_v10, %v3255_v23 }
 0xd15   : > { %3291 = vst.msk [vmem:[%s6268_s23 + $0x70] sm:$0xff] %vm279_vm0, %v3275_v20 }
 0xd18   : > { %v3238_v2 = vpop.f32.mrf.mxu3 }
 0xd19   : > { %v3256_v56 = vadd.f32 %v3238_v2, %v2513_v62 }
 0xd1b   : > { %v3276_v29 = vadd.f32 %v6261_v10, %v3256_v56 }
 0xd1d   : > { %3292 = vst.msk [vmem:[%s6268_s23 + $0x78] sm:$0xff] %vm279_vm0, %v3276_v29 }
 0xd1e PF: > { %s16_s21 = sadd.s32 1, %s4201_s21  }
 0xd1f   : > { %p13_p4 = scmp.ge.s32.totalorder %s16_s21, 10  }
 0xd21   :  { %15 = sbr.rel (!%p13_p4) target bundleno = 1 (0x1), region = 102 }

</bundles_post_ra>
